<compile_context>
chip_gen: v7x
topology: tpu7x:2x2x1
jax: 0.10.0
libtpu: 0.0.40
codegen_flags: <defaults>
</compile_context>

<pallas_src>
import functools

import jax
import jax.numpy as jnp
from jax import lax
from jax.experimental import pallas as pl
from jax.experimental.pallas import tpu as pltpu

L = 110        # sequence length fixed by the module (CrossPatch(length=110))
IN_FEATS = 4   # ResMLP.embed = nn.Linear(4, embed_dim)
TB = 8         # samples per grid step (lane width TB*E = 256 at E=32)


def _gelu_exact(x):
    # torch.nn.GELU() default: 0.5 * x * (1 + erf(x / sqrt(2)))
    return 0.5 * x * (1.0 + lax.erf(x * 0.7071067811865476))


def _block_diag(w, k):
    """w: [..., A, B] -> [..., k*A, k*B], k copies of w on the diagonal."""
    *lead, a, b = w.shape
    eye = jnp.eye(k, dtype=w.dtype)
    bd = eye[:, None, :, None] * w[..., None, :, None, :]
    return bd.reshape(*lead, k * a, k * b)


def _tile_last(a, k):
    """Tile the last axis k times (sample-major lane layout: col = t*D + d)."""
    return jnp.tile(a, (1,) * (a.ndim - 1) + (k,))


def resmlp_kernel(x_ref, we_ref, be_ref,
                  cp_w_ref, cp_aff_ref, cp_bias_ref,
                  cc_aff_ref, cc_w1_ref, cc_b1_ref, cc_w2_ref, cc_b2_ref,
                  wo_ref, bo_ref, out_ref, *, n_blocks, inv_len):
    # x_ref block: (1, L, TB*IN_FEATS) -> one contiguous DMA for TB samples.
    x = x_ref[0]                                                  # [L, TB*4]

    # embed: one block-diagonal GEMM for all TB samples (K=TB*4, N=TB*E lanes)
    # instead of a degenerate K=4 MXU pass per sample.
    h = jnp.dot(x, we_ref[...], preferred_element_type=jnp.float32) + be_ref[...]

    # NOTE: static unroll is fine for small n_blocks; for large n_blocks this
    # should become a lax.fori_loop with dynamic ref indexing (bounds live
    # ranges / code size).
    for b in range(n_blocks):
        # ---------------- CrossPatch ----------------
        aff = cp_aff_ref[b]               # [3, TB*E]: alpha1, beta1, alpha2 (lane-tiled)
        u = h * aff[0:1] + aff[1:2]                                # Aff1
        # patch-mix: [L, L] @ [L, TB*E] -> full 256-lane MXU output
        z = jnp.dot(cp_w_ref[b], u, preferred_element_type=jnp.float32)
        # Linear bias and Aff2 beta are pre-folded into cp_bias_ref (wrapper).
        h = h + z * aff[2:3] + cp_bias_ref[b]

        # ---------------- CrossChannel ----------------
        ca = cc_aff_ref[b]                # [2, TB*E]
        u = h * ca[0:1] + ca[1:2]                                  # Aff
        # block-diagonal weights: [L, TB*E] @ [TB*E, TB*H] -> [L, TB*H]
        hid = jnp.dot(u, cc_w1_ref[b],
                      preferred_element_type=jnp.float32) + cc_b1_ref[b]
        g = _gelu_exact(hid)              # Dropout: identity at inference.
        o = jnp.dot(g, cc_w2_ref[b],
                    preferred_element_type=jnp.float32) + cc_b2_ref[b]
        h = h + o

    # mean over L: VPU/XLU sublane reduction (no MXU); head: one tiny batched
    # GEMM producing the lane-dense (1, TB) output row for all TB samples.
    m = jnp.sum(h, axis=0, keepdims=True) * inv_len                # [1, TB*E]
    y = jnp.dot(m, wo_ref[...], preferred_element_type=jnp.float32) + bo_ref[...]
    out_ref[...] = y.reshape(1, 1, -1)                             # [1, 1, TB]


def resmlp_forward(x, p, n_blocks, tb=TB):
    """x: [N, L, 4] float32 -> [N] float32"""
    N = x.shape[0]
    G = (N + tb - 1) // tb
    n_pad = G * tb

    # ---- XLA-side packing (pure layout plumbing, done once) ----
    xp = jnp.pad(x, ((0, n_pad - N), (0, 0), (0, 0)))
    # [G, L, TB*4] with lane index = t*4 + k  (sample-major)
    x_wide = xp.reshape(G, tb, L, IN_FEATS).transpose(0, 2, 1, 3).reshape(
        G, L, tb * IN_FEATS)

    we_bd = _block_diag(p["we"], tb)                               # [TB*4, TB*E]
    be_t = _tile_last(p["be"], tb)                                 # [1, TB*E]

    a1, b1 = p["cp_aff"][:, 0:1, :], p["cp_aff"][:, 1:2, :]
    a2, b2 = p["cp_aff"][:, 2:3, :], p["cp_aff"][:, 3:4, :]
    cp_aff_t = _tile_last(jnp.concatenate([a1, b1, a2], axis=1), tb)  # [NB,3,TB*E]
    cp_bias_t = _tile_last(p["cp_b"] * a2 + b2, tb)                   # [NB,L,TB*E]
    cc_aff_t = _tile_last(p["cc_aff"], tb)                            # [NB,2,TB*E]
    cc_w1_bd = _block_diag(p["cc_w1"], tb)                            # [NB,TB*E,TB*H]
    cc_w2_bd = _block_diag(p["cc_w2"], tb)                            # [NB,TB*H,TB*E]
    cc_b1_t = _tile_last(p["cc_b1"], tb)                              # [NB,1,TB*H]
    cc_b2_t = _tile_last(p["cc_b2"], tb)                              # [NB,1,TB*E]
    wo_bd = _block_diag(p["wo"], tb)                                  # [TB*E, TB]
    bo_t = jnp.tile(p["bo"], (1, tb))                                 # [1, TB]

    def const(arr):
        nd = arr.ndim
        return pl.BlockSpec(arr.shape, lambda g, _nd=nd: (0,) * _nd)

    kernel = functools.partial(resmlp_kernel, n_blocks=n_blocks, inv_len=1.0 / L)

    out = pl.pallas_call(
        kernel,
        out_shape=jax.ShapeDtypeStruct((G, 1, tb), jnp.float32),
        grid=(G,),
        in_specs=[
            pl.BlockSpec((1, L, tb * IN_FEATS), lambda g: (g, 0, 0)),  # x tile
            const(we_bd), const(be_t),
            const(p["cp_w"]), const(cp_aff_t), const(cp_bias_t),
            const(cc_aff_t), const(cc_w1_bd), const(cc_b1_t),
            const(cc_w2_bd), const(cc_b2_t),
            const(wo_bd), const(bo_t),
        ],
        out_specs=pl.BlockSpec((1, 1, tb), lambda g: (g, 0, 0)),
        compiler_params=pltpu.CompilerParams(
            dimension_semantics=("parallel",),   # independent samples -> v7x 2x TC
            vmem_limit_bytes=32 * 1024 * 1024,
        ),
    )(x_wide, we_bd, be_t, p["cp_w"], cp_aff_t, cp_bias_t,
      cc_aff_t, cc_w1_bd, cc_b1_t, cc_w2_bd, cc_b2_t, wo_bd, bo_t)
    return out.reshape(n_pad)[:N]


def init_params(key, embed_dim, hidden_dim, n_blocks):
    """Deterministic synthetic init matching the module's parameter shapes.
    Linears: U(-1/sqrt(fan_in), 1/sqrt(fan_in)).  Aff params are perturbed from
    the module's (1, 0) init so the test exercises the affine folding."""
    ks = jax.random.split(key, 16)

    def lin(k, fan_in, shape):
        bound = 1.0 / float(fan_in) ** 0.5
        return jax.random.uniform(k, shape, jnp.float32, -bound, bound)

    E, H, NB = embed_dim, hidden_dim, n_blocks
    cp_aff = jnp.concatenate([
        1.0 + 0.1 * jax.random.normal(ks[10], (NB, 1, E)),   # alpha1
        0.1 * jax.random.normal(ks[11], (NB, 1, E)),         # beta1
        1.0 + 0.1 * jax.random.normal(ks[12], (NB, 1, E)),   # alpha2
        0.1 * jax.random.normal(ks[13], (NB, 1, E)),         # beta2
    ], axis=1).astype(jnp.float32)
    cc_aff = jnp.concatenate([
        1.0 + 0.1 * jax.random.normal(ks[14], (NB, 1, E)),   # alpha
        0.1 * jax.random.normal(ks[15], (NB, 1, E)),         # beta
    ], axis=1).astype(jnp.float32)
    return dict(
        we=lin(ks[0], IN_FEATS, (IN_FEATS, E)),
        be=lin(ks[1], IN_FEATS, (1, E)),
        cp_aff=cp_aff,
        cp_w=lin(ks[2], L, (NB, L, L)),
        cp_b=lin(ks[3], L, (NB, L, 1)),
        cc_aff=cc_aff,
        cc_w1=lin(ks[4], E, (NB, E, H)),
        cc_b1=lin(ks[5], E, (NB, 1, H)),
        cc_w2=lin(ks[6], H, (NB, H, E)),
        cc_b2=lin(ks[7], H, (NB, 1, E)),
        wo=lin(ks[8], E, (E, 1)),
        bo=lin(ks[9], E, (1, 1)),
    )


def resmlp_ref(x, p, n_blocks):
    """Pure-JAX reference (mirrors the PyTorch forward, eval mode)."""
    h = x @ p["we"] + p["be"][0]                                    # [N, L, E]
    for b in range(n_blocks):
        a1, b1_, a2, b2_ = (p["cp_aff"][b, i] for i in range(4))
        u = h * a1 + b1_
        z = jnp.einsum("ij,njc->nic", p["cp_w"][b], u) + p["cp_b"][b][None]
        h = h + (z * a2 + b2_)
        a3, b3_ = p["cc_aff"][b, 0], p["cc_aff"][b, 1]
        u = h * a3 + b3_
        hid = u @ p["cc_w1"][b] + p["cc_b1"][b, 0]
        g = jax.nn.gelu(hid, approximate=False)
        o = g @ p["cc_w2"][b] + p["cc_b2"][b, 0]
        h = h + o
    m = h.mean(axis=1)                                              # [N, E]
    y = m @ p["wo"] + p["bo"][0]                                    # [N, 1]
    return y[:, 0]


if __name__ == "__main__":
    N, EMBED_DIM, HIDDEN_DIM, N_BLOCKS = 2, 32, 64, 2
    key = jax.random.PRNGKey(0)
    kx, kp = jax.random.split(key)
    x = jax.random.normal(kx, (N, L, IN_FEATS), jnp.float32)
    params = init_params(kp, EMBED_DIM, HIDDEN_DIM, N_BLOCKS)

    out = resmlp_forward(x, params, N_BLOCKS)
    out = jax.block_until_ready(out)

    ref = resmlp_ref(x, params, N_BLOCKS)
    assert out.shape == (N,), out.shape
    if not jnp.allclose(out, ref, atol=1e-3, rtol=1e-3):
        raise AssertionError(f"mismatch: kernel={out} ref={ref}")
    print("KERNEL_OK")
</pallas_src>

<mosaic_0001>
module attributes {stable_mosaic.version = 11 : i64} {
  func.func @resmlp_kernel(%arg0: i32, %arg1: memref<1x110x32xf32, #tpu.memory_space<vmem>>, %arg2: memref<32x256xf32, #tpu.memory_space<vmem>>, %arg3: memref<1x256xf32, #tpu.memory_space<vmem>>, %arg4: memref<2x110x110xf32, #tpu.memory_space<vmem>>, %arg5: memref<2x3x256xf32, #tpu.memory_space<vmem>>, %arg6: memref<2x110x256xf32, #tpu.memory_space<vmem>>, %arg7: memref<2x2x256xf32, #tpu.memory_space<vmem>>, %arg8: memref<2x256x512xf32, #tpu.memory_space<vmem>>, %arg9: memref<2x1x512xf32, #tpu.memory_space<vmem>>, %arg10: memref<2x512x256xf32, #tpu.memory_space<vmem>>, %arg11: memref<2x1x256xf32, #tpu.memory_space<vmem>>, %arg12: memref<256x8xf32, #tpu.memory_space<vmem>>, %arg13: memref<1x8xf32, #tpu.memory_space<vmem>>, %arg14: memref<1x1x8xf32, #tpu.memory_space<vmem>>) attributes {dimension_semantics = [#tpu.dimension_semantics<parallel>], iteration_bounds = array<i64: 1>, scalar_prefetch = 0 : i64, scratch_operands = 0 : i64, tpu.core_type = #tpu.core_type<tc>, window_params = [{transform_indices = @transform_0, window_bounds = array<i64: 1, 110, 32>}, {pipeline_mode = #tpu.pipeline_mode<synchronous>, transform_indices = @transform_1, window_bounds = array<i64: 32, 256>}, {pipeline_mode = #tpu.pipeline_mode<synchronous>, transform_indices = @transform_2, window_bounds = array<i64: 1, 256>}, {pipeline_mode = #tpu.pipeline_mode<synchronous>, transform_indices = @transform_3, window_bounds = array<i64: 2, 110, 110>}, {pipeline_mode = #tpu.pipeline_mode<synchronous>, transform_indices = @transform_4, window_bounds = array<i64: 2, 3, 256>}, {pipeline_mode = #tpu.pipeline_mode<synchronous>, transform_indices = @transform_5, window_bounds = array<i64: 2, 110, 256>}, {pipeline_mode = #tpu.pipeline_mode<synchronous>, transform_indices = @transform_6, window_bounds = array<i64: 2, 2, 256>}, {pipeline_mode = #tpu.pipeline_mode<synchronous>, transform_indices = @transform_7, window_bounds = array<i64: 2, 256, 512>}, {pipeline_mode = #tpu.pipeline_mode<synchronous>, transform_indices = @transform_8, window_bounds = array<i64: 2, 1, 512>}, {pipeline_mode = #tpu.pipeline_mode<synchronous>, transform_indices = @transform_9, window_bounds = array<i64: 2, 512, 256>}, {pipeline_mode = #tpu.pipeline_mode<synchronous>, transform_indices = @transform_10, window_bounds = array<i64: 2, 1, 256>}, {pipeline_mode = #tpu.pipeline_mode<synchronous>, transform_indices = @transform_11, window_bounds = array<i64: 256, 8>}, {pipeline_mode = #tpu.pipeline_mode<synchronous>, transform_indices = @transform_12, window_bounds = array<i64: 1, 8>}, {transform_indices = @transform_13, window_bounds = array<i64: 1, 1, 8>}]} {
    %c0 = arith.constant 0 : index
    %c0_0 = arith.constant 0 : index
    %c0_1 = arith.constant 0 : index
    %0 = vector.load %arg1[%c0, %c0_0, %c0_1] : memref<1x110x32xf32, #tpu.memory_space<vmem>>, vector<1x110x32xf32>
    %1 = vector.shape_cast %0 : vector<1x110x32xf32> to vector<110x32xf32>
    %c0_2 = arith.constant 0 : index
    %c0_3 = arith.constant 0 : index
    %2 = vector.load %arg2[%c0_2, %c0_3] : memref<32x256xf32, #tpu.memory_space<vmem>>, vector<32x256xf32>
    %cst = arith.constant dense<0.000000e+00> : vector<110x256xf32>
    %3 = tpu.matmul %1, %2, %cst {dimension_numbers = #tpu.dot_dimension_numbers<[1], [0], [0], [1], [0, 0, 1, 1], [], []>} : vector<110x32xf32>, vector<32x256xf32>, vector<110x256xf32> -> vector<110x256xf32>
    %c0_4 = arith.constant 0 : index
    %c0_5 = arith.constant 0 : index
    %4 = vector.load %arg3[%c0_4, %c0_5] : memref<1x256xf32, #tpu.memory_space<vmem>>, vector<1x256xf32>
    %5 = vector.broadcast %4 : vector<1x256xf32> to vector<110x256xf32>
    %6 = arith.addf %3, %5 : vector<110x256xf32>
    %c0_6 = arith.constant 0 : index
    %c0_7 = arith.constant 0 : index
    %c0_8 = arith.constant 0 : index
    %7 = vector.load %arg5[%c0_6, %c0_7, %c0_8] : memref<2x3x256xf32, #tpu.memory_space<vmem>>, vector<1x3x256xf32>
    %8 = vector.shape_cast %7 : vector<1x3x256xf32> to vector<3x256xf32>
    %9 = vector.extract_strided_slice %8 {offsets = [0, 0], sizes = [1, 256], strides = [1, 1]} : vector<3x256xf32> to vector<1x256xf32>
    %10 = vector.broadcast %9 : vector<1x256xf32> to vector<110x256xf32>
    %11 = arith.mulf %6, %10 : vector<110x256xf32>
    %12 = vector.extract_strided_slice %8 {offsets = [1, 0], sizes = [1, 256], strides = [1, 1]} : vector<3x256xf32> to vector<1x256xf32>
    %13 = vector.broadcast %12 : vector<1x256xf32> to vector<110x256xf32>
    %14 = arith.addf %11, %13 : vector<110x256xf32>
    %c0_9 = arith.constant 0 : index
    %c0_10 = arith.constant 0 : index
    %c0_11 = arith.constant 0 : index
    %15 = vector.load %arg4[%c0_9, %c0_10, %c0_11] : memref<2x110x110xf32, #tpu.memory_space<vmem>>, vector<1x110x110xf32>
    %16 = vector.shape_cast %15 : vector<1x110x110xf32> to vector<110x110xf32>
    %cst_12 = arith.constant dense<0.000000e+00> : vector<110x256xf32>
    %17 = tpu.matmul %16, %14, %cst_12 {dimension_numbers = #tpu.dot_dimension_numbers<[1], [0], [0], [1], [0, 0, 1, 1], [], []>} : vector<110x110xf32>, vector<110x256xf32>, vector<110x256xf32> -> vector<110x256xf32>
    %18 = vector.extract_strided_slice %8 {offsets = [2, 0], sizes = [1, 256], strides = [1, 1]} : vector<3x256xf32> to vector<1x256xf32>
    %19 = vector.broadcast %18 : vector<1x256xf32> to vector<110x256xf32>
    %20 = arith.mulf %17, %19 : vector<110x256xf32>
    %21 = arith.addf %6, %20 : vector<110x256xf32>
    %c0_13 = arith.constant 0 : index
    %c0_14 = arith.constant 0 : index
    %c0_15 = arith.constant 0 : index
    %22 = vector.load %arg6[%c0_13, %c0_14, %c0_15] : memref<2x110x256xf32, #tpu.memory_space<vmem>>, vector<1x110x256xf32>
    %23 = vector.shape_cast %22 : vector<1x110x256xf32> to vector<110x256xf32>
    %24 = arith.addf %21, %23 : vector<110x256xf32>
    %c0_16 = arith.constant 0 : index
    %c0_17 = arith.constant 0 : index
    %c0_18 = arith.constant 0 : index
    %25 = vector.load %arg7[%c0_16, %c0_17, %c0_18] : memref<2x2x256xf32, #tpu.memory_space<vmem>>, vector<1x2x256xf32>
    %26 = vector.shape_cast %25 : vector<1x2x256xf32> to vector<2x256xf32>
    %27 = vector.extract_strided_slice %26 {offsets = [0, 0], sizes = [1, 256], strides = [1, 1]} : vector<2x256xf32> to vector<1x256xf32>
    %28 = vector.broadcast %27 : vector<1x256xf32> to vector<110x256xf32>
    %29 = arith.mulf %24, %28 : vector<110x256xf32>
    %30 = vector.extract_strided_slice %26 {offsets = [1, 0], sizes = [1, 256], strides = [1, 1]} : vector<2x256xf32> to vector<1x256xf32>
    %31 = vector.broadcast %30 : vector<1x256xf32> to vector<110x256xf32>
    %32 = arith.addf %29, %31 : vector<110x256xf32>
    %c0_19 = arith.constant 0 : index
    %c0_20 = arith.constant 0 : index
    %c0_21 = arith.constant 0 : index
    %33 = vector.load %arg8[%c0_19, %c0_20, %c0_21] : memref<2x256x512xf32, #tpu.memory_space<vmem>>, vector<1x256x512xf32>
    %34 = vector.shape_cast %33 : vector<1x256x512xf32> to vector<256x512xf32>
    %cst_22 = arith.constant dense<0.000000e+00> : vector<110x512xf32>
    %35 = tpu.matmul %32, %34, %cst_22 {dimension_numbers = #tpu.dot_dimension_numbers<[1], [0], [0], [1], [0, 0, 1, 1], [], []>} : vector<110x256xf32>, vector<256x512xf32>, vector<110x512xf32> -> vector<110x512xf32>
    %c0_23 = arith.constant 0 : index
    %c0_24 = arith.constant 0 : index
    %c0_25 = arith.constant 0 : index
    %36 = vector.load %arg9[%c0_23, %c0_24, %c0_25] : memref<2x1x512xf32, #tpu.memory_space<vmem>>, vector<1x1x512xf32>
    %37 = vector.shape_cast %36 : vector<1x1x512xf32> to vector<1x512xf32>
    %38 = vector.broadcast %37 : vector<1x512xf32> to vector<110x512xf32>
    %39 = arith.addf %35, %38 : vector<110x512xf32>
    %cst_26 = arith.constant 5.000000e-01 : f32
    %40 = vector.broadcast %cst_26 : f32 to vector<110x512xf32>
    %41 = arith.mulf %40, %39 : vector<110x512xf32>
    %cst_27 = arith.constant 0.707106769 : f32
    %42 = vector.broadcast %cst_27 : f32 to vector<110x512xf32>
    %43 = arith.mulf %39, %42 : vector<110x512xf32>
    %44 = math.erf %43 : vector<110x512xf32>
    %cst_28 = arith.constant 1.000000e+00 : f32
    %45 = vector.broadcast %cst_28 : f32 to vector<110x512xf32>
    %46 = arith.addf %45, %44 : vector<110x512xf32>
    %47 = arith.mulf %41, %46 : vector<110x512xf32>
    %c0_29 = arith.constant 0 : index
    %c0_30 = arith.constant 0 : index
    %c0_31 = arith.constant 0 : index
    %48 = vector.load %arg10[%c0_29, %c0_30, %c0_31] : memref<2x512x256xf32, #tpu.memory_space<vmem>>, vector<1x512x256xf32>
    %49 = vector.shape_cast %48 : vector<1x512x256xf32> to vector<512x256xf32>
    %cst_32 = arith.constant dense<0.000000e+00> : vector<110x256xf32>
    %50 = tpu.matmul %47, %49, %cst_32 {dimension_numbers = #tpu.dot_dimension_numbers<[1], [0], [0], [1], [0, 0, 1, 1], [], []>} : vector<110x512xf32>, vector<512x256xf32>, vector<110x256xf32> -> vector<110x256xf32>
    %c0_33 = arith.constant 0 : index
    %c0_34 = arith.constant 0 : index
    %c0_35 = arith.constant 0 : index
    %51 = vector.load %arg11[%c0_33, %c0_34, %c0_35] : memref<2x1x256xf32, #tpu.memory_space<vmem>>, vector<1x1x256xf32>
    %52 = vector.shape_cast %51 : vector<1x1x256xf32> to vector<1x256xf32>
    %53 = vector.broadcast %52 : vector<1x256xf32> to vector<110x256xf32>
    %54 = arith.addf %50, %53 : vector<110x256xf32>
    %55 = arith.addf %24, %54 : vector<110x256xf32>
    %c1 = arith.constant 1 : index
    %c0_36 = arith.constant 0 : index
    %c0_37 = arith.constant 0 : index
    %56 = vector.load %arg5[%c1, %c0_36, %c0_37] : memref<2x3x256xf32, #tpu.memory_space<vmem>>, vector<1x3x256xf32>
    %57 = vector.shape_cast %56 : vector<1x3x256xf32> to vector<3x256xf32>
    %58 = vector.extract_strided_slice %57 {offsets = [0, 0], sizes = [1, 256], strides = [1, 1]} : vector<3x256xf32> to vector<1x256xf32>
    %59 = vector.broadcast %58 : vector<1x256xf32> to vector<110x256xf32>
    %60 = arith.mulf %55, %59 : vector<110x256xf32>
    %61 = vector.extract_strided_slice %57 {offsets = [1, 0], sizes = [1, 256], strides = [1, 1]} : vector<3x256xf32> to vector<1x256xf32>
    %62 = vector.broadcast %61 : vector<1x256xf32> to vector<110x256xf32>
    %63 = arith.addf %60, %62 : vector<110x256xf32>
    %c1_38 = arith.constant 1 : index
    %c0_39 = arith.constant 0 : index
    %c0_40 = arith.constant 0 : index
    %64 = vector.load %arg4[%c1_38, %c0_39, %c0_40] : memref<2x110x110xf32, #tpu.memory_space<vmem>>, vector<1x110x110xf32>
    %65 = vector.shape_cast %64 : vector<1x110x110xf32> to vector<110x110xf32>
    %cst_41 = arith.constant dense<0.000000e+00> : vector<110x256xf32>
    %66 = tpu.matmul %65, %63, %cst_41 {dimension_numbers = #tpu.dot_dimension_numbers<[1], [0], [0], [1], [0, 0, 1, 1], [], []>} : vector<110x110xf32>, vector<110x256xf32>, vector<110x256xf32> -> vector<110x256xf32>
    %67 = vector.extract_strided_slice %57 {offsets = [2, 0], sizes = [1, 256], strides = [1, 1]} : vector<3x256xf32> to vector<1x256xf32>
    %68 = vector.broadcast %67 : vector<1x256xf32> to vector<110x256xf32>
    %69 = arith.mulf %66, %68 : vector<110x256xf32>
    %70 = arith.addf %55, %69 : vector<110x256xf32>
    %c1_42 = arith.constant 1 : index
    %c0_43 = arith.constant 0 : index
    %c0_44 = arith.constant 0 : index
    %71 = vector.load %arg6[%c1_42, %c0_43, %c0_44] : memref<2x110x256xf32, #tpu.memory_space<vmem>>, vector<1x110x256xf32>
    %72 = vector.shape_cast %71 : vector<1x110x256xf32> to vector<110x256xf32>
    %73 = arith.addf %70, %72 : vector<110x256xf32>
    %c1_45 = arith.constant 1 : index
    %c0_46 = arith.constant 0 : index
    %c0_47 = arith.constant 0 : index
    %74 = vector.load %arg7[%c1_45, %c0_46, %c0_47] : memref<2x2x256xf32, #tpu.memory_space<vmem>>, vector<1x2x256xf32>
    %75 = vector.shape_cast %74 : vector<1x2x256xf32> to vector<2x256xf32>
    %76 = vector.extract_strided_slice %75 {offsets = [0, 0], sizes = [1, 256], strides = [1, 1]} : vector<2x256xf32> to vector<1x256xf32>
    %77 = vector.broadcast %76 : vector<1x256xf32> to vector<110x256xf32>
    %78 = arith.mulf %73, %77 : vector<110x256xf32>
    %79 = vector.extract_strided_slice %75 {offsets = [1, 0], sizes = [1, 256], strides = [1, 1]} : vector<2x256xf32> to vector<1x256xf32>
    %80 = vector.broadcast %79 : vector<1x256xf32> to vector<110x256xf32>
    %81 = arith.addf %78, %80 : vector<110x256xf32>
    %c1_48 = arith.constant 1 : index
    %c0_49 = arith.constant 0 : index
    %c0_50 = arith.constant 0 : index
    %82 = vector.load %arg8[%c1_48, %c0_49, %c0_50] : memref<2x256x512xf32, #tpu.memory_space<vmem>>, vector<1x256x512xf32>
    %83 = vector.shape_cast %82 : vector<1x256x512xf32> to vector<256x512xf32>
    %cst_51 = arith.constant dense<0.000000e+00> : vector<110x512xf32>
    %84 = tpu.matmul %81, %83, %cst_51 {dimension_numbers = #tpu.dot_dimension_numbers<[1], [0], [0], [1], [0, 0, 1, 1], [], []>} : vector<110x256xf32>, vector<256x512xf32>, vector<110x512xf32> -> vector<110x512xf32>
    %c1_52 = arith.constant 1 : index
    %c0_53 = arith.constant 0 : index
    %c0_54 = arith.constant 0 : index
    %85 = vector.load %arg9[%c1_52, %c0_53, %c0_54] : memref<2x1x512xf32, #tpu.memory_space<vmem>>, vector<1x1x512xf32>
    %86 = vector.shape_cast %85 : vector<1x1x512xf32> to vector<1x512xf32>
    %87 = vector.broadcast %86 : vector<1x512xf32> to vector<110x512xf32>
    %88 = arith.addf %84, %87 : vector<110x512xf32>
    %cst_55 = arith.constant 5.000000e-01 : f32
    %89 = vector.broadcast %cst_55 : f32 to vector<110x512xf32>
    %90 = arith.mulf %89, %88 : vector<110x512xf32>
    %cst_56 = arith.constant 0.707106769 : f32
    %91 = vector.broadcast %cst_56 : f32 to vector<110x512xf32>
    %92 = arith.mulf %88, %91 : vector<110x512xf32>
    %93 = math.erf %92 : vector<110x512xf32>
    %cst_57 = arith.constant 1.000000e+00 : f32
    %94 = vector.broadcast %cst_57 : f32 to vector<110x512xf32>
    %95 = arith.addf %94, %93 : vector<110x512xf32>
    %96 = arith.mulf %90, %95 : vector<110x512xf32>
    %c1_58 = arith.constant 1 : index
    %c0_59 = arith.constant 0 : index
    %c0_60 = arith.constant 0 : index
    %97 = vector.load %arg10[%c1_58, %c0_59, %c0_60] : memref<2x512x256xf32, #tpu.memory_space<vmem>>, vector<1x512x256xf32>
    %98 = vector.shape_cast %97 : vector<1x512x256xf32> to vector<512x256xf32>
    %cst_61 = arith.constant dense<0.000000e+00> : vector<110x256xf32>
    %99 = tpu.matmul %96, %98, %cst_61 {dimension_numbers = #tpu.dot_dimension_numbers<[1], [0], [0], [1], [0, 0, 1, 1], [], []>} : vector<110x512xf32>, vector<512x256xf32>, vector<110x256xf32> -> vector<110x256xf32>
    %c1_62 = arith.constant 1 : index
    %c0_63 = arith.constant 0 : index
    %c0_64 = arith.constant 0 : index
    %100 = vector.load %arg11[%c1_62, %c0_63, %c0_64] : memref<2x1x256xf32, #tpu.memory_space<vmem>>, vector<1x1x256xf32>
    %101 = vector.shape_cast %100 : vector<1x1x256xf32> to vector<1x256xf32>
    %102 = vector.broadcast %101 : vector<1x256xf32> to vector<110x256xf32>
    %103 = arith.addf %99, %102 : vector<110x256xf32>
    %104 = arith.addf %73, %103 : vector<110x256xf32>
    %cst_65 = arith.constant dense<0.000000e+00> : vector<256xf32>
    %105 = vector.multi_reduction <add>, %104, %cst_65 [0] : vector<110x256xf32> to vector<256xf32>
    %106 = vector.shape_cast %105 : vector<256xf32> to vector<1x256xf32>
    %cst_66 = arith.constant 0.0090909088 : f32
    %107 = vector.broadcast %cst_66 : f32 to vector<1x256xf32>
    %108 = arith.mulf %106, %107 : vector<1x256xf32>
    %c0_67 = arith.constant 0 : index
    %c0_68 = arith.constant 0 : index
    %109 = vector.load %arg12[%c0_67, %c0_68] : memref<256x8xf32, #tpu.memory_space<vmem>>, vector<256x8xf32>
    %cst_69 = arith.constant dense<0.000000e+00> : vector<1x8xf32>
    %110 = tpu.matmul %108, %109, %cst_69 {dimension_numbers = #tpu.dot_dimension_numbers<[1], [0], [0], [1], [0, 0, 1, 1], [], []>} : vector<1x256xf32>, vector<256x8xf32>, vector<1x8xf32> -> vector<1x8xf32>
    %c0_70 = arith.constant 0 : index
    %c0_71 = arith.constant 0 : index
    %111 = vector.load %arg13[%c0_70, %c0_71] : memref<1x8xf32, #tpu.memory_space<vmem>>, vector<1x8xf32>
    %112 = arith.addf %110, %111 : vector<1x8xf32>
    %113 = vector.shape_cast %112 : vector<1x8xf32> to vector<1x1x8xf32>
    %c0_72 = arith.constant 0 : index
    %c0_73 = arith.constant 0 : index
    %c0_74 = arith.constant 0 : index
    %114 = vector.load %arg14[%c0_72, %c0_73, %c0_74] : memref<1x1x8xf32, #tpu.memory_space<vmem>>, vector<1x1x8xf32>
    tpu.vector_store %arg14[%c0_72, %c0_73, %c0_74], %113 {strides = array<i32>} : memref<1x1x8xf32, #tpu.memory_space<vmem>>, vector<1x1x8xf32>,
    return
  }
  func.func @transform_0(%arg0: i32) -> (i32, i32, i32) {
    %c0_i32 = arith.constant 0 : i32
    %c0_i32_0 = arith.constant 0 : i32
    %c0_i32_1 = arith.constant 0 : i32
    return %arg0, %c0_i32, %c0_i32_0 : i32, i32, i32
  }
  func.func @transform_1(%arg0: i32) -> (i32, i32) {
    %c0_i32 = arith.constant 0 : i32
    %c0_i32_0 = arith.constant 0 : i32
    %c0_i32_1 = arith.constant 0 : i32
    return %c0_i32, %c0_i32_0 : i32, i32
  }
  func.func @transform_2(%arg0: i32) -> (i32, i32) {
    %c0_i32 = arith.constant 0 : i32
    %c0_i32_0 = arith.constant 0 : i32
    %c0_i32_1 = arith.constant 0 : i32
    return %c0_i32, %c0_i32_0 : i32, i32
  }
  func.func @transform_3(%arg0: i32) -> (i32, i32, i32) {
    %c0_i32 = arith.constant 0 : i32
    %c0_i32_0 = arith.constant 0 : i32
    %c0_i32_1 = arith.constant 0 : i32
    %c0_i32_2 = arith.constant 0 : i32
    return %c0_i32, %c0_i32_0, %c0_i32_1 : i32, i32, i32
  }
  func.func @transform_4(%arg0: i32) -> (i32, i32, i32) {
    %c0_i32 = arith.constant 0 : i32
    %c0_i32_0 = arith.constant 0 : i32
    %c0_i32_1 = arith.constant 0 : i32
    %c0_i32_2 = arith.constant 0 : i32
    return %c0_i32, %c0_i32_0, %c0_i32_1 : i32, i32, i32
  }
  func.func @transform_5(%arg0: i32) -> (i32, i32, i32) {
    %c0_i32 = arith.constant 0 : i32
    %c0_i32_0 = arith.constant 0 : i32
    %c0_i32_1 = arith.constant 0 : i32
    %c0_i32_2 = arith.constant 0 : i32
    return %c0_i32, %c0_i32_0, %c0_i32_1 : i32, i32, i32
  }
  func.func @transform_6(%arg0: i32) -> (i32, i32, i32) {
    %c0_i32 = arith.constant 0 : i32
    %c0_i32_0 = arith.constant 0 : i32
    %c0_i32_1 = arith.constant 0 : i32
    %c0_i32_2 = arith.constant 0 : i32
    return %c0_i32, %c0_i32_0, %c0_i32_1 : i32, i32, i32
  }
  func.func @transform_7(%arg0: i32) -> (i32, i32, i32) {
    %c0_i32 = arith.constant 0 : i32
    %c0_i32_0 = arith.constant 0 : i32
    %c0_i32_1 = arith.constant 0 : i32
    %c0_i32_2 = arith.constant 0 : i32
    return %c0_i32, %c0_i32_0, %c0_i32_1 : i32, i32, i32
  }
  func.func @transform_8(%arg0: i32) -> (i32, i32, i32) {
    %c0_i32 = arith.constant 0 : i32
    %c0_i32_0 = arith.constant 0 : i32
    %c0_i32_1 = arith.constant 0 : i32
    %c0_i32_2 = arith.constant 0 : i32
    return %c0_i32, %c0_i32_0, %c0_i32_1 : i32, i32, i32
  }
  func.func @transform_9(%arg0: i32) -> (i32, i32, i32) {
    %c0_i32 = arith.constant 0 : i32
    %c0_i32_0 = arith.constant 0 : i32
    %c0_i32_1 = arith.constant 0 : i32
    %c0_i32_2 = arith.constant 0 : i32
    return %c0_i32, %c0_i32_0, %c0_i32_1 : i32, i32, i32
  }
  func.func @transform_10(%arg0: i32) -> (i32, i32, i32) {
    %c0_i32 = arith.constant 0 : i32
    %c0_i32_0 = arith.constant 0 : i32
    %c0_i32_1 = arith.constant 0 : i32
    %c0_i32_2 = arith.constant 0 : i32
    return %c0_i32, %c0_i32_0, %c0_i32_1 : i32, i32, i32
  }
  func.func @transform_11(%arg0: i32) -> (i32, i32) {
    %c0_i32 = arith.constant 0 : i32
    %c0_i32_0 = arith.constant 0 : i32
    %c0_i32_1 = arith.constant 0 : i32
    return %c0_i32, %c0_i32_0 : i32, i32
  }
  func.func @transform_12(%arg0: i32) -> (i32, i32) {
    %c0_i32 = arith.constant 0 : i32
    %c0_i32_0 = arith.constant 0 : i32
    %c0_i32_1 = arith.constant 0 : i32
    return %c0_i32, %c0_i32_0 : i32, i32
  }
  func.func @transform_13(%arg0: i32) -> (i32, i32, i32) {
    %c0_i32 = arith.constant 0 : i32
    %c0_i32_0 = arith.constant 0 : i32
    %c0_i32_1 = arith.constant 0 : i32
    return %arg0, %c0_i32, %c0_i32_0 : i32, i32, i32
  }
}

</mosaic_0001>

<bundles_post_ra>
// kernel: tpu_custom_call.1
= control target key start
LH: loop header
LB: loop body
LE: loop exit
PB: predicated region body
PF: predicated region fallthrough
CT: control target
= control target key end

     0   :  { %18 = vsyncpa [#allocation3], 0  ;;  %s7706_s0 = inlined_call_operand.vmem [shape: f32[1,110,32], index: 0, kind: input, shape index: {}]   ;;  %s7707_s1 = inlined_call_operand.vmem [shape: f32[32,256], index: 1, kind: input, shape index: {}]   ;;  %s7708_s2 = inlined_call_operand.vmem [shape: f32[1,256], index: 2, kind: input, shape index: {}]   ;;  %s7709_s3 = inlined_call_operand.vmem [shape: f32[2,110,110], index: 3, kind: input, shape index: {}]   ;;  %s7710_s4 = inlined_call_operand.vmem [shape: f32[2,3,256], index: 4, kind: input, shape index: {}]   ;;  %s7711_s5 = inlined_call_operand.vmem [shape: f32[2,110,256], index: 5, kind: input, shape index: {}]   ;;  %s7712_s6 = inlined_call_operand.vmem [shape: f32[2,2,256], index: 6, kind: input, shape index: {}]   ;;  %s7713_s7 = inlined_call_operand.hbm [shape: f32[2,256,512], index: 7, kind: input, shape index: {}]   ;;  %s7714_s8 = inlined_call_operand.vmem [shape: f32[2,1,512], index: 8, kind: input, shape index: {}]   ;;  %s7715_s9 = inlined_call_operand.hbm [shape: f32[2,512,256], index: 9, kind: input, shape index: {}]   ;;  %s7716_s10 = inlined_call_operand.vmem [shape: f32[2,1,256], index: 10, kind: input, shape index: {}]   ;;  %s7717_s11 = inlined_call_operand.vmem [shape: f32[256,8], index: 11, kind: input, shape index: {}]   ;;  %s7718_s12 = inlined_call_operand.vmem [shape: f32[1,8], index: 12, kind: input, shape index: {}]   ;;  %s7719_s13 = inlined_call_operand.hbm [shape: f32[1,1,8], index: 13, kind: output, shape index: {}]  }
   0x1   :  { %19 = vsyncpa [#allocation6], 0 }
   0x2   :  { %20 = vsyncpa [#allocation4], 0  ;;  %s5156_s25 = smov [#allocation2]   ;;  %s5084_s29 = scalar_lea.hbm %s7713_s7, 32768 }
   0x3   :  { %s40_s26 = sshll.u32 %s5156_s25, 4  ;;  %p5085_p0 = scmp.ne.s32.totalorder %s7713_s7, %s5084_s29  ;;  %s41_s26 = int_to_ptr.vmem [resolvable:$true] %s40_s26 }
   0x4   :  { %p5088_p1 = scmp.lt.u32.totalorder %s5084_s29, %s7713_s7 }
   0x6   :  { %p5090_p2 = pnand %p5088_p1, %p5085_p0 }
   0x8   :  { %5093 = shalt.err (!%p5090_p2)
}
   0x9   :  { %s5094_s17 = scalar_lea.vmem %s41_s26, 32768  ;;  %p5099_p4 = scmp.lt.s32.totalorder %s41_s26, %s41_s26 }
   0xa   :  { %p5095_p3 = scmp.ne.s32.totalorder %s41_s26, %s5094_s17  ;;  %p5100_p5 = scmp.lt.s32.totalorder %s5094_s17, %s5094_s17 }
   0xc   :  { %p5101_p6 = por %p5100_p5, %p5099_p4 }
   0xe   :  { %p5102_p7 = pnand %p5101_p6, %p5095_p3 }
  0x10   :  { %5105 = shalt.err (!%p5102_p7)
}
  0x11   :  { %s5157_s18 = smov 512   ;;  %s5158_s19 = smov 32  }
  0x12   :  { %46 = dma.hbm_to_vmem [thread:$0]  %s7713_s7, 32768, %s41_s26, [#allocation3], %s5157_s18, %s5157_s18, %s5158_s19  }
  0x13   :  { %s5159_s22 = smov [#allocation5]   ;;  %s5106_s27 = scalar_lea.hbm %s7715_s9, 32768 }
  0x14   :  { %s54_s23 = sshll.u32 %s5159_s22, 4  ;;  %p5107_p8 = scmp.ne.s32.totalorder %s7715_s9, %s5106_s27  ;;  %s55_s23 = int_to_ptr.vmem [resolvable:$true] %s54_s23 }
  0x15   :  { %p5110_p9 = scmp.lt.u32.totalorder %s5106_s27, %s7715_s9 }
  0x17   :  { %p5112_p10 = pnand %p5110_p9, %p5107_p8 }
  0x19   :  { %5115 = shalt.err (!%p5112_p10)
}
  0x1a   :  { %s5116_s15 = scalar_lea.vmem %s55_s23, 32768  ;;  %p5121_p12 = scmp.lt.s32.totalorder %s55_s23, %s55_s23 }
  0x1b   :  { %p5117_p11 = scmp.ne.s32.totalorder %s55_s23, %s5116_s15  ;;  %p5122_p13 = scmp.lt.s32.totalorder %s5116_s15, %s5116_s15 }
  0x1d   :  { %p5123_p0 = por %p5122_p13, %p5121_p12 }
  0x1f   :  { %p5124_p1 = pnand %p5123_p0, %p5117_p11 }
  0x21   :  { %5127 = shalt.err (!%p5124_p1)
}
  0x22   :  { %s5160_s7 = smov 256   ;;  %s5161_s26 = smov 16  }
  0x23   :  { %60 = dma.hbm_to_vmem [thread:$0]  %s7715_s9, 32768, %s55_s23, [#allocation6], %s5160_s7, %s5160_s7, %s5161_s26  }
  0x24   :  { %5150 = dma.done.wait [#allocation3], 32768  }
  0x25   :  { %5151 = vsyncadd [#allocation3], 4294934528 }
  0x26   :  { %5152 = dma.done.wait [#allocation6], 32768  }
  0x27   :  { %5153 = vsyncadd [#allocation6], 4294934528  ;;  %v7721_v0 = vmov 0.0   ;;  %v88_v1 = vld [vmem:[%s7707_s1 + $0x8] sm:$0xff]  ;;  %v90_v2 = vld [vmem:[%s7707_s1 + $0x18] sm:$0xff]  ;;  %vm107_vm0 = vcmask 261120   ;;  %v97_v27 = vlaneseq }
  0x28   :  { %214 = vmatprep.mubr.f32.mxu0 %v7721_v0  ;;  %521 = vmatprep.mubr.f32.mxu1 %v7721_v0  ;;  %v87_v3 = vld [vmem:[%s7707_s1] sm:$0xff]  ;;  %v4045_v4 = vpack.c.bf16 %v90_v2, %v88_v1  ;;  %v89_v5 = vld [vmem:[%s7707_s1 + $0x10] sm:$0xff]  ;;  %v92_v6 = vld [vmem:[%s7707_s1 + $0x28] sm:$0xff]  ;;  %vm450_vm1 = vcmask 1045504   ;;  %vm5163_vm2 = vmmov 1   ;;  %vm407_vm4 = vcmask 900096  }
  0x29   :  { %v94_v7 = vld [vmem:[%s7707_s1 + $0x38] sm:$0xff]  ;;  %v4047_v8 = vpack.c.bf16 %v89_v5, %v87_v3  ;;  %v91_v10 = vld [vmem:[%s7707_s1 + $0x20] sm:$0xff]  ;;  %v93_v11 = vld [vmem:[%s7707_s1 + $0x30] sm:$0xff]  ;;  %v5354_v28 = vshrl.u32 %v97_v27, 7  ;;  %vm3900_vm5 = vcmask 57344  }
  0x2a   :  { %v4049_v9 = vpack.c.bf16 %v94_v7, %v92_v6  ;;  %4046 = vmatprep.subr.bf16.mxu0 %v4045_v4  ;;  %v4051_v12 = vpack.c.bf16 %v93_v11, %v91_v10  ;;  %v73_v13 = vld [vmem:[%s7706_s0] sm:$0xff]  ;;  %v74_v14 = vld [vmem:[%s7706_s0 + $0x8] sm:$0xff]  ;;  %v75_v15 = vld [vmem:[%s7706_s0 + $0x10] sm:$0xff] }
  0x2b   :  { %4048 = vmatpush1.bf16.msra.mxu0 %v4047_v8  ;;  %v76_v16 = vld [vmem:[%s7706_s0 + $0x18] sm:$0xff]  ;;  %v77_v17 = vld [vmem:[%s7706_s0 + $0x20] sm:$0xff]  ;;  %v78_v18 = vld [vmem:[%s7706_s0 + $0x28] sm:$0xff]  ;;  %7835 = vst [vmem:[#allocation11_spill] sm:$0xff] %v5354_v28  ;;  %v5360_v38 = vsub.s32 1, %v5354_v28  ;;  %v7724_v39 = vsub.s32 4, %v5354_v28 }
  0x2c   :  { %4050 = vmatprep.subr.bf16.mxu0 %v4049_v9  ;;  %v79_v19 = vld [vmem:[%s7706_s0 + $0x30] sm:$0xff]  ;;  %v80_v20 = vld [vmem:[%s7706_s0 + $0x38] sm:$0xff]  ;;  %v81_v21 = vld [vmem:[%s7706_s0 + $0x40] sm:$0xff]  ;;  %v5364_v43 = vsub.s32 0, %v5354_v28  ;;  %v7723_v53 = vsub.s32 5, %v5354_v28 }
  0x2d   :  { %v82_v22 = vld [vmem:[%s7706_s0 + $0x48] sm:$0xff]  ;;  %v83_v23 = vld [vmem:[%s7706_s0 + $0x50] sm:$0xff]  ;;  %v84_v24 = vld [vmem:[%s7706_s0 + $0x58] sm:$0xff]  ;;  %7836 = vst [vmem:[#allocation12_spill] sm:$0xff] %v5360_v38 }
  0x2e   :  { %v85_v25 = vld [vmem:[%s7706_s0 + $0x60] sm:$0xff]  ;;  %v86_v26 = vld [vmem:[%s7706_s0 + $0x68] sm:$0x3f]  ;;  %7837 = vst [vmem:[#allocation13_spill] sm:$0xff] %v5364_v43  ;;  %vm5569_vm3 = vmpackc.low %vm450_vm1, %vm5163_vm2 }
  0x2f   :  { %4052 = vmatpush1.bf16.msra.mxu0 %v4051_v12  ;;  %v831_v29 = vld [vmem:[#allocation2 + $0x8] sm:$0xff]  ;;  %v830_v32 = vld [vmem:[#allocation2] sm:$0xff] }
  0x30   :  { %v835_v30 = vld [vmem:[#allocation2 + $0x28] sm:$0xff]  ;;  %v834_v33 = vld [vmem:[#allocation2 + $0x20] sm:$0xff] }
  0x31   :  { %v4083_v31 = vpack.c.bf16 %v835_v30, %v831_v29  ;;  %v4085_v34 = vpack.c.bf16 %v834_v33, %v830_v32  ;;  %v839_v35 = vld [vmem:[#allocation2 + $0x48] sm:$0xff]  ;;  %v95_v37 = vld [vmem:[%s7708_s2] sm:$0x3] }
  0x32   :  { %3918 = vmatmul.mubr.msk.f32.vlgmr.msra.gmra.mrb[0].mxu0 %vm107_vm0, %v73_v13  ;;  %v843_v36 = vld [vmem:[#allocation2 + $0x68] sm:$0xff]  ;;  %v838_v41 = vld [vmem:[#allocation2 + $0x40] sm:$0xff]  ;;  %v5372_v51 = vrot.slane %v95_v37, %v5360_v38  ;;  %v5379_v57 = vrot.slane %v95_v37, %v5364_v43 }
  0x33   :  { %220 = vmatprep.mubr.f32.mxu0 %v7721_v0  ;;  %4084 = vmatprep.subr.bf16.mxu0 %v4083_v31  ;;  %v4087_v40 = vpack.c.bf16 %v843_v36, %v839_v35  ;;  %v842_v42 = vld [vmem:[#allocation2 + $0x60] sm:$0xff]  ;;  %v847_v46 = vld [vmem:[#allocation2 + $0x88] sm:$0xff] }
  0x34   :  { %4086 = vmatpush1.bf16.msra.mxu0 %v4085_v34  ;;  %v5369_v44 = vld [vmem:[%s7710_s4] sm:$0x77]  ;;  %v4089_v45 = vpack.c.bf16 %v842_v42, %v838_v41  ;;  %v851_v47 = vld [vmem:[#allocation2 + $0xa8] sm:$0xff] }
  0x35   :  { %4088 = vmatprep.subr.bf16.mxu0 %v4087_v40  ;;  %v4091_v48 = vpack.c.bf16 %v851_v47, %v847_v46  ;;  %v846_v49 = vld [vmem:[#allocation2 + $0x80] sm:$0xff]  ;;  %v308_v52 = vrot.slane %v5369_v44, %v7724_v39  ;;  %v855_v55 = vld [vmem:[#allocation2 + $0xc8] sm:$0xff]  ;;  %v304_v58 = vrot.slane %v5369_v44, %v5364_v43  ;;  %v354_v5 = vrot.slane %v5369_v44, %v7723_v53 }
  0x36   :  { %3919 = vmatmul.mubr.msk.f32.gmra.mrb[2].mxu0 %vm107_vm0, %v74_v14  ;;  %v850_v50 = vld [vmem:[#allocation2 + $0xa0] sm:$0xff]  ;;  %v859_v56 = vld [vmem:[#allocation2 + $0xe8] sm:$0xff]  ;;  %v350_v9 = vrot.slane %v5369_v44, %v5360_v38 }
  0x37   :  { %226 = vmatprep.mubr.f32.mxu0 %v7721_v0  ;;  %v4093_v54 = vpack.c.bf16 %v850_v50, %v846_v49  ;;  %v4095_v59 = vpack.c.bf16 %v859_v56, %v855_v55  ;;  %v854_v60 = vld [vmem:[#allocation2 + $0xc0] sm:$0xff]  ;;  %v863_v63 = vld [vmem:[#allocation2 + $0x108] sm:$0xff]  ;;  %v5387_v4 = vrot.slane %v308_v52, %v5364_v43  ;;  %v5396_v8 = vrot.slane %v304_v58, %v5364_v43 }
  0x38   :  { %4090 = vmatpush1.bf16.msra.mxu0 %v4089_v45  ;;  %v858_v61 = vld [vmem:[#allocation2 + $0xe0] sm:$0xff]  ;;  %v867_v2 = vld [vmem:[#allocation2 + $0x128] sm:$0xff] }
  0x39   :  { %4092 = vmatprep.subr.bf16.mxu0 %v4091_v48  ;;  %v4097_v6 = vpack.c.bf16 %v858_v61, %v854_v60  ;;  %v4099_v10 = vpack.c.bf16 %v867_v2, %v863_v63  ;;  %v862_v11 = vld [vmem:[#allocation2 + $0x100] sm:$0xff]  ;;  %v871_v14 = vld [vmem:[#allocation2 + $0x148] sm:$0xff] }
  0x3a   :  { %3920 = vmatmul.mubr.msk.f32.gmra.mrb[4].mxu0 %vm107_vm0, %v75_v15  ;;  %v866_v12 = vld [vmem:[#allocation2 + $0x120] sm:$0xff]  ;;  %v875_v15 = vld [vmem:[#allocation2 + $0x168] sm:$0xff] }
  0x3b   :  { %232 = vmatprep.mubr.f32.mxu0 %v7721_v0  ;;  %v874_v27 = vld [vmem:[#allocation2 + $0x160] sm:$0xff]  ;;  %v879_v31 = vld [vmem:[#allocation2 + $0x188] sm:$0xff] }
  0x3c   :  { %4094 = vmatpush1.bf16.msra.mxu0 %v4093_v54  ;;  %v883_v32 = vld [vmem:[#allocation2 + $0x1a8] sm:$0xff]  ;;  %v878_v46 = vld [vmem:[#allocation2 + $0x180] sm:$0xff] }
  0x3d   :  { %4096 = vmatprep.subr.bf16.mxu0 %v4095_v59  ;;  %v4107_v45 = vpack.c.bf16 %v883_v32, %v879_v31  ;;  %v882_v47 = vld [vmem:[#allocation2 + $0x1a0] sm:$0xff]  ;;  %v887_v50 = vld [vmem:[#allocation2 + $0x1c8] sm:$0xff] }
  0x3e   :  { %3921 = vmatmul.mubr.msk.f32.gmra.mrb[6].mxu0 %vm107_vm0, %v76_v16  ;;  %v891_v52 = vld [vmem:[#allocation2 + $0x1e8] sm:$0xff]  ;;  %v4109_v60 = vpack.c.bf16 %v882_v47, %v878_v46  ;;  %v890_v2 = vld [vmem:[#allocation2 + $0x1e0] sm:$0xff] }
  0x3f   :  { %238 = vmatprep.mubr.f32.mxu0 %v7721_v0  ;;  %v4111_v63 = vpack.c.bf16 %v891_v52, %v887_v50  ;;  %v902_v46 = vld [vmem:[#allocation2 + $0x240] sm:$0xff]  ;;  %v911_v50 = vld [vmem:[#allocation2 + $0x288] sm:$0xff] }
  0x40   :  { %4098 = vmatpush1.bf16.msra.mxu0 %v4097_v6  ;;  %v906_v47 = vld [vmem:[#allocation2 + $0x260] sm:$0xff]  ;;  %v915_v52 = vld [vmem:[#allocation2 + $0x2a8] sm:$0xff] }
  0x41   :  { %4100 = vmatprep.subr.bf16.mxu0 %v4099_v10  ;;  %v899_v10 = vld [vmem:[#allocation2 + $0x228] sm:$0xff] }
  0x42   :  { %3922 = vmatmul.mubr.msk.f32.gmra.mrb[8].mxu0 %vm107_vm0, %v77_v17 }
  0x43   :  { %244 = vmatprep.mubr.f32.mxu0 %v7721_v0 }
  0x46   :  { %3923 = vmatmul.mubr.msk.f32.gmra.mrb[10].mxu0 %vm107_vm0, %v78_v18 }
  0x47   :  { %250 = vmatprep.mubr.f32.mxu0 %v7721_v0 }
  0x4a   :  { %3924 = vmatmul.mubr.msk.f32.gmra.mrb[12].mxu0 %vm107_vm0, %v79_v19 }
  0x4b   :  { %256 = vmatprep.mubr.f32.mxu0 %v7721_v0 }
  0x4e   :  { %3925 = vmatmul.mubr.msk.f32.gmra.mrb[14].mxu0 %vm107_vm0, %v80_v20  ;;  %v5409_v20 = vrot.slane %v354_v5, %v5360_v38 }
  0x4f   :  { %262 = vmatprep.mubr.f32.mxu0 %v7721_v0 }
  0x52   :  { %3926 = vmatmul.mubr.msk.f32.gmra.mrb[16].mxu0 %vm107_vm0, %v81_v21  ;;  %v4101_v21 = vpack.c.bf16 %v866_v12, %v862_v11 }
  0x53   :  { %268 = vmatprep.mubr.f32.mxu0 %v7721_v0 }
  0x54   :  { %4102 = vmatpush1.bf16.msra.mxu0 %v4101_v21 }
  0x56   :  { %3927 = vmatmul.mubr.msk.f32.gmra.mrb[18].mxu0 %vm107_vm0, %v82_v22 }
  0x57   :  { %274 = vmatprep.mubr.f32.mxu0 %v7721_v0 }
  0x5a   :  { %3928 = vmatmul.mubr.msk.f32.gmra.mrb[20].mxu0 %vm107_vm0, %v83_v23 }
  0x5b   :  { %280 = vmatprep.mubr.f32.mxu0 %v7721_v0 }
  0x5e   :  { %3929 = vmatmul.mubr.msk.f32.gmra.mrb[22].mxu0 %vm107_vm0, %v84_v24  ;;  %v5416_v24 = vrot.slane %v350_v9, %v5360_v38  ;;  %v895_v9 = vld [vmem:[#allocation2 + $0x208] sm:$0xff] }
  0x5f   :  { %286 = vmatprep.mubr.f32.mxu0 %v7721_v0 }
  0x62   :  { %3930 = vmatmul.mubr.msk.f32.gmra.mrb[24].mxu0 %vm107_vm0, %v85_v25  ;;  %v4103_v25 = vpack.c.bf16 %v875_v15, %v871_v14 }
  0x63   :  { %292 = vmatprep.mubr.f32.mxu0 %v7721_v0 }
  0x64   :  { %4104 = vmatprep.subr.bf16.mxu0 %v4103_v25  ;;  %v898_v25 = vld [vmem:[#allocation2 + $0x220] sm:$0xff] }
  0x66   :  { %3931 = vmatmul.mubr.msk.f32.gmra.mrb[26].mxu0 %vm107_vm0, %v86_v26  ;;  %v870_v26 = vld [vmem:[#allocation2 + $0x140] sm:$0xff] }
  0x67   :  { %v4105_v40 = vpack.c.bf16 %v874_v27, %v870_v26 }
  0x69   :  { %4106 = vmatpush1.bf16.msra.mxu0 %v4105_v40 }
  0x6a   :  { %4108 = vmatprep.subr.bf16.mxu0 %v4107_v45 }
  0x6d   :  { %4110 = vmatpush1.bf16.msra.mxu0 %v4109_v60 }
  0x6e   :  { %4112 = vmatprep.subr.bf16.mxu0 %v4111_v63 }
 0x105   :  { %v216_v62 = vpop.f32.mrb[0].mxu0 }
 0x106   :  { %v218_v1 = vpop.f32.mrb[1].mxu0  ;;  %v5393_v7 = vadd.f32 %v216_v62, %v5379_v57 }
 0x107   :  { %v5384_v3 = vadd.f32 %v218_v1, %v5372_v51  ;;  %v886_v1 = vld [vmem:[#allocation2 + $0x1c0] sm:$0xff] }
 0x108   :  { %v319_v22 = vmul.f32 %v5396_v8, %v5393_v7 }
 0x109   :  { %v222_v13 = vpop.f32.mrb[2].mxu0  ;;  %v320_v18 = vmul.f32 %v5387_v4, %v5384_v3 }
 0x10a   :  { %v5401_v16 = vadd.f32 %v222_v13, %v5379_v57  ;;  %v224_v17 = vpop.f32.mrb[3].mxu0  ;;  %v365_v42 = vadd.f32 %v5416_v24, %v319_v22  ;;  %v4115_v22 = vpack.c.bf16 %v899_v10, %v895_v9 }
 0x10b   :  { %v5406_v19 = vadd.f32 %v224_v17, %v5372_v51  ;;  %v366_v36 = vadd.f32 %v5409_v20, %v320_v18  ;;  %v4113_v17 = vpack.c.bf16 %v890_v2, %v886_v1  ;;  %v4123_v2 = vpack.c.bf16 %v915_v52, %v911_v50 }
 0x10c   :  { %v321_v23 = vmul.f32 %v5396_v8, %v5401_v16 }
 0x10d   :  { %v322_v29 = vmul.f32 %v5387_v4, %v5406_v19  ;;  %v228_v30 = vpop.f32.mrb[4].mxu0  ;;  %4114 = vmatpush1.bf16.msra.mxu0 %v4113_v17 }
 0x10e   :  { %v230_v33 = vpop.f32.mrb[5].mxu0  ;;  %v367_v34 = vadd.f32 %v5416_v24, %v321_v23  ;;  %v5427_v41 = vadd.f32 %v228_v30, %v5379_v57  ;;  %v894_v23 = vld [vmem:[#allocation2 + $0x200] sm:$0xff]  ;;  %v907_v30 = vld [vmem:[#allocation2 + $0x268] sm:$0xff]  ;;  %4116 = vmatprep.subr.bf16.mxu0 %v4115_v22 }
 0x10f   :  { %v5422_v35 = vadd.f32 %v230_v33, %v5372_v51  ;;  %v368_v37 = vadd.f32 %v5409_v20, %v322_v29  ;;  %v903_v29 = vld [vmem:[#allocation2 + $0x248] sm:$0xff] }
 0x110   :  { %v4055_v56 = vpack.c.bf16 %v367_v34, %v365_v42  ;;  %v323_v61 = vmul.f32 %v5396_v8, %v5427_v41  ;;  %v4119_v45 = vpack.c.bf16 %v907_v30, %v903_v29  ;;  %v918_v29 = vld [vmem:[#allocation2 + $0x2c0] sm:$0xff] }
 0x111   :  { %v234_v48 = vpop.f32.mrb[6].mxu0  ;;  %v4053_v49 = vpack.c.bf16 %v368_v37, %v366_v36  ;;  %v324_v58 = vmul.f32 %v5387_v4, %v5422_v35  ;;  %v4117_v37 = vpack.c.bf16 %v898_v25, %v894_v23  ;;  %v922_v30 = vld [vmem:[#allocation2 + $0x2e0] sm:$0xff] }
 0x112   :  { %v5431_v54 = vadd.f32 %v234_v48, %v5379_v57  ;;  %v236_v55 = vpop.f32.mrb[7].mxu0  ;;  %v369_v18 = vadd.f32 %v5416_v24, %v323_v61 }
 0x113   :  { %v5436_v59 = vadd.f32 %v236_v55, %v5372_v51  ;;  %4054 = vmatprep.subr.bf16.mxu1 %v4053_v49  ;;  %v370_v13 = vadd.f32 %v5409_v20, %v324_v58  ;;  %4118 = vmatpush1.bf16.msra.mxu0 %v4117_v37  ;;  %v931_v37 = vld [vmem:[#allocation2 + $0x328] sm:$0xff] }
 0x114   :  { %v325_v62 = vmul.f32 %v5396_v8, %v5431_v54  ;;  %4056 = vmatpush1.bf16.msra.mxu1 %v4055_v56  ;;  %4120 = vmatprep.subr.bf16.mxu0 %v4119_v45 }
 0x115   :  { %v326_v5 = vmul.f32 %v5387_v4, %v5436_v59  ;;  %v240_v6 = vpop.f32.mrb[8].mxu0 }
 0x116   :  { %v371_v11 = vadd.f32 %v5416_v24, %v325_v62  ;;  %v242_v12 = vpop.f32.mrb[9].mxu0  ;;  %v5452_v21 = vadd.f32 %v240_v6, %v5379_v57  ;;  %v4121_v62 = vpack.c.bf16 %v906_v47, %v902_v46  ;;  %v914_v6 = vld [vmem:[#allocation2 + $0x2a0] sm:$0xff] }
 0x117   :  { %v372_v14 = vadd.f32 %v5409_v20, %v326_v5  ;;  %v5448_v15 = vadd.f32 %v242_v12, %v5372_v51  ;;  %v910_v5 = vld [vmem:[#allocation2 + $0x280] sm:$0xff]  ;;  %v923_v12 = vld [vmem:[#allocation2 + $0x2e8] sm:$0xff] }
 0x118   :  { %v4059_v33 = vpack.c.bf16 %v371_v11, %v369_v18  ;;  %v327_v40 = vmul.f32 %v5396_v8, %v5452_v21  ;;  %v919_v11 = vld [vmem:[#allocation2 + $0x2c8] sm:$0xff]  ;;  %4122 = vmatpush1.bf16.msra.mxu0 %v4121_v62  ;;  %v4125_v23 = vpack.c.bf16 %v914_v6, %v910_v5 }
 0x119   :  { %v246_v26 = vpop.f32.mrb[10].mxu0  ;;  %v4057_v27 = vpack.c.bf16 %v372_v14, %v370_v13  ;;  %v328_v34 = vmul.f32 %v5387_v4, %v5448_v15  ;;  %4124 = vmatprep.subr.bf16.mxu0 %v4123_v2 }
 0x11a   :  { %v5455_v31 = vadd.f32 %v246_v26, %v5379_v57  ;;  %v248_v32 = vpop.f32.mrb[11].mxu0  ;;  %v373_v63 = vadd.f32 %v5416_v24, %v327_v40 }
 0x11b   :  { %v5460_v36 = vadd.f32 %v248_v32, %v5372_v51  ;;  %4058 = vmatprep.subr.bf16.mxu1 %v4057_v27  ;;  %v374_v58 = vadd.f32 %v5409_v20, %v328_v34  ;;  %v4127_v27 = vpack.c.bf16 %v923_v12, %v919_v11  ;;  %v927_v34 = vld [vmem:[#allocation2 + $0x308] sm:$0xff] }
 0x11c   :  { %v329_v42 = vmul.f32 %v5396_v8, %v5455_v31  ;;  %4060 = vmatpush1.bf16.msra.mxu1 %v4059_v33  ;;  %4126 = vmatpush1.bf16.msra.mxu0 %v4125_v23  ;;  %v4131_v52 = vpack.c.bf16 %v931_v37, %v927_v34 }
 0x11d   :  { %v330_v48 = vmul.f32 %v5387_v4, %v5460_v36  ;;  %v252_v49 = vpop.f32.mrb[12].mxu0  ;;  %4128 = vmatprep.subr.bf16.mxu0 %v4127_v27 }
 0x11e   :  { %v375_v55 = vadd.f32 %v5416_v24, %v329_v42  ;;  %v254_v56 = vpop.f32.mrb[13].mxu0  ;;  %v5476_v1 = vadd.f32 %v252_v49, %v5379_v57 }
 0x11f   :  { %v376_v60 = vadd.f32 %v5409_v20, %v330_v48  ;;  %v5472_v61 = vadd.f32 %v254_v56, %v5372_v51  ;;  %v4129_v48 = vpack.c.bf16 %v922_v30, %v918_v29  ;;  %v930_v56 = vld [vmem:[#allocation2 + $0x320] sm:$0xff] }
 0x120   :  { %v4063_v17 = vpack.c.bf16 %v375_v55, %v373_v63  ;;  %v331_v25 = vmul.f32 %v5396_v8, %v5476_v1  ;;  %v926_v55 = vld [vmem:[#allocation2 + $0x300] sm:$0xff] }
 0x121   :  { %v258_v9 = vpop.f32.mrb[14].mxu0  ;;  %v4061_v10 = vpack.c.bf16 %v376_v60, %v374_v58  ;;  %v332_v18 = vmul.f32 %v5387_v4, %v5472_v61  ;;  %4130 = vmatpush1.bf16.msra.mxu0 %v4129_v48 }
 0x122   :  { %v5479_v13 = vadd.f32 %v258_v9, %v5379_v57  ;;  %v260_v14 = vpop.f32.mrb[15].mxu0  ;;  %v377_v49 = vadd.f32 %v5416_v24, %v331_v25  ;;  %v4133_v9 = vpack.c.bf16 %v930_v56, %v926_v55  ;;  %4132 = vmatprep.subr.bf16.mxu0 %v4131_v52 }
 0x123   :  { %v5484_v22 = vadd.f32 %v260_v14, %v5372_v51  ;;  %4062 = vmatprep.subr.bf16.mxu1 %v4061_v10  ;;  %v378_v45 = vadd.f32 %v5409_v20, %v332_v18 }
 0x124   :  { %v333_v26 = vmul.f32 %v5396_v8, %v5479_v13  ;;  %4064 = vmatpush1.bf16.msra.mxu1 %v4063_v17 }
 0x125   :  { %v334_v32 = vmul.f32 %v5387_v4, %v5484_v22  ;;  %v264_v33 = vpop.f32.mrb[16].mxu0  ;;  %4134 = vmatpush1.bf16.msra.mxu0 %v4133_v9 }
 0x126   :  { %v379_v40 = vadd.f32 %v5416_v24, %v333_v26  ;;  %v266_v42 = vpop.f32.mrb[17].mxu0  ;;  %v5500_v50 = vadd.f32 %v264_v33, %v5379_v57 }
 0x127   :  { %v380_v46 = vadd.f32 %v5409_v20, %v334_v32  ;;  %v5496_v47 = vadd.f32 %v266_v42, %v5372_v51 }
 0x128   :  { %v4067_v2 = vpack.c.bf16 %v379_v40, %v377_v49  ;;  %v335_v10 = vmul.f32 %v5396_v8, %v5500_v50 }
 0x129   :  { %v270_v58 = vpop.f32.mrb[18].mxu0  ;;  %v4065_v60 = vpack.c.bf16 %v380_v46, %v378_v45  ;;  %v336_v5 = vmul.f32 %v5387_v4, %v5496_v47 }
 0x12a   :  { %v5503_v62 = vadd.f32 %v270_v58, %v5379_v57  ;;  %v272_v63 = vpop.f32.mrb[19].mxu0  ;;  %v381_v27 = vadd.f32 %v5416_v24, %v335_v10 }
 0x12b   :  { %v5508_v6 = vadd.f32 %v272_v63, %v5372_v51  ;;  %4066 = vmatprep.subr.bf16.mxu1 %v4065_v60  ;;  %v382_v23 = vadd.f32 %v5409_v20, %v336_v5 }
 0x12c   :  { %v337_v11 = vmul.f32 %v5396_v8, %v5503_v62  ;;  %4068 = vmatpush1.bf16.msra.mxu1 %v4067_v2 }
 0x12d   :  { %v338_v12 = vmul.f32 %v5387_v4, %v5508_v6  ;;  %v276_v14 = vpop.f32.mrb[20].mxu0 }
 0x12e   :  { %v383_v17 = vadd.f32 %v5416_v24, %v337_v11  ;;  %v278_v18 = vpop.f32.mrb[21].mxu0  ;;  %v5524_v29 = vadd.f32 %v276_v14, %v5379_v57 }
 0x12f   :  { %v384_v25 = vadd.f32 %v5409_v20, %v338_v12  ;;  %v5520_v26 = vadd.f32 %v278_v18, %v5372_v51 }
 0x130   :  { %v4071_v37 = vpack.c.bf16 %v383_v17, %v381_v27  ;;  %v339_v45 = vmul.f32 %v5396_v8, %v5524_v29  ;;  %v833_v27 = vld [vmem:[#allocation2 + $0x18] sm:$0xff] }
 0x131   :  { %v282_v30 = vpop.f32.mrb[22].mxu0  ;;  %v4069_v32 = vpack.c.bf16 %v384_v25, %v382_v23  ;;  %v340_v40 = vmul.f32 %v5387_v4, %v5520_v26 }
 0x132   :  { %v5527_v33 = vadd.f32 %v282_v30, %v5379_v57  ;;  %v284_v34 = vpop.f32.mrb[23].mxu0  ;;  %v385_v63 = vadd.f32 %v5416_v24, %v339_v45  ;;  %v837_v30 = vld [vmem:[#allocation2 + $0x38] sm:$0xff]  ;;  %v836_v45 = vld [vmem:[#allocation2 + $0x30] sm:$0xff] }
 0x133   :  { %v5532_v42 = vadd.f32 %v284_v34, %v5372_v51  ;;  %4070 = vmatprep.subr.bf16.mxu1 %v4069_v32  ;;  %v386_v56 = vadd.f32 %v5409_v20, %v340_v40  ;;  %v4147_v40 = vpack.c.bf16 %v837_v30, %v833_v27  ;;  %v856_v30 = vld [vmem:[#allocation2 + $0xd0] sm:$0xff] }
 0x134   :  { %v341_v46 = vmul.f32 %v5396_v8, %v5527_v33  ;;  %4072 = vmatpush1.bf16.msra.mxu1 %v4071_v37  ;;  %v7838_v37 = vmov 0 }
 0x135   :  { %v342_v48 = vmul.f32 %v5387_v4, %v5532_v42  ;;  %v288_v49 = vpop.f32.mrb[24].mxu0  ;;  %v7839_v37 = vsel %vm5569_vm3, 4294967295, %v7838_v37 }
 0x136   :  { %v387_v52 = vadd.f32 %v5416_v24, %v341_v46  ;;  %v290_v55 = vpop.f32.mrb[25].mxu0  ;;  %v5548_v2 = vadd.f32 %v288_v49, %v5379_v57  ;;  %7840 = vst [vmem:[#allocation14_spill] sm:$0xff] %v7839_v37  ;;  %v845_v49 = vld [vmem:[#allocation2 + $0x78] sm:$0xff] }
 0x137   :  { %v388_v58 = vadd.f32 %v5409_v20, %v342_v48  ;;  %v5544_v60 = vadd.f32 %v290_v55, %v5372_v51  ;;  %v841_v48 = vld [vmem:[#allocation2 + $0x58] sm:$0xff]  ;;  %v840_v55 = vld [vmem:[#allocation2 + $0x50] sm:$0xff] }
 0x138   :  { %v4075_v12 = vpack.c.bf16 %v387_v52, %v385_v63  ;;  %v343_v18 = vmul.f32 %v5396_v8, %v5548_v2  ;;  %v4151_v52 = vpack.c.bf16 %v845_v49, %v841_v48  ;;  %v853_v63 = vld [vmem:[#allocation2 + $0xb8] sm:$0xff] }
 0x139   :  { %v294_v5 = vpop.f32.mrb[26].mxu0  ;;  %v4073_v9 = vpack.c.bf16 %v388_v58, %v386_v56  ;;  %v344_v14 = vmul.f32 %v5387_v4, %v5544_v60  ;;  %v844_v56 = vld [vmem:[#allocation2 + $0x70] sm:$0xff]  ;;  %v849_v58 = vld [vmem:[#allocation2 + $0x98] sm:$0xff] }
 0x13a   :  { %v5551_v10 = vadd.f32 %v294_v5, %v5379_v57  ;;  %v296_v11 = vpop.f32.mrb[27].mxu0  ;;  %v389_v34 = vadd.f32 %v5416_v24, %v343_v18  ;;  %v394_v5 = vld [vmem:[%s7709_s3 + $0x8] sm:$0xff]  ;;  %v857_v18 = vld [vmem:[#allocation2 + $0xd8] sm:$0xff] }
 0x13b   :  { %v5556_v17 = vadd.f32 %v296_v11, %v5372_v51  ;;  %4074 = vmatprep.subr.bf16.mxu1 %v4073_v9  ;;  %v390_v32 = vadd.f32 %v5409_v20, %v344_v14  ;;  %v4153_v9 = vpack.c.bf16 %v844_v56, %v840_v55  ;;  %v4155_v11 = vpack.c.bf16 %v853_v63, %v849_v58  ;;  %v852_v14 = vld [vmem:[#allocation2 + $0xb0] sm:$0xff]  ;;  %v873_v48 = vld [vmem:[#allocation2 + $0x158] sm:$0xff] }
 0x13c   :  { %v345_v23 = vmul.f32 %v5396_v8, %v5551_v10  ;;  %4076 = vmatpush1.bf16.msra.mxu1 %v4075_v12  ;;  %v848_v12 = vld [vmem:[#allocation2 + $0x90] sm:$0xff]  ;;  %v877_v49 = vld [vmem:[#allocation2 + $0x178] sm:$0xff] }
 0x13d   :  { %v346_v57 = vmul.f32 %v5387_v4, %v5556_v17  ;;  %v832_v4 = vld [vmem:[#allocation2 + $0x10] sm:$0xff]  ;;  %v881_v58 = vld [vmem:[#allocation2 + $0x198] sm:$0xff] }
 0x13e   :  { %v391_v25 = vadd.f32 %v5416_v24, %v345_v23  ;;  %v4149_v24 = vpack.c.bf16 %v836_v45, %v832_v4  ;;  %v861_v23 = vld [vmem:[#allocation2 + $0xf8] sm:$0xff]  ;;  %v864_v45 = vld [vmem:[#allocation2 + $0x110] sm:$0xff] }
 0x13f   :  { %v392_v51 = vadd.f32 %v5409_v20, %v346_v57  ;;  %v393_v20 = vld [vmem:[%s7709_s3] sm:$0xff]  ;;  %v395_v57 = vld [vmem:[%s7709_s3 + $0x10] sm:$0xff]  ;;  %v4159_v27 = vpack.c.bf16 %v861_v23, %v857_v18  ;;  %v885_v63 = vld [vmem:[#allocation2 + $0x1b8] sm:$0xff] }
 0x140   :  { %v4080_v46 = vpack.c.bf16 %v391_v25, %v389_v34  ;;  %v4157_v25 = vpack.c.bf16 %v852_v14, %v848_v12  ;;  %v869_v34 = vld [vmem:[#allocation2 + $0x138] sm:$0xff]  ;;  %v872_v55 = vld [vmem:[#allocation2 + $0x150] sm:$0xff] }
 0x141   :  { %v4077_v8 = vpack.c.bf16 %v392_v51, %v390_v32  ;;  %v860_v32 = vld [vmem:[#allocation2 + $0xf0] sm:$0xff]  ;;  %v865_v51 = vld [vmem:[#allocation2 + $0x118] sm:$0xff] }
 0x142   :  { %v4163_v4 = vpack.c.bf16 %v869_v34, %v865_v51  ;;  %v876_v56 = vld [vmem:[#allocation2 + $0x170] sm:$0xff]  ;;  %v889_v18 = vld [vmem:[#allocation2 + $0x1d8] sm:$0xff] }
 0x143   :  { %4079 = vmatprep.subr.msk.bf16.mxu1 %vm5569_vm3, %v4077_v8  ;;  %v396_v8 = vld [vmem:[%s7709_s3 + $0x18] sm:$0xff]  ;;  %v880_v12 = vld [vmem:[#allocation2 + $0x190] sm:$0xff] }
 0x144   :  { %4082 = vmatpush1.bf16.msk.msra.mxu1 %vm5569_vm3, %v4080_v46  ;;  %v868_v46 = vld [vmem:[#allocation2 + $0x130] sm:$0xff]  ;;  %v893_v23 = vld [vmem:[#allocation2 + $0x1f8] sm:$0xff] }
 0x145   :  { %4148 = vmatprep.subr.bf16.mxu1 %v4147_v40  ;;  %v4161_v40 = vpack.c.bf16 %v860_v32, %v856_v30  ;;  %v884_v14 = vld [vmem:[#allocation2 + $0x1b0] sm:$0xff]  ;;  %v897_v51 = vld [vmem:[#allocation2 + $0x218] sm:$0xff] }
 0x146   :  { %v888_v30 = vld [vmem:[#allocation2 + $0x1d0] sm:$0xff]  ;;  %v901_v34 = vld [vmem:[#allocation2 + $0x238] sm:$0xff] }
 0x147   :  { %3934 = vmatmul.mubr.msk.f32.vlgmr.msra.gmra.mrb[0].mxu1 %vm407_vm4, %v393_v20  ;;  %v397_v20 = vld [vmem:[%s7709_s3 + $0x20] sm:$0xff]  ;;  %v892_v32 = vld [vmem:[#allocation2 + $0x1f0] sm:$0xff] }
 0x148   :  { %527 = vmatprep.mubr.f32.mxu1 %v7721_v0  ;;  %4150 = vmatpush1.bf16.msra.mxu1 %v4149_v24  ;;  %v4165_v24 = vpack.c.bf16 %v868_v46, %v864_v45  ;;  %v896_v45 = vld [vmem:[#allocation2 + $0x210] sm:$0xff] }
 0x149   :  { %4152 = vmatprep.subr.bf16.mxu1 %v4151_v52  ;;  %v4167_v52 = vpack.c.bf16 %v877_v49, %v873_v48  ;;  %v900_v46 = vld [vmem:[#allocation2 + $0x230] sm:$0xff]  ;;  %v905_v48 = vld [vmem:[#allocation2 + $0x258] sm:$0xff] }
 0x14a   :  { %v909_v49 = vld [vmem:[#allocation2 + $0x278] sm:$0xff] }
 0x14b   :  { %3935 = vmatmul.mubr.msk.f32.gmra.mrb[2].mxu1 %vm407_vm4, %v394_v5  ;;  %v398_v5 = vld [vmem:[%s7709_s3 + $0x28] sm:$0xff] }
 0x14c   :  { %533 = vmatprep.mubr.f32.mxu1 %v7721_v0  ;;  %4154 = vmatpush1.bf16.msra.mxu1 %v4153_v9  ;;  %v4169_v9 = vpack.c.bf16 %v876_v56, %v872_v55  ;;  %v904_v55 = vld [vmem:[#allocation2 + $0x250] sm:$0xff] }
 0x14d   :  { %4156 = vmatprep.subr.bf16.mxu1 %v4155_v11  ;;  %v4171_v11 = vpack.c.bf16 %v885_v63, %v881_v58  ;;  %v908_v56 = vld [vmem:[#allocation2 + $0x270] sm:$0xff]  ;;  %v913_v58 = vld [vmem:[#allocation2 + $0x298] sm:$0xff] }
 0x14e   :  { %v917_v63 = vld [vmem:[#allocation2 + $0x2b8] sm:$0xff] }
 0x14f   :  { %3936 = vmatmul.mubr.msk.f32.gmra.mrb[4].mxu1 %vm407_vm4, %v395_v57  ;;  %v399_v57 = vld [vmem:[%s7709_s3 + $0x30] sm:$0xff] }
 0x150   :  { %539 = vmatprep.mubr.f32.mxu1 %v7721_v0  ;;  %4158 = vmatpush1.bf16.msra.mxu1 %v4157_v25  ;;  %v4173_v25 = vpack.c.bf16 %v884_v14, %v880_v12  ;;  %v912_v12 = vld [vmem:[#allocation2 + $0x290] sm:$0xff] }
 0x151   :  { %4160 = vmatprep.subr.bf16.mxu1 %v4159_v27  ;;  %v4175_v27 = vpack.c.bf16 %v893_v23, %v889_v18  ;;  %v916_v14 = vld [vmem:[#allocation2 + $0x2b0] sm:$0xff]  ;;  %v921_v18 = vld [vmem:[#allocation2 + $0x2d8] sm:$0xff] }
 0x152   :  { %v925_v23 = vld [vmem:[#allocation2 + $0x2f8] sm:$0xff] }
 0x153   :  { %3937 = vmatmul.mubr.msk.f32.gmra.mrb[6].mxu1 %vm407_vm4, %v396_v8  ;;  %v400_v8 = vld [vmem:[%s7709_s3 + $0x38] sm:$0xff] }
 0x154   :  { %545 = vmatprep.mubr.f32.mxu1 %v7721_v0  ;;  %4162 = vmatpush1.bf16.msra.mxu1 %v4161_v40  ;;  %v4177_v40 = vpack.c.bf16 %v892_v32, %v888_v30  ;;  %v920_v30 = vld [vmem:[#allocation2 + $0x2d0] sm:$0xff] }
 0x155   :  { %4164 = vmatprep.subr.bf16.mxu1 %v4163_v4  ;;  %v4179_v4 = vpack.c.bf16 %v901_v34, %v897_v51  ;;  %v924_v32 = vld [vmem:[#allocation2 + $0x2f0] sm:$0xff]  ;;  %v929_v51 = vld [vmem:[#allocation2 + $0x318] sm:$0xff] }
 0x156   :  { %v933_v34 = vld [vmem:[#allocation2 + $0x338] sm:$0xff] }
 0x157   :  { %3938 = vmatmul.mubr.msk.f32.gmra.mrb[8].mxu1 %vm407_vm4, %v397_v20  ;;  %v401_v20 = vld [vmem:[%s7709_s3 + $0x40] sm:$0xff] }
 0x158   :  { %551 = vmatprep.mubr.f32.mxu1 %v7721_v0  ;;  %4166 = vmatpush1.bf16.msra.mxu1 %v4165_v24  ;;  %v4181_v24 = vpack.c.bf16 %v900_v46, %v896_v45  ;;  %v928_v45 = vld [vmem:[#allocation2 + $0x310] sm:$0xff] }
 0x159   :  { %4168 = vmatprep.subr.bf16.mxu1 %v4167_v52  ;;  %v4183_v52 = vpack.c.bf16 %v909_v49, %v905_v48  ;;  %v932_v46 = vld [vmem:[#allocation2 + $0x330] sm:$0xff]  ;;  %v405_v48 = vld [vmem:[%s7709_s3 + $0x60] sm:$0xff] }
 0x15a   :  { %v4197_v49 = vpack.c.bf16 %v932_v46, %v928_v45  ;;  %v951_v46 = vld [vmem:[#allocation2 + $0x3c8] sm:$0xff] }
 0x15b   :  { %3939 = vmatmul.mubr.msk.f32.gmra.mrb[10].mxu1 %vm407_vm4, %v398_v5  ;;  %v402_v5 = vld [vmem:[%s7709_s3 + $0x48] sm:$0xff] }
 0x15c   :  { %557 = vmatprep.mubr.f32.mxu1 %v7721_v0  ;;  %4170 = vmatpush1.bf16.msra.mxu1 %v4169_v9  ;;  %v4185_v9 = vpack.c.bf16 %v908_v56, %v904_v55  ;;  %v937_v55 = vld [vmem:[#allocation2 + $0x358] sm:$0xff] }
 0x15d   :  { %4172 = vmatprep.subr.bf16.mxu1 %v4171_v11  ;;  %v4187_v11 = vpack.c.bf16 %v917_v63, %v913_v58  ;;  %v941_v58 = vld [vmem:[#allocation2 + $0x378] sm:$0xff]  ;;  %v934_v63 = vld [vmem:[#allocation2 + $0x340] sm:$0xff] }
 0x15f   :  { %3940 = vmatmul.mubr.msk.f32.gmra.mrb[12].mxu1 %vm407_vm4, %v399_v57  ;;  %v403_v57 = vld [vmem:[%s7709_s3 + $0x50] sm:$0xff] }
 0x160   :  { %563 = vmatprep.mubr.f32.mxu1 %v7721_v0  ;;  %4174 = vmatpush1.bf16.msra.mxu1 %v4173_v25  ;;  %v4189_v25 = vpack.c.bf16 %v916_v14, %v912_v12  ;;  %v936_v12 = vld [vmem:[#allocation2 + $0x350] sm:$0xff] }
 0x161   :  { %4176 = vmatprep.subr.bf16.mxu1 %v4175_v27  ;;  %v4191_v27 = vpack.c.bf16 %v925_v23, %v921_v18  ;;  %v940_v14 = vld [vmem:[#allocation2 + $0x370] sm:$0xff]  ;;  %v943_v23 = vld [vmem:[#allocation2 + $0x388] sm:$0xff] }
 0x162   :  { %v4201_v18 = vpack.c.bf16 %v940_v14, %v936_v12  ;;  %v1561_v12 = vld [vmem:[#allocation5 + $0x18] sm:$0xff] }
 0x163   :  { %3941 = vmatmul.mubr.msk.f32.gmra.mrb[14].mxu1 %vm407_vm4, %v400_v8  ;;  %v404_v8 = vld [vmem:[%s7709_s3 + $0x58] sm:$0xff] }
 0x164   :  { %569 = vmatprep.mubr.f32.mxu1 %v7721_v0  ;;  %4178 = vmatpush1.bf16.msra.mxu1 %v4177_v40  ;;  %v4193_v40 = vpack.c.bf16 %v924_v32, %v920_v30  ;;  %v949_v30 = vld [vmem:[#allocation2 + $0x3b8] sm:$0xff] }
 0x165   :  { %4180 = vmatprep.subr.bf16.mxu1 %v4179_v4  ;;  %v4195_v4 = vpack.c.bf16 %v933_v34, %v929_v51  ;;  %v942_v51 = vld [vmem:[#allocation2 + $0x380] sm:$0xff] }
 0x166   :  { %v946_v34 = vld [vmem:[#allocation2 + $0x3a0] sm:$0xff] }
 0x167   :  { %3942 = vmatmul.mubr.msk.f32.gmra.mrb[16].mxu1 %vm407_vm4, %v401_v20  ;;  %v406_v20 = vld [vmem:[%s7709_s3 + $0x68] sm:$0x3f] }
 0x168   :  { %575 = vmatprep.mubr.f32.mxu1 %v7721_v0  ;;  %4182 = vmatpush1.bf16.msra.mxu1 %v4181_v24  ;;  %v935_v24 = vld [vmem:[#allocation2 + $0x348] sm:$0xff] }
 0x169   :  { %4184 = vmatprep.subr.bf16.mxu1 %v4183_v52  ;;  %v939_v52 = vld [vmem:[#allocation2 + $0x368] sm:$0xff] }
 0x16a   :  { %v4135_v56 = vpack.c.bf16 %v939_v52, %v935_v24  ;;  %v957_v24 = vld [vmem:[#allocation2 + $0x3f8] sm:$0xff]  ;;  %v950_v52 = vld [vmem:[#allocation2 + $0x3c0] sm:$0xff] }
 0x16b   :  { %3943 = vmatmul.mubr.msk.f32.gmra.mrb[18].mxu1 %vm407_vm4, %v402_v5  ;;  %v938_v5 = vld [vmem:[#allocation2 + $0x360] sm:$0xff] }
 0x16c   :  { %581 = vmatprep.mubr.f32.mxu1 %v7721_v0  ;;  %4186 = vmatpush1.bf16.msra.mxu1 %v4185_v9  ;;  %v4199_v9 = vpack.c.bf16 %v941_v58, %v937_v55  ;;  %v954_v55 = vld [vmem:[#allocation2 + $0x3e0] sm:$0xff] }
 0x16d   :  { %4188 = vmatprep.subr.bf16.mxu1 %v4187_v11  ;;  %v4137_v11 = vpack.c.bf16 %v938_v5, %v934_v63  ;;  %4136 = vmatprep.subr.bf16.mxu0 %v4135_v56  ;;  %v4145_v58 = vpack.c.bf16 %v954_v55, %v950_v52  ;;  %v952_v63 = vld [vmem:[#allocation2 + $0x3d0] sm:$0xff]  ;;  %v681_v52 = vld [vmem:[%s7711_s5 + $0x8] sm:$0xff] }
 0x16e   :  { %v956_v5 = vld [vmem:[#allocation2 + $0x3f0] sm:$0xff] }
 0x16f   :  { %3944 = vmatmul.mubr.msk.f32.gmra.mrb[20].mxu1 %vm407_vm4, %v403_v57  ;;  %4138 = vmatpush1.bf16.msra.mxu0 %v4137_v11  ;;  %v947_v57 = vld [vmem:[#allocation2 + $0x3a8] sm:$0xff] }
 0x170   :  { %587 = vmatprep.mubr.f32.mxu1 %v7721_v0  ;;  %4190 = vmatpush1.bf16.msra.mxu1 %v4189_v25  ;;  %v4139_v25 = vpack.c.bf16 %v947_v57, %v943_v23  ;;  %v1559_v11 = vld [vmem:[#allocation5 + $0x8] sm:$0xff]  ;;  %v7720_v23 = vsub.s32 6, %v5354_v28 }
 0x171   :  { %4192 = vmatprep.subr.bf16.mxu1 %v4191_v27  ;;  %v945_v27 = vld [vmem:[#allocation2 + $0x398] sm:$0xff]  ;;  %v4211_v14 = vpack.c.bf16 %v1561_v12, %v1559_v11  ;;  %v682_v11 = vld [vmem:[%s7711_s5 + $0x10] sm:$0xff] }
 0x172   :  { %v4203_v32 = vpack.c.bf16 %v949_v30, %v945_v27  ;;  %4140 = vmatprep.subr.bf16.mxu0 %v4139_v25  ;;  %v613_v25 = vrot.slane %v5369_v44, %v7720_v23  ;;  %v736_v27 = vld [vmem:[%s7712_s6] sm:$0xf]  ;;  %v1568_v23 = vld [vmem:[#allocation5 + $0x50] sm:$0xff] }
 0x173   :  { %3945 = vmatmul.mubr.msk.f32.gmra.mrb[22].mxu1 %vm407_vm4, %v404_v8  ;;  %v944_v8 = vld [vmem:[#allocation2 + $0x390] sm:$0xff] }
 0x174   :  { %593 = vmatprep.mubr.f32.mxu1 %v7721_v0  ;;  %4194 = vmatpush1.bf16.msra.mxu1 %v4193_v40  ;;  %v4141_v40 = vpack.c.bf16 %v946_v34, %v942_v51  ;;  %v5665_v51 = vsub.s32 3, %v5354_v28  ;;  %v741_v34 = vrot.slane %v736_v27, %v5364_v43 }
 0x175   :  { %4196 = vmatprep.subr.bf16.mxu1 %v4195_v4  ;;  %v948_v4 = vld [vmem:[#allocation2 + $0x3b0] sm:$0xff] }
 0x176   :  { %v4205_v45 = vpack.c.bf16 %v948_v4, %v944_v8  ;;  %4142 = vmatpush1.bf16.msra.mxu0 %v4141_v40  ;;  %7842 = vst [vmem:[#allocation16_spill] sm:$0xff] %v5665_v51 }
 0x177   :  { %3946 = vmatmul.mubr.msk.f32.gmra.mrb[24].mxu1 %vm407_vm4, %v405_v48  ;;  %v955_v48 = vld [vmem:[#allocation2 + $0x3e8] sm:$0xff] }
 0x178   :  { %599 = vmatprep.mubr.f32.mxu1 %v7721_v0  ;;  %4198 = vmatpush1.bf16.msra.mxu1 %v4197_v49  ;;  %v953_v49 = vld [vmem:[#allocation2 + $0x3d8] sm:$0xff] }
 0x179   :  { %4200 = vmatprep.subr.bf16.mxu1 %v4199_v9  ;;  %v4207_v56 = vpack.c.bf16 %v957_v24, %v953_v49  ;;  %v4209_v9 = vpack.c.bf16 %v956_v5, %v952_v63  ;;  %v787_v24 = vrot.slane %v736_v27, %v5360_v38 }
 0x17b   :  { %3947 = vmatmul.mubr.msk.f32.gmra.mrb[26].mxu1 %vm407_vm4, %v406_v20  ;;  %v4143_v20 = vpack.c.bf16 %v955_v48, %v951_v46  ;;  %v791_v48 = vrot.slane %v736_v27, %v5665_v51 }
 0x17c   :  { %4202 = vmatpush1.bf16.msra.mxu1 %v4201_v18  ;;  %v5647_v18 = vsub.s32 2, %v5354_v28 }
 0x17d   :  { %4204 = vmatprep.subr.bf16.mxu1 %v4203_v32  ;;  %4144 = vmatprep.subr.bf16.mxu0 %v4143_v20  ;;  %v5677_v20 = vrot.slane %v741_v34, %v5364_v43  ;;  %v1558_v34 = vld [vmem:[#allocation5] sm:$0xff] }
 0x17e   :  { %4146 = vmatpush1.bf16.msra.mxu0 %v4145_v58  ;;  %7841 = vst [vmem:[#allocation15_spill] sm:$0xff] %v5647_v18  ;;  %v609_v57 = vrot.slane %v5369_v44, %v5647_v18  ;;  %v5662_v32 = vrot.slane %v613_v25, %v5647_v18  ;;  %v745_v40 = vrot.slane %v736_v27, %v5647_v18  ;;  %v683_v27 = vld [vmem:[%s7711_s5 + $0x18] sm:$0xff] }
 0x17f   :  { %4212 = vmatprep.subr.bf16.mxu0 %v4211_v14  ;;  %v5697_v14 = vrot.slane %v791_v48, %v5360_v38 }
 0x180   :  { %4206 = vmatpush1.bf16.msra.mxu1 %v4205_v45  ;;  %v5659_v30 = vrot.slane %v609_v57, %v5647_v18  ;;  %v680_v45 = vld [vmem:[%s7711_s5] sm:$0xff]  ;;  %v5685_v58 = vrot.slane %v745_v40, %v5364_v43  ;;  %v5702_v57 = vrot.slane %v787_v24, %v5360_v38 }
 0x181   :  { %4208 = vmatprep.subr.bf16.mxu1 %v4207_v56 }
 0x184   :  { %4210 = vmatpush1.bf16.msra.mxu1 %v4209_v9 }
 0x21a   :  { %v523_v8 = vpop.f32.mrb[0].mxu1 }
 0x21b   :  { %v624_v44 = vmul.f32 %v5659_v30, %v523_v8  ;;  %v525_v4 = vpop.f32.mrb[1].mxu1  ;;  %v1560_v8 = vld [vmem:[#allocation5 + $0x10] sm:$0xff] }
 0x21c   :  { %v625_v46 = vmul.f32 %v5662_v32, %v525_v4 }
 0x21d   :  { %v652_v49 = vadd.f32 %v624_v44, %v5393_v7 }
 0x21e   :  { %v653_v55 = vadd.f32 %v625_v46, %v5384_v3  ;;  %v529_v56 = vpop.f32.mrb[2].mxu1  ;;  %v1565_v46 = vld [vmem:[#allocation5 + $0x38] sm:$0xff] }
 0x21f   :  { %v5687_v63 = vadd.f32 %v680_v45, %v652_v49  ;;  %v626_v5 = vmul.f32 %v5659_v30, %v529_v56  ;;  %v531_v7 = vpop.f32.mrb[3].mxu1  ;;  %v1563_v45 = vld [vmem:[#allocation5 + $0x28] sm:$0xff]  ;;  %v4213_v56 = vpack.c.bf16 %v1560_v8, %v1558_v34 }
 0x220   :  { %v5690_v9 = vadd.f32 %v681_v52, %v653_v55  ;;  %v627_v12 = vmul.f32 %v5662_v32, %v531_v7  ;;  %v684_v52 = vld [vmem:[%s7711_s5 + $0x20] sm:$0xff]  ;;  %v1567_v34 = vld [vmem:[#allocation5 + $0x48] sm:$0xff] }
 0x221   :  { %7843 = vst [vmem:[#allocation17_spill] sm:$0xff] %v5687_v63  ;;  %v756_v3 = vmul.f32 %v5677_v20, %v5687_v63  ;;  %v654_v25 = vadd.f32 %v626_v5, %v5401_v16 }
 0x222   :  { %7844 = vst [vmem:[#allocation18_spill] sm:$0xff] %v5690_v9  ;;  %v655_v40 = vadd.f32 %v627_v12, %v5406_v19  ;;  %v535_v44 = vpop.f32.mrb[4].mxu1  ;;  %v757_v4 = vmul.f32 %v5685_v58, %v5690_v9  ;;  %v1630_v9 = vld [vmem:[#allocation5 + $0x240] sm:$0xff] }
 0x223   :  { %v5711_v48 = vadd.f32 %v682_v11, %v654_v25  ;;  %v628_v49 = vmul.f32 %v5659_v30, %v535_v44  ;;  %v537_v24 = vpop.f32.mrb[5].mxu1  ;;  %v802_v5 = vadd.f32 %v5702_v57, %v756_v3  ;;  %v685_v11 = vld [vmem:[%s7711_s5 + $0x28] sm:$0xff]  ;;  %v4215_v25 = vpack.c.bf16 %v1565_v46, %v1563_v45 }
 0x224   :  { %v5714_v16 = vadd.f32 %v683_v27, %v655_v40  ;;  %v629_v55 = vmul.f32 %v5662_v32, %v537_v24  ;;  %v803_v19 = vadd.f32 %v5697_v14, %v757_v4  ;;  %v1562_v27 = vld [vmem:[#allocation5 + $0x20] sm:$0xff]  ;;  %v1564_v40 = vld [vmem:[#allocation5 + $0x30] sm:$0xff] }
 0x225   :  { %7845 = vst [vmem:[#allocation19_spill] sm:$0xff] %v5711_v48  ;;  %v656_v7 = vadd.f32 %v628_v49, %v5427_v41  ;;  %v758_v12 = vmul.f32 %v5677_v20, %v5711_v48  ;;  %v1569_v41 = vld [vmem:[#allocation5 + $0x58] sm:$0xff] }
 0x226   :  { %7846 = vst [vmem:[#allocation20_spill] sm:$0xff] %v5714_v16  ;;  %v657_v44 = vadd.f32 %v629_v55, %v5422_v35  ;;  %v541_v24 = vpop.f32.mrb[6].mxu1  ;;  %1044 = vmatprep.mubr.f32.mxu0 %v803_v19  ;;  %1193 = vmatprep.mubr.f32.mxu1 %v803_v19  ;;  %v759_v3 = vmul.f32 %v5685_v58, %v5714_v16  ;;  %v686_v35 = vld [vmem:[%s7711_s5 + $0x30] sm:$0xff] }
 0x227   :  { %v5731_v8 = vadd.f32 %v684_v52, %v656_v7  ;;  %v630_v4 = vmul.f32 %v5659_v30, %v541_v24  ;;  %v543_v49 = vpop.f32.mrb[7].mxu1  ;;  %1045 = vmatmul.mubr.f32.vlgmr.msra.gmra.mrb[28].mxu0 %v802_v5  ;;  %1194 = vmatmul.mubr.f32.vlgmr.msra.gmra.mrb[28].mxu1 %v802_v5  ;;  %v4217_v19 = vpack.c.bf16 %v1564_v40, %v1562_v27  ;;  %v687_v7 = vld [vmem:[%s7711_s5 + $0x38] sm:$0xff]  ;;  %v1566_v24 = vld [vmem:[#allocation5 + $0x40] sm:$0xff]  ;;  %v1628_v16 = vld [vmem:[#allocation5 + $0x230] sm:$0xff] }
 0x228   :  { %v5734_v45 = vadd.f32 %v685_v11, %v657_v44  ;;  %v631_v46 = vmul.f32 %v5662_v32, %v543_v49  ;;  %v805_v55 = vadd.f32 %v5697_v14, %v759_v3  ;;  %4214 = vmatpush1.bf16.msra.mxu0 %v4213_v56  ;;  %v804_v5 = vadd.f32 %v5702_v57, %v758_v12  ;;  %v1571_v56 = vld [vmem:[#allocation5 + $0x68] sm:$0xff]  ;;  %v1573_v27 = vld [vmem:[#allocation5 + $0x78] sm:$0xff] }
 0x229   :  { %7847 = vst [vmem:[#allocation21_spill] sm:$0xff] %v5731_v8  ;;  %v658_v52 = vadd.f32 %v630_v4, %v5431_v54  ;;  %v760_v11 = vmul.f32 %v5677_v20, %v5731_v8  ;;  %4216 = vmatprep.subr.bf16.mxu0 %v4215_v25  ;;  %v4219_v44 = vpack.c.bf16 %v1569_v41, %v1567_v34 }
 0x22a   :  { %7848 = vst [vmem:[#allocation22_spill] sm:$0xff] %v5734_v45  ;;  %v659_v49 = vadd.f32 %v631_v46, %v5436_v59  ;;  %v547_v3 = vpop.f32.mrb[8].mxu1  ;;  %1050 = vmatprep.mubr.f32.mxu0 %v805_v55  ;;  %1199 = vmatprep.mubr.f32.mxu1 %v805_v55  ;;  %v761_v54 = vmul.f32 %v5685_v58, %v5734_v45  ;;  %v688_v59 = vld [vmem:[%s7711_s5 + $0x40] sm:$0xff]  ;;  %v689_v55 = vld [vmem:[%s7711_s5 + $0x48] sm:$0xff] }
 0x22b   :  { %v5751_v40 = vadd.f32 %v686_v35, %v658_v52  ;;  %v632_v12 = vmul.f32 %v5659_v30, %v547_v3  ;;  %v549_v4 = vpop.f32.mrb[9].mxu1  ;;  %1051 = vmatmul.mubr.f32.gmra.mrb[30].mxu0 %v804_v5  ;;  %1200 = vmatmul.mubr.f32.gmra.mrb[30].mxu1 %v804_v5  ;;  %v4221_v46 = vpack.c.bf16 %v1568_v23, %v1566_v24  ;;  %v1572_v3 = vld [vmem:[#allocation5 + $0x70] sm:$0xff]  ;;  %v1575_v23 = vld [vmem:[#allocation5 + $0x88] sm:$0xff] }
 0x22c   :  { %v5754_v25 = vadd.f32 %v687_v7, %v659_v49  ;;  %v633_v34 = vmul.f32 %v5662_v32, %v549_v4  ;;  %v807_v41 = vadd.f32 %v5697_v14, %v761_v54  ;;  %4218 = vmatpush1.bf16.msra.mxu0 %v4217_v19  ;;  %v806_v52 = vadd.f32 %v5702_v57, %v760_v11  ;;  %v1570_v49 = vld [vmem:[#allocation5 + $0x60] sm:$0xff]  ;;  %v1577_v19 = vld [vmem:[#allocation5 + $0x98] sm:$0xff] }
 0x22d   :  { %7849 = vst [vmem:[#allocation23_spill] sm:$0xff] %v5751_v40  ;;  %v660_v35 = vadd.f32 %v632_v12, %v5452_v21  ;;  %v762_v7 = vmul.f32 %v5677_v20, %v5751_v40  ;;  %4220 = vmatprep.subr.bf16.mxu0 %v4219_v44  ;;  %v4223_v5 = vpack.c.bf16 %v1573_v27, %v1571_v56 }
 0x22e   :  { %7850 = vst [vmem:[#allocation24_spill] sm:$0xff] %v5754_v25  ;;  %v661_v4 = vadd.f32 %v633_v34, %v5448_v15  ;;  %v553_v54 = vpop.f32.mrb[10].mxu1  ;;  %1056 = vmatprep.mubr.f32.mxu0 %v807_v41  ;;  %1205 = vmatprep.mubr.f32.mxu1 %v807_v41  ;;  %v763_v21 = vmul.f32 %v5685_v58, %v5754_v25  ;;  %v690_v15 = vld [vmem:[%s7711_s5 + $0x50] sm:$0xff]  ;;  %v691_v41 = vld [vmem:[%s7711_s5 + $0x58] sm:$0xff] }
 0x22f   :  { %v5771_v24 = vadd.f32 %v688_v59, %v660_v35  ;;  %v634_v11 = vmul.f32 %v5659_v30, %v553_v54  ;;  %v555_v12 = vpop.f32.mrb[11].mxu1  ;;  %1057 = vmatmul.mubr.f32.gmra.mrb[32].mxu0 %v806_v52  ;;  %1206 = vmatmul.mubr.f32.gmra.mrb[32].mxu1 %v806_v52  ;;  %v4225_v34 = vpack.c.bf16 %v1572_v3, %v1570_v49  ;;  %v1576_v54 = vld [vmem:[#allocation5 + $0x90] sm:$0xff]  ;;  %v1581_v49 = vld [vmem:[#allocation5 + $0xb8] sm:$0xff] }
 0x230   :  { %v5774_v44 = vadd.f32 %v689_v55, %v661_v4  ;;  %v635_v56 = vmul.f32 %v5662_v32, %v555_v12  ;;  %v809_v27 = vadd.f32 %v5697_v14, %v763_v21  ;;  %4222 = vmatpush1.bf16.msra.mxu0 %v4221_v46  ;;  %v808_v35 = vadd.f32 %v5702_v57, %v762_v7  ;;  %v1574_v4 = vld [vmem:[#allocation5 + $0x80] sm:$0xff]  ;;  %v1579_v46 = vld [vmem:[#allocation5 + $0xa8] sm:$0xff] }
 0x231   :  { %7851 = vst [vmem:[#allocation25_spill] sm:$0xff] %v5771_v24  ;;  %v662_v59 = vadd.f32 %v634_v11, %v5455_v31  ;;  %v764_v55 = vmul.f32 %v5677_v20, %v5771_v24  ;;  %4224 = vmatprep.subr.bf16.mxu0 %v4223_v5  ;;  %v4227_v52 = vpack.c.bf16 %v1577_v19, %v1575_v23 }
 0x232   :  { %7852 = vst [vmem:[#allocation26_spill] sm:$0xff] %v5774_v44  ;;  %v663_v12 = vadd.f32 %v635_v56, %v5460_v36  ;;  %v559_v21 = vpop.f32.mrb[12].mxu1  ;;  %1062 = vmatprep.mubr.f32.mxu0 %v809_v27  ;;  %1211 = vmatprep.mubr.f32.mxu1 %v809_v27  ;;  %v765_v31 = vmul.f32 %v5685_v58, %v5774_v44  ;;  %v692_v36 = vld [vmem:[%s7711_s5 + $0x60] sm:$0xff]  ;;  %v693_v27 = vld [vmem:[%s7711_s5 + $0x68] sm:$0xff] }
 0x233   :  { %v5791_v3 = vadd.f32 %v690_v15, %v662_v59  ;;  %v636_v7 = vmul.f32 %v5659_v30, %v559_v21  ;;  %v561_v11 = vpop.f32.mrb[13].mxu1  ;;  %1063 = vmatmul.mubr.f32.gmra.mrb[34].mxu0 %v808_v35  ;;  %1212 = vmatmul.mubr.f32.gmra.mrb[34].mxu1 %v808_v35  ;;  %v4229_v56 = vpack.c.bf16 %v1576_v54, %v1574_v4  ;;  %v1580_v21 = vld [vmem:[#allocation5 + $0xb0] sm:$0xff]  ;;  %v1585_v4 = vld [vmem:[#allocation5 + $0xd8] sm:$0xff] }
 0x234   :  { %v5794_v5 = vadd.f32 %v691_v41, %v663_v12  ;;  %v637_v23 = vmul.f32 %v5662_v32, %v561_v11  ;;  %v811_v19 = vadd.f32 %v5697_v14, %v765_v31  ;;  %4226 = vmatpush1.bf16.msra.mxu0 %v4225_v34  ;;  %v810_v59 = vadd.f32 %v5702_v57, %v764_v55  ;;  %v1578_v12 = vld [vmem:[#allocation5 + $0xa0] sm:$0xff]  ;;  %v1583_v34 = vld [vmem:[#allocation5 + $0xc8] sm:$0xff] }
 0x235   :  { %7853 = vst [vmem:[#allocation27_spill] sm:$0xff] %v5791_v3  ;;  %v664_v15 = vadd.f32 %v636_v7, %v5476_v1  ;;  %v766_v41 = vmul.f32 %v5677_v20, %v5791_v3  ;;  %4228 = vmatprep.subr.bf16.mxu0 %v4227_v52  ;;  %v4231_v35 = vpack.c.bf16 %v1581_v49, %v1579_v46 }
 0x236   :  { %7854 = vst [vmem:[#allocation28_spill] sm:$0xff] %v5794_v5  ;;  %v665_v11 = vadd.f32 %v637_v23, %v5472_v61  ;;  %v565_v31 = vpop.f32.mrb[14].mxu1  ;;  %1068 = vmatprep.mubr.f32.mxu0 %v811_v19  ;;  %1217 = vmatprep.mubr.f32.mxu1 %v811_v19  ;;  %v767_v1 = vmul.f32 %v5685_v58, %v5794_v5  ;;  %v694_v61 = vld [vmem:[%s7711_s5 + $0x70] sm:$0xff]  ;;  %v695_v19 = vld [vmem:[%s7711_s5 + $0x78] sm:$0xff] }
 0x237   :  { %v5811_v54 = vadd.f32 %v692_v36, %v664_v15  ;;  %v638_v55 = vmul.f32 %v5659_v30, %v565_v31  ;;  %v567_v7 = vpop.f32.mrb[15].mxu1  ;;  %1069 = vmatmul.mubr.f32.gmra.mrb[36].mxu0 %v810_v59  ;;  %1218 = vmatmul.mubr.f32.gmra.mrb[36].mxu1 %v810_v59  ;;  %v4233_v23 = vpack.c.bf16 %v1580_v21, %v1578_v12  ;;  %v1584_v31 = vld [vmem:[#allocation5 + $0xd0] sm:$0xff]  ;;  %v1589_v12 = vld [vmem:[#allocation5 + $0xf8] sm:$0xff] }
 0x238   :  { %v5814_v52 = vadd.f32 %v693_v27, %v665_v11  ;;  %v639_v46 = vmul.f32 %v5662_v32, %v567_v7  ;;  %v813_v49 = vadd.f32 %v5697_v14, %v767_v1  ;;  %4230 = vmatpush1.bf16.msra.mxu0 %v4229_v56  ;;  %v812_v15 = vadd.f32 %v5702_v57, %v766_v41  ;;  %v1582_v11 = vld [vmem:[#allocation5 + $0xc0] sm:$0xff]  ;;  %v1587_v56 = vld [vmem:[#allocation5 + $0xe8] sm:$0xff] }
 0x239   :  { %7855 = vst [vmem:[#allocation29_spill] sm:$0xff] %v5811_v54  ;;  %v666_v36 = vadd.f32 %v638_v55, %v5479_v13  ;;  %v768_v27 = vmul.f32 %v5677_v20, %v5811_v54  ;;  %4232 = vmatprep.subr.bf16.mxu0 %v4231_v35  ;;  %v4235_v59 = vpack.c.bf16 %v1585_v4, %v1583_v34 }
 0x23a   :  { %7856 = vst [vmem:[#allocation30_spill] sm:$0xff] %v5814_v52  ;;  %v667_v7 = vadd.f32 %v639_v46, %v5484_v22  ;;  %v571_v1 = vpop.f32.mrb[16].mxu1  ;;  %1074 = vmatprep.mubr.f32.mxu0 %v813_v49  ;;  %1223 = vmatprep.mubr.f32.mxu1 %v813_v49  ;;  %v769_v13 = vmul.f32 %v5685_v58, %v5814_v52  ;;  %v696_v22 = vld [vmem:[%s7711_s5 + $0x80] sm:$0xff]  ;;  %v697_v49 = vld [vmem:[%s7711_s5 + $0x88] sm:$0xff] }
 0x23b   :  { %v5831_v21 = vadd.f32 %v694_v61, %v666_v36  ;;  %v640_v41 = vmul.f32 %v5659_v30, %v571_v1  ;;  %v573_v55 = vpop.f32.mrb[17].mxu1  ;;  %1075 = vmatmul.mubr.f32.gmra.mrb[38].mxu0 %v812_v15  ;;  %1224 = vmatmul.mubr.f32.gmra.mrb[38].mxu1 %v812_v15  ;;  %v4237_v46 = vpack.c.bf16 %v1584_v31, %v1582_v11  ;;  %v1588_v1 = vld [vmem:[#allocation5 + $0xf0] sm:$0xff]  ;;  %v1593_v11 = vld [vmem:[#allocation5 + $0x118] sm:$0xff] }
 0x23c   :  { %v5834_v35 = vadd.f32 %v695_v19, %v667_v7  ;;  %v641_v34 = vmul.f32 %v5662_v32, %v573_v55  ;;  %v815_v4 = vadd.f32 %v5697_v14, %v769_v13  ;;  %4234 = vmatpush1.bf16.msra.mxu0 %v4233_v23  ;;  %v814_v36 = vadd.f32 %v5702_v57, %v768_v27  ;;  %v1586_v7 = vld [vmem:[#allocation5 + $0xe0] sm:$0xff]  ;;  %v1591_v23 = vld [vmem:[#allocation5 + $0x108] sm:$0xff] }
 0x23d   :  { %7857 = vst [vmem:[#allocation31_spill] sm:$0xff] %v5831_v21  ;;  %v668_v61 = vadd.f32 %v640_v41, %v5500_v50  ;;  %v770_v19 = vmul.f32 %v5677_v20, %v5831_v21  ;;  %4236 = vmatprep.subr.bf16.mxu0 %v4235_v59  ;;  %v4239_v15 = vpack.c.bf16 %v1589_v12, %v1587_v56  ;;  %v1629_v21 = vld [vmem:[#allocation5 + $0x238] sm:$0xff] }
 0x23e   :  { %7858 = vst [vmem:[#allocation32_spill] sm:$0xff] %v5834_v35  ;;  %v669_v55 = vadd.f32 %v641_v34, %v5496_v47  ;;  %v577_v13 = vpop.f32.mrb[18].mxu1  ;;  %1080 = vmatprep.mubr.f32.mxu0 %v815_v4  ;;  %1229 = vmatprep.mubr.f32.mxu1 %v815_v4  ;;  %v771_v50 = vmul.f32 %v5685_v58, %v5834_v35  ;;  %v698_v47 = vld [vmem:[%s7711_s5 + $0x90] sm:$0xff]  ;;  %v699_v4 = vld [vmem:[%s7711_s5 + $0x98] sm:$0xff]  ;;  %v1627_v35 = vld [vmem:[#allocation5 + $0x228] sm:$0xff] }
 0x23f   :  { %v5851_v31 = vadd.f32 %v696_v22, %v668_v61  ;;  %v642_v27 = vmul.f32 %v5659_v30, %v577_v13  ;;  %v579_v41 = vpop.f32.mrb[19].mxu1  ;;  %1081 = vmatmul.mubr.f32.gmra.mrb[40].mxu0 %v814_v36  ;;  %1230 = vmatmul.mubr.f32.gmra.mrb[40].mxu1 %v814_v36  ;;  %v4241_v34 = vpack.c.bf16 %v1588_v1, %v1586_v7  ;;  %v1592_v13 = vld [vmem:[#allocation5 + $0x110] sm:$0xff]  ;;  %v1597_v7 = vld [vmem:[#allocation5 + $0x138] sm:$0xff] }
 0x240   :  { %v5854_v59 = vadd.f32 %v697_v49, %v669_v55  ;;  %v643_v56 = vmul.f32 %v5662_v32, %v579_v41  ;;  %v817_v12 = vadd.f32 %v5697_v14, %v771_v50  ;;  %4238 = vmatpush1.bf16.msra.mxu0 %v4237_v46  ;;  %v816_v61 = vadd.f32 %v5702_v57, %v770_v19  ;;  %v1590_v55 = vld [vmem:[#allocation5 + $0x100] sm:$0xff]  ;;  %v1595_v46 = vld [vmem:[#allocation5 + $0x128] sm:$0xff] }
 0x241   :  { %7859 = vst [vmem:[#allocation33_spill] sm:$0xff] %v5851_v31  ;;  %v670_v22 = vadd.f32 %v642_v27, %v5503_v62  ;;  %v772_v49 = vmul.f32 %v5677_v20, %v5851_v31  ;;  %4240 = vmatprep.subr.bf16.mxu0 %v4239_v15  ;;  %v4243_v36 = vpack.c.bf16 %v1593_v11, %v1591_v23 }
 0x242   :  { %7860 = vst [vmem:[#allocation34_spill] sm:$0xff] %v5854_v59  ;;  %v671_v41 = vadd.f32 %v643_v56, %v5508_v6  ;;  %v583_v50 = vpop.f32.mrb[20].mxu1  ;;  %1086 = vmatprep.mubr.f32.mxu0 %v817_v12  ;;  %1235 = vmatprep.mubr.f32.mxu1 %v817_v12  ;;  %v773_v62 = vmul.f32 %v5685_v58, %v5854_v59  ;;  %v700_v6 = vld [vmem:[%s7711_s5 + $0xa0] sm:$0xff]  ;;  %v701_v12 = vld [vmem:[%s7711_s5 + $0xa8] sm:$0xff] }
 0x243   :  { %v5871_v1 = vadd.f32 %v698_v47, %v670_v22  ;;  %v644_v19 = vmul.f32 %v5659_v30, %v583_v50  ;;  %v585_v27 = vpop.f32.mrb[21].mxu1  ;;  %1087 = vmatmul.mubr.f32.gmra.mrb[42].mxu0 %v816_v61  ;;  %1236 = vmatmul.mubr.f32.gmra.mrb[42].mxu1 %v816_v61  ;;  %v4245_v56 = vpack.c.bf16 %v1592_v13, %v1590_v55  ;;  %v1596_v50 = vld [vmem:[#allocation5 + $0x130] sm:$0xff]  ;;  %v1601_v55 = vld [vmem:[#allocation5 + $0x158] sm:$0xff] }
 0x244   :  { %v5874_v15 = vadd.f32 %v699_v4, %v671_v41  ;;  %v645_v23 = vmul.f32 %v5662_v32, %v585_v27  ;;  %v819_v11 = vadd.f32 %v5697_v14, %v773_v62  ;;  %4242 = vmatpush1.bf16.msra.mxu0 %v4241_v34  ;;  %v818_v22 = vadd.f32 %v5702_v57, %v772_v49  ;;  %v1594_v41 = vld [vmem:[#allocation5 + $0x120] sm:$0xff]  ;;  %v1599_v34 = vld [vmem:[#allocation5 + $0x148] sm:$0xff] }
 0x245   :  { %7861 = vst [vmem:[#allocation35_spill] sm:$0xff] %v5871_v1  ;;  %v672_v47 = vadd.f32 %v644_v19, %v5524_v29  ;;  %v774_v4 = vmul.f32 %v5677_v20, %v5871_v1  ;;  %4244 = vmatprep.subr.bf16.mxu0 %v4243_v36  ;;  %v4247_v61 = vpack.c.bf16 %v1597_v7, %v1595_v46  ;;  %v1622_v1 = vld [vmem:[#allocation5 + $0x200] sm:$0xff] }
 0x246   :  { %7862 = vst [vmem:[#allocation36_spill] sm:$0xff] %v5874_v15  ;;  %v673_v27 = vadd.f32 %v645_v23, %v5520_v26  ;;  %v589_v62 = vpop.f32.mrb[22].mxu1  ;;  %1092 = vmatprep.mubr.f32.mxu0 %v819_v11  ;;  %1241 = vmatprep.mubr.f32.mxu1 %v819_v11  ;;  %v775_v29 = vmul.f32 %v5685_v58, %v5874_v15  ;;  %v702_v26 = vld [vmem:[%s7711_s5 + $0xb0] sm:$0xff]  ;;  %v703_v11 = vld [vmem:[%s7711_s5 + $0xb8] sm:$0xff] }
 0x247   :  { %v5891_v13 = vadd.f32 %v700_v6, %v672_v47  ;;  %v646_v49 = vmul.f32 %v5659_v30, %v589_v62  ;;  %v591_v19 = vpop.f32.mrb[23].mxu1  ;;  %1093 = vmatmul.mubr.f32.gmra.mrb[44].mxu0 %v818_v22  ;;  %1242 = vmatmul.mubr.f32.gmra.mrb[44].mxu1 %v818_v22  ;;  %v4249_v23 = vpack.c.bf16 %v1596_v50, %v1594_v41  ;;  %v1600_v62 = vld [vmem:[#allocation5 + $0x150] sm:$0xff] }
 0x248   :  { %v5894_v36 = vadd.f32 %v701_v12, %v673_v27  ;;  %v647_v46 = vmul.f32 %v5662_v32, %v591_v19  ;;  %v821_v7 = vadd.f32 %v5697_v14, %v775_v29  ;;  %4246 = vmatpush1.bf16.msra.mxu0 %v4245_v56  ;;  %v820_v47 = vadd.f32 %v5702_v57, %v774_v4  ;;  %v1598_v27 = vld [vmem:[#allocation5 + $0x140] sm:$0xff] }
 0x249   :  { %7863 = vst [vmem:[#allocation37_spill] sm:$0xff] %v5891_v13  ;;  %v674_v6 = vadd.f32 %v646_v49, %v5527_v33  ;;  %v776_v12 = vmul.f32 %v5677_v20, %v5891_v13  ;;  %4248 = vmatprep.subr.bf16.mxu0 %v4247_v61  ;;  %v4251_v22 = vpack.c.bf16 %v1601_v55, %v1599_v34  ;;  %v704_v61 = vld [vmem:[%s7711_s5 + $0xc0] sm:$0xff] }
 0x24a   :  { %7864 = vst [vmem:[#allocation38_spill] sm:$0xff] %v5894_v36  ;;  %v675_v19 = vadd.f32 %v647_v46, %v5532_v42  ;;  %v595_v29 = vpop.f32.mrb[24].mxu1  ;;  %1098 = vmatprep.mubr.f32.mxu0 %v821_v7  ;;  %1247 = vmatprep.mubr.f32.mxu1 %v821_v7  ;;  %v777_v33 = vmul.f32 %v5685_v58, %v5894_v36 }
 0x24b   :  { %v5911_v56 = vadd.f32 %v702_v26, %v674_v6  ;;  %v648_v41 = vmul.f32 %v5659_v30, %v595_v29  ;;  %v597_v4 = vpop.f32.mrb[25].mxu1  ;;  %1099 = vmatmul.mubr.f32.gmra.mrb[46].mxu0 %v820_v47  ;;  %1248 = vmatmul.mubr.f32.gmra.mrb[46].mxu1 %v820_v47  ;;  %v4253_v55 = vpack.c.bf16 %v1600_v62, %v1598_v27  ;;  %v705_v26 = vld [vmem:[%s7711_s5 + $0xc8] sm:$0xff] }
 0x24c   :  { %v5914_v50 = vadd.f32 %v703_v11, %v675_v19  ;;  %v649_v42 = vmul.f32 %v5662_v32, %v597_v4  ;;  %v823_v34 = vadd.f32 %v5697_v14, %v777_v33  ;;  %4250 = vmatpush1.bf16.msra.mxu0 %v4249_v23  ;;  %v822_v46 = vadd.f32 %v5702_v57, %v776_v12 }
 0x24d   :  { %7865 = vst [vmem:[#allocation39_spill] sm:$0xff] %v5911_v56  ;;  %v676_v49 = vadd.f32 %v648_v41, %v5548_v2  ;;  %v778_v7 = vmul.f32 %v5677_v20, %v5911_v56  ;;  %4252 = vmatprep.subr.bf16.mxu0 %v4251_v22  ;;  %v706_v22 = vld [vmem:[%s7711_s5 + $0xd0] sm:$0x3f]  ;;  %v4279_v40 = vpack.c.bf16 %v1629_v21, %v1627_v35  ;;  %v1633_v21 = vld [vmem:[#allocation5 + $0x258] sm:$0xff] }
 0x24e   :  { %7866 = vst [vmem:[#allocation40_spill] sm:$0xff] %v5914_v50  ;;  %v677_v6 = vadd.f32 %v649_v42, %v5544_v60  ;;  %v601_v11 = vpop.f32.mrb[26].mxu1  ;;  %1104 = vmatprep.mubr.f32.mxu0 %v823_v34  ;;  %1253 = vmatprep.mubr.f32.mxu1 %v823_v34  ;;  %v779_v23 = vmul.f32 %v5685_v58, %v5914_v50 }
 0x24f   :  { %v5931_v47 = vadd.f32 %v704_v61, %v676_v49  ;;  %v650_v2 = vmul.f32 %v5659_v30, %v601_v11  ;;  %v603_v27 = vpop.f32.mrb[27].mxu1  ;;  %1105 = vmatmul.mubr.f32.gmra.mrb[48].mxu0 %v822_v46  ;;  %1254 = vmatmul.mubr.f32.gmra.mrb[48].mxu1 %v822_v46  ;;  %v707_v30 = vld [vmem:[%s7711_s5 + $0xd8] sm:$0x3f]  ;;  %v824_v29 = vadd.f32 %v5702_v57, %v778_v7  ;;  %v1602_v7 = vld [vmem:[#allocation5 + $0x160] sm:$0xff] }
 0x250   :  { %v5934_v12 = vadd.f32 %v705_v26, %v677_v6  ;;  %v651_v60 = vmul.f32 %v5662_v32, %v603_v27  ;;  %v825_v62 = vadd.f32 %v5697_v14, %v779_v23  ;;  %4254 = vmatpush1.bf16.msra.mxu0 %v4253_v55  ;;  %v1603_v26 = vld [vmem:[#allocation5 + $0x168] sm:$0xff]  ;;  %v1605_v46 = vld [vmem:[#allocation5 + $0x178] sm:$0xff]  ;;  %v1604_v6 = vld [vmem:[#allocation5 + $0x170] sm:$0xff] }
 0x251   :  { %7867 = vst [vmem:[#allocation41_spill] sm:$0xff] %v5931_v47  ;;  %v678_v19 = vadd.f32 %v650_v2, %v5551_v10  ;;  %v780_v33 = vmul.f32 %v5677_v20, %v5931_v47  ;;  %v4257_v11 = vpack.c.bf16 %v1604_v6, %v1602_v7  ;;  %v1609_v23 = vld [vmem:[#allocation5 + $0x198] sm:$0xff]  ;;  %v1608_v27 = vld [vmem:[#allocation5 + $0x190] sm:$0xff]  ;;  %v1623_v7 = vld [vmem:[#allocation5 + $0x208] sm:$0xff] }
 0x252   :  { %7868 = vst [vmem:[#allocation42_spill] sm:$0xff] %v5934_v12  ;;  %v679_v41 = vadd.f32 %v651_v60, %v5556_v17  ;;  %1110 = vmatprep.mubr.f32.mxu0 %v825_v62  ;;  %1259 = vmatprep.mubr.f32.mxu1 %v825_v62  ;;  %v781_v32 = vmul.f32 %v5685_v58, %v5934_v12  ;;  %v1613_v60 = vld [vmem:[#allocation5 + $0x1b8] sm:$0xff] }
 0x253   :  { %v5951_v4 = vadd.f32 %v706_v22, %v678_v19  ;;  %1111 = vmatmul.mubr.f32.gmra.mrb[50].mxu0 %v824_v29  ;;  %1260 = vmatmul.mubr.f32.gmra.mrb[50].mxu1 %v824_v29  ;;  %v826_v42 = vadd.f32 %v5702_v57, %v780_v33  ;;  %v1611_v22 = vld [vmem:[#allocation5 + $0x1a8] sm:$0xff]  ;;  %v1610_v19 = vld [vmem:[#allocation5 + $0x1a0] sm:$0xff]  ;;  %v1625_v6 = vld [vmem:[#allocation5 + $0x218] sm:$0xff] }
 0x254   :  { %v5953_v10 = vadd.f32 %v707_v30, %v679_v41  ;;  %v827_v61 = vadd.f32 %v5697_v14, %v781_v32  ;;  %v4263_v62 = vpack.c.bf16 %v1613_v60, %v1611_v22  ;;  %v1612_v30 = vld [vmem:[#allocation5 + $0x1b0] sm:$0xff]  ;;  %v1615_v33 = vld [vmem:[#allocation5 + $0x1c8] sm:$0xff]  ;;  %v1617_v41 = vld [vmem:[#allocation5 + $0x1d8] sm:$0xff] }
 0x255   :  { %7869 = vst [vmem:[#allocation43_spill] sm:$0xff] %v5951_v4  ;;  %v782_v34 = vmul.f32 %v5677_v20, %v5951_v4  ;;  %v4255_v20 = vpack.c.bf16 %v1605_v46, %v1603_v26  ;;  %v4265_v29 = vpack.c.bf16 %v1612_v30, %v1610_v19  ;;  %v4267_v32 = vpack.c.bf16 %v1617_v41, %v1615_v33  ;;  %v1618_v26 = vld [vmem:[#allocation5 + $0x1e0] sm:$0xff]  ;;  %v1620_v46 = vld [vmem:[#allocation5 + $0x1f0] sm:$0xff] }
 0x256   :  { %7870 = vst [vmem:[#allocation44_spill] sm:$0xff] %v5953_v10  ;;  %1116 = vmatprep.mubr.f32.mxu0 %v827_v61  ;;  %1265 = vmatprep.mubr.f32.mxu1 %v827_v61  ;;  %v783_v17 = vmul.f32 %v5685_v58, %v5953_v10  ;;  %v1607_v58 = vld [vmem:[#allocation5 + $0x188] sm:$0xff]  ;;  %v1614_v61 = vld [vmem:[#allocation5 + $0x1c0] sm:$0xff] }
 0x257   :  { %1117 = vmatmul.mubr.f32.gmra.mrb[52].mxu0 %v826_v42  ;;  %1266 = vmatmul.mubr.f32.gmra.mrb[52].mxu1 %v826_v42  ;;  %v828_v49 = vadd.f32 %v5702_v57, %v782_v34  ;;  %v4259_v2 = vpack.c.bf16 %v1609_v23, %v1607_v58  ;;  %v1616_v42 = vld [vmem:[#allocation5 + $0x1d0] sm:$0xff]  ;;  %v5967_v58 = vld [vmem:[%s7714_s8] sm:$0xf] }
 0x258   :  { %v829_v55 = vadd.f32 %v5697_v14, %v783_v17  ;;  %4256 = vmatprep.subr.bf16.mxu0 %v4255_v20  ;;  %v1606_v14 = vld [vmem:[#allocation5 + $0x180] sm:$0xff]  ;;  %v4269_v34 = vpack.c.bf16 %v1616_v42, %v1614_v61  ;;  %v1619_v17 = vld [vmem:[#allocation5 + $0x1e8] sm:$0xff]  ;;  %v4273_v20 = vpack.c.bf16 %v1620_v46, %v1618_v26  ;;  %v5979_v22 = vrot.slane %v5967_v58, %v5364_v43 }
 0x259   :  { %4258 = vmatpush1.bf16.msra.mxu0 %v4257_v11  ;;  %v4261_v57 = vpack.c.bf16 %v1608_v27, %v1606_v14  ;;  %v4275_v11 = vpack.c.bf16 %v1625_v6, %v1623_v7  ;;  %v5973_v14 = vrot.slane %v5967_v58, %v5360_v38  ;;  %v1638_v43 = vld [vmem:[#allocation5 + $0x280] sm:$0xff] }
 0x25a   :  { %1122 = vmatprep.mubr.f32.mxu0 %v829_v55  ;;  %1271 = vmatprep.mubr.f32.mxu1 %v829_v55  ;;  %v1621_v55 = vld [vmem:[#allocation5 + $0x1f8] sm:$0xff] }
 0x25b   :  { %1123 = vmatmul.mubr.f32.gmra.mrb[54].mxu0 %v828_v49  ;;  %1272 = vmatmul.mubr.f32.gmra.mrb[54].mxu1 %v828_v49  ;;  %v4271_v49 = vpack.c.bf16 %v1621_v55, %v1619_v17 }
 0x25c   :  { %2246 = vmatprep.mubr.f32.mxu1 %v7721_v0  ;;  %4260 = vmatprep.subr.bf16.mxu0 %v4259_v2 }
 0x25d   :  { %4262 = vmatpush1.bf16.msra.mxu0 %v4261_v57 }
 0x25e   :  { %4264 = vmatprep.subr.bf16.mxu0 %v4263_v62 }
 0x261   :  { %4266 = vmatpush1.bf16.msra.mxu0 %v4265_v29 }
 0x262   :  { %4268 = vmatprep.subr.bf16.mxu0 %v4267_v32 }
 0x265   :  { %4270 = vmatpush1.bf16.msra.mxu0 %v4269_v34 }
 0x266   :  { %4272 = vmatprep.subr.bf16.mxu0 %v4271_v49 }
 0x269   :  { %4274 = vmatpush1.bf16.msra.mxu0 %v4273_v20 }
 0x26a   :  { %4276 = vmatprep.subr.bf16.mxu0 %v4275_v11 }
 0x2fa   :  { %v1046_v23 = vpop.f32.mrb[28].mxu0  ;;  %v5969_v2 = vpop.f32.mrb[28].mxu1 }
 0x2fb   :  { %v1048_v27 = vpop.f32.mrb[29].mxu0  ;;  %v5975_v57 = vpop.f32.mrb[29].mxu1  ;;  %v1047_v30 = vadd.f32 %v1046_v23, %v5979_v22 }
 0x2fc   :  { %v1049_v60 = vadd.f32 %v1048_v27, %v5973_v14 }
 0x2fd   :  { %v1334_v42 = vmul.f32 0.70710677, %v1047_v30  ;;  %v1278_v5 = vmul.f32 0.5, %v1047_v30  ;;  %v1626_v30 = vld [vmem:[#allocation5 + $0x220] sm:$0xff] }
 0x2fe   :  { %v1052_v62 = vpop.f32.mrb[30].mxu0  ;;  %v5982_v19 = vpop.f32.mrb[30].mxu1  ;;  %v1335_v61 = vmul.f32 0.70710677, %v1049_v60 }
 0x2ff   :  { %v1054_v29 = vpop.f32.mrb[31].mxu0  ;;  %v5985_v33 = vpop.f32.mrb[31].mxu1  ;;  %v5995_v49 = vadd.f32 %v1052_v62, %v5979_v22 }
 0x300   :  { %v5990_v34 = vadd.f32 %v1054_v29, %v5973_v14  ;;  %4860 = verf.f32 %v1335_v61 }
 0x301   :  { %4862 = verf.f32 %v1334_v42  ;;  %v1338_v23 = vmul.f32 0.70710677, %v5995_v49 }
 0x302   :  { %v1058_v41 = vpop.f32.mrb[32].mxu0  ;;  %v5987_v32 = vpop.f32.mrb[32].mxu1  ;;  %v1339_v6 = vmul.f32 0.70710677, %v5990_v34 }
 0x303   :  { %v1060_v17 = vpop.f32.mrb[33].mxu0  ;;  %v5992_v55 = vpop.f32.mrb[33].mxu1  ;;  %v6007_v27 = vadd.f32 %v1058_v41, %v5979_v22 }
 0x304   :  { %v6000_v20 = vadd.f32 %v1060_v17, %v5973_v14  ;;  %4864 = verf.f32 %v1339_v6 }
 0x305   :  { %4866 = verf.f32 %v1338_v23  ;;  %v1342_v17 = vmul.f32 0.70710677, %v6007_v27 }
 0x306   :  { %v1064_v26 = vpop.f32.mrb[34].mxu0  ;;  %v5997_v46 = vpop.f32.mrb[34].mxu1  ;;  %v1343_v0 = vmul.f32 0.70710677, %v6000_v20 }
 0x307   :  { %v1066_v7 = vpop.f32.mrb[35].mxu0  ;;  %v6003_v11 = vpop.f32.mrb[35].mxu1  ;;  %v6023_v4 = vadd.f32 %v1064_v26, %v5979_v22 }
 0x308   :  { %v6015_v42 = vadd.f32 %v1066_v7, %v5973_v14  ;;  %4868 = verf.f32 %v1343_v0 }
 0x309   :  { %4870 = verf.f32 %v1342_v17  ;;  %v1346_v36 = vmul.f32 0.70710677, %v6023_v4  ;;  %v1624_v17 = vld [vmem:[#allocation5 + $0x210] sm:$0xff] }
 0x30a   :  { %v1070_v62 = vpop.f32.mrb[36].mxu0  ;;  %v6009_v29 = vpop.f32.mrb[36].mxu1  ;;  %v1347_v47 = vmul.f32 0.70710677, %v6015_v42 }
 0x30b   :  { %v1072_v61 = vpop.f32.mrb[37].mxu0  ;;  %v6012_v53 = vpop.f32.mrb[37].mxu1  ;;  %v6037_v15 = vadd.f32 %v1070_v62, %v5979_v22  ;;  %v4277_v62 = vpack.c.bf16 %v1624_v17, %v1622_v1  ;;  %v1283_v1 = vmul.f32 0.5, %v5990_v34 }
 0x30c   :  { %v4861_v12 = vpop.eup %4860  ;;  %v6027_v7 = vadd.f32 %v1072_v61, %v5973_v14  ;;  %4872 = verf.f32 %v1347_v47  ;;  %v1279_v61 = vmul.f32 0.5, %v1049_v60 }
 0x30d   :  { %v4863_v6 = vpop.eup %4862  ;;  %v1447_v13 = vadd.f32 1.0, %v4861_v12  ;;  %4874 = verf.f32 %v1346_v36  ;;  %v1350_v25 = vmul.f32 0.70710677, %v6037_v15  ;;  %v1282_v36 = vmul.f32 0.5, %v5995_v49 }
 0x30e   :  { %v1076_v39 = vpop.f32.mrb[38].mxu0  ;;  %v6018_v37 = vpop.f32.mrb[38].mxu1  ;;  %v1446_v26 = vadd.f32 1.0, %v4863_v6  ;;  %v1351_v59 = vmul.f32 0.70710677, %v6027_v7 }
 0x30f   :  { %v1078_v41 = vpop.f32.mrb[39].mxu0  ;;  %v6020_v10 = vpop.f32.mrb[39].mxu1  ;;  %v1503_v47 = vmul.f32 %v1447_v13, %v1279_v61 }
 0x310   :  { %v4865_v31 = vpop.eup %4864  ;;  %v1502_v44 = vmul.f32 %v1446_v26, %v1278_v5  ;;  %4876 = verf.f32 %v1351_v59  ;;  %v6050_v45 = vadd.f32 %v1078_v41, %v5973_v14  ;;  %v6058_v5 = vadd.f32 %v1076_v39, %v5979_v22 }
 0x311   :  { %v4867_v52 = vpop.eup %4866  ;;  %v1451_v60 = vadd.f32 1.0, %v4865_v31  ;;  %1762 = vmatprep.mubr.f32.mxu0 %v1503_v47  ;;  %v1631_v31 = vld [vmem:[#allocation5 + $0x248] sm:$0xff]  ;;  %4878 = verf.f32 %v1350_v25  ;;  %v4281_v39 = vpack.c.bf16 %v1628_v16, %v1626_v30  ;;  %v1286_v30 = vmul.f32 0.5, %v6007_v27 }
 0x312   :  { %v6029_v23 = vpop.f32.mrb[40].mxu0  ;;  %v6031_v50 = vpop.f32.mrb[40].mxu1  ;;  %v1450_v8 = vadd.f32 1.0, %v4867_v52  ;;  %1763 = vmatmul.mubr.f32.vlgmr.msra.gmra.mrb[56].mxu0 %v1502_v44  ;;  %v1287_v44 = vmul.f32 0.5, %v6000_v20  ;;  %v1355_v61 = vmul.f32 0.70710677, %v6050_v45  ;;  %v4283_v63 = vpack.c.bf16 %v1633_v21, %v1631_v31 }
 0x313   :  { %v1084_v56 = vpop.f32.mrb[41].mxu0  ;;  %v6033_v0 = vpop.f32.mrb[41].mxu1  ;;  %4278 = vmatpush1.bf16.msra.mxu0 %v4277_v62  ;;  %v1507_v34 = vmul.f32 %v1451_v60, %v1283_v1  ;;  %v1354_v25 = vmul.f32 0.70710677, %v6058_v5  ;;  %v1635_v20 = vld [vmem:[#allocation5 + $0x268] sm:$0xff]  ;;  %v1637_v60 = vld [vmem:[#allocation5 + $0x278] sm:$0xff] }
 0x314   :  { %v4869_v24 = vpop.eup %4868  ;;  %v6066_v26 = vadd.f32 %v1084_v56, %v5973_v14  ;;  %4280 = vmatprep.subr.bf16.mxu0 %v4279_v40  ;;  %v1506_v47 = vmul.f32 %v1450_v8, %v1282_v36  ;;  %v1632_v56 = vld [vmem:[#allocation5 + $0x250] sm:$0xff]  ;;  %v6081_v40 = vadd.f32 %v6029_v23, %v5979_v22  ;;  %4880 = verf.f32 %v1355_v61  ;;  %v1639_v61 = vld [vmem:[#allocation5 + $0x288] sm:$0xff] }
 0x315   :  { %v4871_v59 = vpop.eup %4870  ;;  %v1455_v41 = vadd.f32 1.0, %v4869_v24  ;;  %1768 = vmatprep.mubr.f32.mxu0 %v1507_v34  ;;  %v1291_v23 = vmul.f32 0.5, %v6015_v42  ;;  %4882 = verf.f32 %v1354_v25 }
 0x316   :  { %v6040_v54 = vpop.f32.mrb[42].mxu0  ;;  %v6042_v12 = vpop.f32.mrb[42].mxu1  ;;  %v1454_v24 = vadd.f32 1.0, %v4871_v59  ;;  %1769 = vmatmul.mubr.f32.gmra.mrb[58].mxu0 %v1506_v47  ;;  %v1359_v31 = vmul.f32 0.70710677, %v6066_v26  ;;  %v4285_v59 = vpack.c.bf16 %v1632_v56, %v1630_v9  ;;  %v1636_v47 = vld [vmem:[#allocation5 + $0x270] sm:$0xff] }
 0x317   :  { %v6044_v3 = vpop.f32.mrb[43].mxu0  ;;  %v6046_v6 = vpop.f32.mrb[43].mxu1  ;;  %v1511_v8 = vmul.f32 %v1455_v41, %v1287_v44  ;;  %4282 = vmatpush1.bf16.msra.mxu0 %v4281_v39  ;;  %v4287_v41 = vpack.c.bf16 %v1637_v60, %v1635_v20  ;;  %v1634_v44 = vld [vmem:[#allocation5 + $0x260] sm:$0xff]  ;;  %v1358_v39 = vmul.f32 0.70710677, %v6081_v40  ;;  %v6101_v25 = vadd.f32 %v6040_v54, %v5979_v22  ;;  %v1643_v54 = vld [vmem:[#allocation5 + $0x2a8] sm:$0xff] }
 0x318   :  { %v4873_v17 = vpop.eup %4872  ;;  %4284 = vmatprep.subr.bf16.mxu0 %v4283_v63  ;;  %v1510_v34 = vmul.f32 %v1454_v24, %v1286_v30  ;;  %4884 = verf.f32 %v1359_v31  ;;  %v6097_v42 = vadd.f32 %v6044_v3, %v5973_v14  ;;  %v4289_v56 = vpack.c.bf16 %v1636_v47, %v1634_v44 }
 0x319   :  { %v1459_v1 = vadd.f32 1.0, %v4873_v17  ;;  %v4875_v21 = vpop.eup %4874  ;;  %1774 = vmatprep.mubr.f32.mxu0 %v1511_v8  ;;  %v1641_v8 = vld [vmem:[#allocation5 + $0x298] sm:$0xff]  ;;  %4886 = verf.f32 %v1358_v39  ;;  %v1295_v44 = vmul.f32 0.5, %v6027_v7 }
 0x31a   :  { %v6052_v48 = vpop.f32.mrb[44].mxu0  ;;  %v6054_v13 = vpop.f32.mrb[44].mxu1  ;;  %v1458_v9 = vadd.f32 1.0, %v4875_v21  ;;  %1775 = vmatmul.mubr.f32.gmra.mrb[60].mxu0 %v1510_v34  ;;  %v1290_v21 = vmul.f32 0.5, %v6023_v4  ;;  %v4291_v3 = vpack.c.bf16 %v1641_v8, %v1639_v61  ;;  %v1640_v34 = vld [vmem:[#allocation5 + $0x290] sm:$0xff] }
 0x31b   :  { %v6060_v52 = vpop.f32.mrb[45].mxu0  ;;  %v6062_v35 = vpop.f32.mrb[45].mxu1  ;;  %v1515_v24 = vmul.f32 %v1459_v1, %v1291_v23  ;;  %4286 = vmatpush1.bf16.msra.mxu0 %v4285_v59  ;;  %v1645_v23 = vld [vmem:[#allocation5 + $0x2b8] sm:$0xff]  ;;  %v1363_v47 = vmul.f32 0.70710677, %v6097_v42 }
 0x31c   :  { %v4877_v17 = vpop.eup %4876  ;;  %4288 = vmatprep.subr.bf16.mxu0 %v4287_v41  ;;  %v1362_v4 = vmul.f32 0.70710677, %v6101_v25  ;;  %v6117_v41 = vadd.f32 %v6052_v48, %v5979_v22  ;;  %v6125_v8 = vadd.f32 %v6060_v52, %v5973_v14  ;;  %v1649_v52 = vld [vmem:[#allocation5 + $0x2d8] sm:$0xff] }
 0x31d   :  { %v4879_v30 = vpop.eup %4878  ;;  %v1463_v31 = vadd.f32 1.0, %v4877_v17  ;;  %1780 = vmatprep.mubr.f32.mxu0 %v1515_v24  ;;  %v4293_v17 = vpack.c.bf16 %v1640_v34, %v1638_v43  ;;  %v1642_v24 = vld [vmem:[#allocation5 + $0x2a0] sm:$0xff]  ;;  %v1294_v43 = vmul.f32 0.5, %v6037_v15  ;;  %4888 = verf.f32 %v1363_v47 }
 0x31e   :  { %v6070_v28 = vpop.f32.mrb[46].mxu0  ;;  %v6072_v49 = vpop.f32.mrb[46].mxu1  ;;  %4890 = verf.f32 %v1362_v4 }
 0x31f   :  { %7871 = vst [vmem:[#allocation45_spill] sm:$0xff] %v6072_v49  ;;  %v6075_v62 = vpop.f32.mrb[47].mxu0  ;;  %v6077_v16 = vpop.f32.mrb[47].mxu1  ;;  %4290 = vmatpush1.bf16.msra.mxu0 %v4289_v56  ;;  %v1519_v7 = vmul.f32 %v1463_v31, %v1295_v44  ;;  %v1366_v31 = vmul.f32 0.70710677, %v6117_v41  ;;  %v1651_v44 = vld [vmem:[#allocation5 + $0x2e8] sm:$0xff] }
 0x320   :  { %7872 = vst [vmem:[#allocation46_spill] sm:$0xff] %v6077_v16  ;;  %4292 = vmatprep.subr.bf16.mxu0 %v4291_v3  ;;  %v4881_v56 = vpop.eup %4880  ;;  %v6134_v34 = vadd.f32 %v6075_v62, %v5973_v14  ;;  %v1367_v49 = vmul.f32 0.70710677, %v6125_v8 }
 0x321   :  { %4892 = verf.f32 %v1366_v31 }
 0x322   :  { %v6085_v36 = vpop.f32.mrb[48].mxu0  ;;  %v6088_v38 = vpop.f32.mrb[48].mxu1  ;;  %4894 = verf.f32 %v1367_v49 }
 0x323   :  { %7873 = vst [vmem:[#allocation47_spill] sm:$0xff] %v6088_v38  ;;  %v6090_v27 = vpop.f32.mrb[49].mxu0  ;;  %v6093_v63 = vpop.f32.mrb[49].mxu1  ;;  %v1462_v38 = vadd.f32 1.0, %v4879_v30  ;;  %v1644_v30 = vld [vmem:[#allocation5 + $0x2b0] sm:$0xff]  ;;  %4294 = vmatpush1.bf16.msra.mxu0 %v4293_v17 }
 0x324   :  { %7874 = vst [vmem:[#allocation48_spill] sm:$0xff] %v6093_v63  ;;  %v1467_v63 = vadd.f32 1.0, %v4881_v56  ;;  %v6144_v47 = vadd.f32 %v6090_v27, %v5973_v14  ;;  %v1371_v56 = vmul.f32 0.70710677, %v6134_v34 }
 0x325   :  { %v1518_v3 = vmul.f32 %v1462_v38, %v1294_v43  ;;  %v1299_v43 = vmul.f32 0.5, %v6050_v45  ;;  %v6162_v45 = vadd.f32 %v6085_v36, %v5979_v22 }
 0x326   :  { %v6103_v20 = vpop.f32.mrb[50].mxu0  ;;  %v6105_v60 = vpop.f32.mrb[50].mxu1  ;;  %4896 = verf.f32 %v1371_v56 }
 0x327   :  { %7875 = vst [vmem:[#allocation49_spill] sm:$0xff] %v6105_v60  ;;  %v6108_v1 = vpop.f32.mrb[51].mxu0  ;;  %v6110_v59 = vpop.f32.mrb[51].mxu1  ;;  %v1514_v60 = vmul.f32 %v1458_v9, %v1290_v21  ;;  %v4295_v9 = vpack.c.bf16 %v1645_v23, %v1643_v54  ;;  %v4297_v54 = vpack.c.bf16 %v1644_v30, %v1642_v24  ;;  %v1648_v23 = vld [vmem:[#allocation5 + $0x2d0] sm:$0xff]  ;;  %v6152_v30 = vadd.f32 %v6070_v28, %v5979_v22 }
 0x328   :  { %7876 = vst [vmem:[#allocation50_spill] sm:$0xff] %v6110_v59  ;;  %v4883_v59 = vpop.eup %4882  ;;  %v1523_v28 = vmul.f32 %v1467_v63, %v1299_v43  ;;  %v1655_v63 = vld [vmem:[#allocation5 + $0x308] sm:$0xff] }
 0x329   :  { %1781 = vmatmul.mubr.f32.gmra.mrb[62].mxu0 %v1514_v60  ;;  %v1646_v60 = vld [vmem:[#allocation5 + $0x2c0] sm:$0xff]  ;;  %v4885_v62 = vpop.eup %4884  ;;  %4296 = vmatprep.subr.bf16.mxu0 %v4295_v9  ;;  %v1466_v24 = vadd.f32 1.0, %v4883_v59  ;;  %v1298_v9 = vmul.f32 0.5, %v6058_v5  ;;  %v1375_v59 = vmul.f32 0.70710677, %v6144_v47 }
 0x32a   :  { %v6119_v61 = vpop.f32.mrb[52].mxu0  ;;  %v6121_v39 = vpop.f32.mrb[52].mxu1  ;;  %1786 = vmatprep.mubr.f32.mxu0 %v1519_v7  ;;  %v1653_v7 = vld [vmem:[#allocation5 + $0x2f8] sm:$0xff]  ;;  %4298 = vmatpush1.bf16.msra.mxu0 %v4297_v54  ;;  %v1370_v16 = vmul.f32 0.70710677, %v6152_v30  ;;  %v1650_v5 = vld [vmem:[#allocation5 + $0x2e0] sm:$0xff] }
 0x32b   :  { %7877 = vst [vmem:[#allocation51_spill] sm:$0xff] %v6121_v39  ;;  %v6127_v21 = vpop.f32.mrb[53].mxu0  ;;  %v6129_v48 = vpop.f32.mrb[53].mxu1  ;;  %v1647_v39 = vld [vmem:[#allocation5 + $0x2c8] sm:$0xff]  ;;  %v1657_v54 = vld [vmem:[#allocation5 + $0x318] sm:$0xff]  ;;  %4898 = verf.f32 %v1375_v59  ;;  %v1307_v59 = vmul.f32 0.5, %v6097_v42  ;;  %v6193_v42 = vrot.slane %v5967_v58, %v5647_v18 }
 0x32c   :  { %7878 = vst [vmem:[#allocation52_spill] sm:$0xff] %v6129_v48  ;;  %v4299_v4 = vpack.c.bf16 %v1649_v52, %v1647_v39  ;;  %v4887_v27 = vpop.eup %4886  ;;  %v1471_v39 = vadd.f32 1.0, %v4885_v62  ;;  %v4303_v52 = vpack.c.bf16 %v1653_v7, %v1651_v44  ;;  %v1302_v44 = vmul.f32 0.5, %v6081_v40 }
 0x32d   :  { %1787 = vmatmul.mubr.f32.gmra.mrb[64].mxu0 %v1518_v3  ;;  %v1652_v3 = vld [vmem:[#allocation5 + $0x2f0] sm:$0xff]  ;;  %v1470_v31 = vadd.f32 1.0, %v4887_v27  ;;  %4900 = verf.f32 %v1370_v16  ;;  %v6172_v7 = vadd.f32 %v6103_v20, %v5979_v22  ;;  %v4307_v43 = vpack.c.bf16 %v1657_v54, %v1655_v63  ;;  %v1659_v27 = vld [vmem:[#allocation5 + $0x328] sm:$0xff]  ;;  %v1661_v20 = vld [vmem:[#allocation5 + $0x338] sm:$0xff] }
 0x32e   :  { %v6137_v48 = vpop.f32.mrb[54].mxu0  ;;  %v6139_v15 = vpop.f32.mrb[54].mxu1  ;;  %4300 = vmatprep.subr.bf16.mxu0 %v4299_v4  ;;  %1792 = vmatprep.mubr.f32.mxu0 %v1523_v28  ;;  %v4305_v36 = vpack.c.bf16 %v1652_v3, %v1650_v5  ;;  %v1374_v4 = vmul.f32 0.70710677, %v6162_v45  ;;  %v6177_v40 = vrot.slane %v5967_v58, %v5665_v51  ;;  %v6181_v16 = vadd.f32 %v6127_v21, %v5973_v14  ;;  %v1658_v5 = vld [vmem:[#allocation5 + $0x320] sm:$0xff]  ;;  %v1660_v21 = vld [vmem:[#allocation5 + $0x330] sm:$0xff] }
 0x32f   :  { %7879 = vst [vmem:[#allocation53_spill] sm:$0xff] %v6139_v15  ;;  %v6146_v38 = vpop.f32.mrb[55].mxu0  ;;  %v6148_v17 = vpop.f32.mrb[55].mxu1  ;;  %v4301_v15 = vpack.c.bf16 %v1648_v23, %v1646_v60  ;;  %v1522_v60 = vmul.f32 %v1466_v24, %v1298_v9  ;;  %v1656_v24 = vld [vmem:[#allocation5 + $0x310] sm:$0xff]  ;;  %v1526_v56 = vmul.f32 %v1470_v31, %v1302_v44  ;;  %v1378_v28 = vmul.f32 0.70710677, %v6172_v7 }
 0x330   :  { %7880 = vst [vmem:[#allocation54_spill] sm:$0xff] %v6148_v17  ;;  %v1303_v17 = vmul.f32 0.5, %v6066_v26  ;;  %v6166_v26 = vadd.f32 %v6108_v1, %v5973_v14  ;;  %v4889_v23 = vpop.eup %4888  ;;  %v1306_v31 = vmul.f32 0.5, %v6101_v25  ;;  %v4311_v63 = vpack.c.bf16 %v1661_v20, %v1659_v27  ;;  %v1663_v54 = vld [vmem:[#allocation5 + $0x348] sm:$0xff] }
 0x331   :  { %1793 = vmatmul.mubr.f32.gmra.mrb[66].mxu0 %v1522_v60  ;;  %v4891_v62 = vpop.eup %4890  ;;  %v6187_v60 = vadd.f32 %v6119_v61, %v5979_v22  ;;  %v6197_v61 = vadd.f32 %v5975_v57, %v6177_v40  ;;  %v6208_v57 = vadd.f32 %v6146_v38, %v5973_v14  ;;  %v6219_v38 = vadd.f32 %v5985_v33, %v6177_v40 }
 0x332   :  { %v1527_v49 = vmul.f32 %v1471_v39, %v1303_v17  ;;  %4302 = vmatpush1.bf16.msra.mxu0 %v4301_v15  ;;  %v1379_v1 = vmul.f32 0.70710677, %v6166_v26  ;;  %v1654_v17 = vld [vmem:[#allocation5 + $0x300] sm:$0xff]  ;;  %v1475_v15 = vadd.f32 1.0, %v4889_v23  ;;  %v1474_v9 = vadd.f32 1.0, %v4891_v62 }
 0x333   :  { %4304 = vmatprep.subr.bf16.mxu0 %v4303_v52  ;;  %v4309_v39 = vpack.c.bf16 %v1656_v24, %v1654_v17  ;;  %v4893_v52 = vpop.eup %4892  ;;  %v1662_v62 = vld [vmem:[#allocation5 + $0x340] sm:$0xff]  ;;  %v4313_v17 = vpack.c.bf16 %v1660_v21, %v1658_v5  ;;  %v6203_v24 = vld [vmem:[#allocation5 + $0x368] sm:$0xff]  ;;  %v1311_v5 = vmul.f32 0.5, %v6125_v8  ;;  %v1387_v21 = vmul.f32 0.70710677, %v6208_v57 }
 0x334   :  { %1798 = vmatprep.mubr.f32.mxu0 %v1527_v49  ;;  %4902 = verf.f32 %v1379_v1  ;;  %v4895_v3 = vpop.eup %4894  ;;  %v1383_v49 = vmul.f32 0.70710677, %v6181_v16  ;;  %v1531_v44 = vmul.f32 %v1475_v15, %v1307_v59  ;;  %v1530_v25 = vmul.f32 %v1474_v9, %v1306_v31  ;;  %v1668_v31 = vld [vmem:[#allocation5 + $0x370] sm:$0xff]  ;;  %v1671_v8 = vld [vmem:[#allocation5 + $0x388] sm:$0xff] }
 0x335   :  { %1799 = vmatmul.mubr.f32.gmra.mrb[68].mxu0 %v1526_v56  ;;  %4904 = verf.f32 %v1374_v4  ;;  %v4897_v23 = vpop.eup %4896  ;;  %v1664_v4 = vld [vmem:[#allocation5 + $0x350] sm:$0xff]  ;;  %v6201_v1 = vadd.f32 %v6137_v48, %v5979_v22  ;;  %v1669_v56 = vld [vmem:[#allocation5 + $0x378] sm:$0xff]  ;;  %v1479_v58 = vadd.f32 1.0, %v4895_v3  ;;  %v1478_v27 = vadd.f32 1.0, %v4893_v52  ;;  %v1666_v3 = vld [vmem:[#allocation5 + $0x360] sm:$0xff] }
 0x336   :  { %4306 = vmatpush1.bf16.msra.mxu0 %v4305_v36  ;;  %v1665_v36 = vld [vmem:[#allocation5 + $0x358] sm:$0xff]  ;;  %4906 = verf.f32 %v1383_v49  ;;  %1804 = vmatprep.mubr.f32.mxu0 %v1531_v44  ;;  %v4899_v15 = vpop.eup %4898  ;;  %v1483_v20 = vadd.f32 1.0, %v4897_v23  ;;  %v4317_v48 = vpack.c.bf16 %v1664_v4, %v1662_v62  ;;  %v6212_v59 = vadd.f32 %v5969_v2, %v6193_v42 }
 0x337   :  { %4308 = vmatprep.subr.bf16.mxu0 %v4307_v43  ;;  %4908 = verf.f32 %v1378_v28  ;;  %v1382_v43 = vmul.f32 0.70710677, %v6187_v60  ;;  %v4315_v22 = vpack.c.bf16 %v1665_v36, %v1663_v54  ;;  %v4901_v9 = vpop.eup %4900  ;;  %v1337_v28 = vmul.f32 0.70710677, %v6197_v61  ;;  %v1673_v54 = vld [vmem:[#allocation5 + $0x398] sm:$0xff] }
 0x338   :  { %v4319_v14 = vpack.c.bf16 %v1669_v56, %v6203_v24  ;;  %v1315_v52 = vmul.f32 0.5, %v6134_v34  ;;  %v1487_v2 = vadd.f32 1.0, %v4899_v15  ;;  %v1386_v49 = vmul.f32 0.70710677, %v6201_v1  ;;  %v1670_v24 = vld [vmem:[#allocation5 + $0x380] sm:$0xff]  ;;  %v1672_v56 = vld [vmem:[#allocation5 + $0x390] sm:$0xff] }
 0x339   :  { %1805 = vmatmul.mubr.f32.gmra.mrb[70].mxu0 %v1530_v25  ;;  %4910 = verf.f32 %v1382_v43  ;;  %v1482_v44 = vadd.f32 1.0, %v4901_v9  ;;  %v1319_v34 = vmul.f32 0.5, %v6144_v47  ;;  %v4321_v62 = vpack.c.bf16 %v1668_v31, %v1666_v3  ;;  %v1675_v47 = vld [vmem:[#allocation5 + $0x3a8] sm:$0xff]  ;;  %v1674_v3 = vld [vmem:[#allocation5 + $0x3a0] sm:$0xff]  ;;  %v1676_v31 = vld [vmem:[#allocation5 + $0x3b0] sm:$0xff] }
 0x33a   :  { %4310 = vmatpush1.bf16.msra.mxu0 %v4309_v39  ;;  %v1310_v39 = vmul.f32 0.5, %v6117_v41  ;;  %4912 = verf.f32 %v1387_v21  ;;  %v1539_v36 = vmul.f32 %v1483_v20, %v1315_v52  ;;  %v1336_v4 = vmul.f32 0.70710677, %v6212_v59 }
 0x33b   :  { %4312 = vmatprep.subr.bf16.mxu0 %v4311_v63  ;;  %v1535_v63 = vmul.f32 %v1479_v58, %v1311_v5  ;;  %4914 = verf.f32 %v1337_v28  ;;  %v1314_v25 = vmul.f32 0.5, %v6152_v30  ;;  %v6230_v58 = vadd.f32 %v5982_v19, %v6193_v42 }
 0x33c   :  { %v1534_v33 = vmul.f32 %v1478_v27, %v1310_v39  ;;  %4916 = verf.f32 %v1386_v49  ;;  %v1543_v15 = vmul.f32 %v1487_v2, %v1319_v34  ;;  %v1677_v27 = vld [vmem:[#allocation5 + $0x3b8] sm:$0xff]  ;;  %v6235_v30 = vadd.f32 %v5992_v55, %v6177_v40  ;;  %v1679_v49 = vld [vmem:[#allocation5 + $0x3c8] sm:$0xff] }
 0x33d   :  { %1810 = vmatprep.mubr.f32.mxu0 %v1535_v63  ;;  %v1538_v28 = vmul.f32 %v1482_v44, %v1314_v25  ;;  %v1323_v19 = vmul.f32 0.5, %v6166_v26  ;;  %v4325_v39 = vpack.c.bf16 %v1672_v56, %v1670_v24  ;;  %4918 = verf.f32 %v1336_v4  ;;  %v1681_v63 = vld [vmem:[#allocation5 + $0x3d8] sm:$0xff] }
 0x33e   :  { %4314 = vmatpush1.bf16.msra.mxu0 %v4313_v17  ;;  %v4903_v23 = vpop.eup %4902  ;;  %v4323_v17 = vpack.c.bf16 %v1673_v54, %v1671_v8  ;;  %v1318_v52 = vmul.f32 0.5, %v6162_v45  ;;  %v4327_v21 = vpack.c.bf16 %v1677_v27, %v1675_v47  ;;  %v1340_v55 = vmul.f32 0.70710677, %v6230_v58 }
 0x33f   :  { %4316 = vmatprep.subr.bf16.mxu0 %v4315_v22  ;;  %v4905_v41 = vpop.eup %4904  ;;  %1811 = vmatmul.mubr.f32.gmra.mrb[72].mxu0 %v1534_v33  ;;  %v1491_v43 = vadd.f32 1.0, %v4903_v23  ;;  %v1341_v22 = vmul.f32 0.70710677, %v6219_v38  ;;  %v1327_v23 = vmul.f32 0.5, %v6181_v16  ;;  %v4329_v44 = vpack.c.bf16 %v1676_v31, %v1674_v3  ;;  %v1678_v16 = vld [vmem:[#allocation5 + $0x3c0] sm:$0xff]  ;;  %v1684_v3 = vld [vmem:[#allocation5 + $0x3f0] sm:$0xff] }
 0x340   :  { %1816 = vmatprep.mubr.f32.mxu0 %v1539_v36  ;;  %v4907_v20 = vpop.eup %4906  ;;  %v1486_v9 = vadd.f32 1.0, %v4905_v41  ;;  %v6253_v36 = vadd.f32 %v5997_v46, %v6193_v42  ;;  %v1322_v41 = vmul.f32 0.5, %v6172_v7  ;;  %v4331_v34 = vpack.c.bf16 %v1681_v63, %v1679_v49  ;;  %v1680_v7 = vld [vmem:[#allocation5 + $0x3d0] sm:$0xff] }
 0x341   :  { %v4909_v5 = vpop.eup %4908  ;;  %v1495_v2 = vadd.f32 1.0, %v4907_v20  ;;  %v1547_v26 = vmul.f32 %v1491_v43, %v1323_v19  ;;  %4920 = verf.f32 %v1341_v22  ;;  %v6259_v24 = vadd.f32 %v6012_v53, %v6177_v40  ;;  %v1683_v43 = vld [vmem:[#allocation5 + $0x3e8] sm:$0xff] }
 0x342   :  { %4318 = vmatpush1.bf16.msra.mxu0 %v4317_v48  ;;  %v6240_v48 = vadd.f32 %v5987_v32, %v6193_v42  ;;  %v1345_v32 = vmul.f32 0.70710677, %v6235_v30  ;;  %v1490_v45 = vadd.f32 1.0, %v4909_v5  ;;  %v1542_v8 = vmul.f32 %v1486_v9, %v1318_v52 }
 0x343   :  { %4320 = vmatprep.subr.bf16.mxu0 %v4319_v14  ;;  %1817 = vmatmul.mubr.f32.gmra.mrb[74].mxu0 %v1538_v28  ;;  %v6246_v14 = vadd.f32 %v6003_v11, %v6177_v40  ;;  %v4911_v54 = vpop.eup %4910  ;;  %4922 = verf.f32 %v1340_v55  ;;  %v1551_v25 = vmul.f32 %v1495_v2, %v1327_v23  ;;  %v1331_v27 = vmul.f32 0.5, %v6208_v57 }
 0x344   :  { %1822 = vmatprep.mubr.f32.mxu0 %v1543_v15  ;;  %v4913_v33 = vpop.eup %4912  ;;  %v1344_v11 = vmul.f32 0.70710677, %v6240_v48  ;;  %4924 = verf.f32 %v1345_v32  ;;  %v1494_v46 = vadd.f32 1.0, %v4911_v54  ;;  %v1546_v56 = vmul.f32 %v1490_v45, %v1322_v41  ;;  %v1685_v15 = vld [vmem:[#allocation5 + $0x3f8] sm:$0xff] }
 0x345   :  { %v1499_v4 = vadd.f32 1.0, %v4913_v33  ;;  %v1348_v20 = vmul.f32 0.70710677, %v6253_v36  ;;  %v6265_v22 = vadd.f32 %v6009_v29, %v6193_v42  ;;  %v1326_v9 = vmul.f32 0.5, %v6187_v60  ;;  %v1682_v29 = vld [vmem:[#allocation5 + $0x3e0] sm:$0xff] }
 0x346   :  { %4322 = vmatpush1.bf16.msra.mxu0 %v4321_v62  ;;  %v1349_v62 = vmul.f32 0.70710677, %v6246_v14  ;;  %4926 = verf.f32 %v1344_v11  ;;  %v4333_v28 = vpack.c.bf16 %v1680_v7, %v1678_v16  ;;  %v4335_v5 = vpack.c.bf16 %v1685_v15, %v1683_v43 }
 0x347   :  { %4324 = vmatprep.subr.bf16.mxu0 %v4323_v17  ;;  %1823 = vmatmul.mubr.f32.gmra.mrb[76].mxu0 %v1542_v8  ;;  %v4915_v17 = vpop.eup %4914  ;;  %v1555_v53 = vmul.f32 %v1499_v4, %v1331_v27  ;;  %v6271_v57 = vadd.f32 %v6020_v10, %v6177_v40  ;;  %v1352_v55 = vmul.f32 0.70710677, %v6265_v22  ;;  %v6276_v2 = vadd.f32 %v6018_v37, %v6193_v42 }
 0x348   :  { %1828 = vmatprep.mubr.f32.mxu0 %v1547_v26  ;;  %v4917_v47 = vpop.eup %4916  ;;  %4928 = verf.f32 %v1349_v62  ;;  %v1449_v60 = vadd.f32 1.0, %v4915_v17  ;;  %v1330_v26 = vmul.f32 0.5, %v6201_v1  ;;  %v1281_v10 = vmul.f32 0.5, %v6197_v61 }
 0x349   :  { %v4919_v19 = vpop.eup %4918  ;;  %v1498_v52 = vadd.f32 1.0, %v4917_v47  ;;  %4930 = verf.f32 %v1348_v20  ;;  %v4337_v63 = vpack.c.bf16 %v1684_v3, %v1682_v29  ;;  %v1357_v32 = vmul.f32 0.70710677, %v6271_v57 }
 0x34a   :  { %4326 = vmatpush1.bf16.msra.mxu0 %v4325_v39  ;;  %v1353_v39 = vmul.f32 0.70710677, %v6259_v24  ;;  %v1448_v49 = vadd.f32 1.0, %v4919_v19  ;;  %v6283_v45 = vadd.f32 %v6033_v0, %v6177_v40  ;;  %v1280_v54 = vmul.f32 0.5, %v6212_v59 }
 0x34b   :  { %4328 = vmatprep.subr.bf16.mxu0 %v4327_v21  ;;  %1829 = vmatmul.mubr.f32.gmra.mrb[78].mxu0 %v1546_v56  ;;  %v1550_v21 = vmul.f32 %v1494_v46, %v1326_v9  ;;  %v4921_v31 = vpop.eup %4920  ;;  %v1554_v8 = vmul.f32 %v1498_v52, %v1330_v26  ;;  %v1505_v23 = vmul.f32 %v1449_v60, %v1281_v10  ;;  %v1356_v61 = vmul.f32 0.70710677, %v6276_v2  ;;  %v7882_v60 = vld [vmem:[#allocation45_spill] sm:$0xff] }
 0x34c   :  { %1834 = vmatprep.mubr.f32.mxu0 %v1551_v25  ;;  %4932 = verf.f32 %v1353_v39  ;;  %v1453_v1 = vadd.f32 1.0, %v4921_v31  ;;  %v6289_v33 = vadd.f32 %v6031_v50, %v6193_v42  ;;  %v1504_v11 = vmul.f32 %v1448_v49, %v1280_v54  ;;  %v7883_v49 = vld [vmem:[#allocation48_spill] sm:$0xff] }
 0x34d   :  { %v4923_v37 = vpop.eup %4922  ;;  %4934 = verf.f32 %v1352_v55  ;;  %v1285_v0 = vmul.f32 0.5, %v6219_v38  ;;  %v1361_v59 = vmul.f32 0.70710677, %v6283_v45  ;;  %v6295_v62 = vadd.f32 %v6046_v6, %v6177_v40 }
 0x34e   :  { %4330 = vmatpush1.bf16.msra.mxu0 %v4329_v44  ;;  %v4925_v44 = vpop.eup %4924  ;;  %4936 = verf.f32 %v1357_v32  ;;  %v1284_v50 = vmul.f32 0.5, %v6230_v58  ;;  %v1360_v17 = vmul.f32 0.70710677, %v6289_v33  ;;  %v6301_v38 = vadd.f32 %v6042_v12, %v6193_v42 }
 0x34f   :  { %4332 = vmatprep.subr.bf16.mxu0 %v4331_v34  ;;  %1835 = vmatmul.mubr.f32.gmra.mrb[80].mxu0 %v1550_v21  ;;  %v1452_v34 = vadd.f32 1.0, %v4923_v37  ;;  %v1457_v25 = vadd.f32 1.0, %v4925_v44  ;;  %v1509_v16 = vmul.f32 %v1453_v1, %v1285_v0  ;;  %4938 = verf.f32 %v1356_v61  ;;  %v7885_v0 = vld [vmem:[#allocation50_spill] sm:$0xff] }
 0x350   :  { %1840 = vmatprep.mubr.f32.mxu0 %v1555_v53  ;;  %v4927_v41 = vpop.eup %4926  ;;  %v1289_v56 = vmul.f32 0.5, %v6235_v30  ;;  %4940 = verf.f32 %v1361_v59  ;;  %v1365_v6 = vmul.f32 0.70710677, %v6295_v62  ;;  %v6307_v43 = vadd.f32 %v6062_v35, %v6177_v40 }
 0x351   :  { %v1456_v46 = vadd.f32 1.0, %v4927_v41  ;;  %v1508_v58 = vmul.f32 %v1452_v34, %v1284_v50  ;;  %v1288_v12 = vmul.f32 0.5, %v6240_v48  ;;  %4942 = verf.f32 %v1360_v17  ;;  %v7886_v17 = vld [vmem:[#allocation49_spill] sm:$0xff] }
 0x352   :  { %4334 = vmatpush1.bf16.msra.mxu0 %v4333_v28  ;;  %v4929_v4 = vpop.eup %4928  ;;  %v1513_v47 = vmul.f32 %v1457_v25, %v1289_v56  ;;  %v1364_v20 = vmul.f32 0.70710677, %v6301_v38  ;;  %v1293_v9 = vmul.f32 0.5, %v6246_v14  ;;  %v6314_v53 = vadd.f32 %v6054_v13, %v6193_v42 }
 0x353   :  { %4336 = vmatprep.subr.bf16.mxu0 %v4335_v5  ;;  %1841 = vmatmul.mubr.f32.gmra.mrb[82].mxu0 %v1554_v8  ;;  %v4931_v7 = vpop.eup %4930  ;;  %v1461_v15 = vadd.f32 1.0, %v4929_v4  ;;  %4944 = verf.f32 %v1365_v6  ;;  %v1369_v28 = vmul.f32 0.70710677, %v6307_v43  ;;  %v7881_v5 = vld [vmem:[#allocation46_spill] sm:$0xff]  ;;  %v1512_v48 = vmul.f32 %v1456_v46, %v1288_v12  ;;  %v7887_v6 = vld [vmem:[#allocation52_spill] sm:$0xff] }
 0x354   :  { %1911 = vmatprep.mubr.f32.mxu0 %v1505_v23  ;;  %v1460_v30 = vadd.f32 1.0, %v4931_v7  ;;  %v6319_v19 = vadd.f32 %v7881_v5, %v6177_v40  ;;  %v1292_v29 = vmul.f32 0.5, %v6253_v36  ;;  %4946 = verf.f32 %v1364_v20  ;;  %v7884_v23 = vld [vmem:[#allocation47_spill] sm:$0xff]  ;;  %v7889_v5 = vld [vmem:[#allocation54_spill] sm:$0xff] }
 0x355   :  { %v1517_v52 = vmul.f32 %v1461_v15, %v1293_v9  ;;  %v1297_v13 = vmul.f32 0.5, %v6259_v24  ;;  %v1368_v3 = vmul.f32 0.70710677, %v6314_v53  ;;  %v6326_v31 = vadd.f32 %v7882_v60, %v6193_v42  ;;  %v7888_v9 = vld [vmem:[#allocation51_spill] sm:$0xff] }
 0x356   :  { %4338 = vmatpush1.bf16.msra.mxu0 %v4337_v63  ;;  %v4933_v27 = vpop.eup %4932  ;;  %4948 = verf.f32 %v1369_v28  ;;  %v1373_v26 = vmul.f32 0.70710677, %v6319_v19  ;;  %v6331_v10 = vadd.f32 %v7883_v49, %v6177_v40  ;;  %v1516_v36 = vmul.f32 %v1460_v30, %v1292_v29 }
 0x357   :  { %v4935_v35 = vpop.eup %4934  ;;  %v1465_v39 = vadd.f32 1.0, %v4933_v27  ;;  %v1296_v24 = vmul.f32 0.5, %v6265_v22  ;;  %v1301_v37 = vmul.f32 0.5, %v6271_v57  ;;  %4950 = verf.f32 %v1368_v3  ;;  %v7890_v3 = vld [vmem:[#allocation53_spill] sm:$0xff] }
 0x358   :  { %v4937_v21 = vpop.eup %4936  ;;  %v1464_v14 = vadd.f32 1.0, %v4935_v35  ;;  %v1372_v1 = vmul.f32 0.70710677, %v6326_v31  ;;  %v6338_v44 = vadd.f32 %v7884_v23, %v6193_v42  ;;  %4952 = verf.f32 %v1373_v26 }
 0x359   :  { %1912 = vmatmul.mubr.f32.vlgmr.msra.gmra.mrb[56].mxu0 %v1504_v11  ;;  %v4939_v55 = vpop.eup %4938  ;;  %v1469_v63 = vadd.f32 1.0, %v4937_v21  ;;  %v1521_v32 = vmul.f32 %v1465_v39, %v1297_v13  ;;  %v1377_v11 = vmul.f32 0.70710677, %v6331_v10  ;;  %v6343_v41 = vadd.f32 %v7885_v0, %v6177_v40 }
 0x35a   :  { %1917 = vmatprep.mubr.f32.mxu0 %v1509_v16  ;;  %v4941_v8 = vpop.eup %4940  ;;  %v1468_v54 = vadd.f32 1.0, %v4939_v55  ;;  %v1520_v22 = vmul.f32 %v1464_v14, %v1296_v24  ;;  %v1300_v4 = vmul.f32 0.5, %v6276_v2  ;;  %v1305_v25 = vmul.f32 0.5, %v6283_v45 }
 0x35b   :  { %v4943_v61 = vpop.eup %4942  ;;  %v1473_v57 = vadd.f32 1.0, %v4941_v8  ;;  %v1525_v34 = vmul.f32 %v1469_v63, %v1301_v37  ;;  %4954 = verf.f32 %v1372_v1  ;;  %v1376_v50 = vmul.f32 0.70710677, %v6338_v44 }
 0x35c   :  { %v1472_v16 = vadd.f32 1.0, %v4943_v61  ;;  %v6350_v46 = vadd.f32 %v7886_v17, %v6193_v42  ;;  %4956 = verf.f32 %v1377_v11  ;;  %v1381_v7 = vmul.f32 0.70710677, %v6343_v41 }
 0x35d   :  { %1918 = vmatmul.mubr.f32.gmra.mrb[58].mxu0 %v1508_v58  ;;  %v4945_v59 = vpop.eup %4944  ;;  %v6355_v58 = vadd.f32 %v7887_v6, %v6177_v40  ;;  %v1524_v2 = vmul.f32 %v1468_v54, %v1300_v4  ;;  %v1529_v15 = vmul.f32 %v1473_v57, %v1305_v25  ;;  %v1304_v27 = vmul.f32 0.5, %v6289_v33 }
 0x35e   :  { %1923 = vmatprep.mubr.f32.mxu0 %v1513_v47  ;;  %v4947_v56 = vpop.eup %4946  ;;  %v1477_v45 = vadd.f32 1.0, %v4945_v59  ;;  %v1309_v12 = vmul.f32 0.5, %v6295_v62  ;;  %4958 = verf.f32 %v1376_v50  ;;  %v1380_v30 = vmul.f32 0.70710677, %v6350_v46 }
 0x35f   :  { %v1476_v20 = vadd.f32 1.0, %v4947_v56  ;;  %v6362_v35 = vadd.f32 %v7888_v9, %v6193_v42  ;;  %4960 = verf.f32 %v1381_v7  ;;  %v1385_v28 = vmul.f32 0.70710677, %v6355_v58  ;;  %v2565_v9 = vld [vmem:[#allocation2 + $0x438] sm:$0xff] }
 0x360   :  { %v4949_v47 = vpop.eup %4948  ;;  %v1528_v33 = vmul.f32 %v1472_v16, %v1304_v27  ;;  %v1308_v29 = vmul.f32 0.5, %v6301_v38  ;;  %v1313_v14 = vmul.f32 0.5, %v6307_v43  ;;  %4962 = verf.f32 %v1380_v30 }
 0x361   :  { %1924 = vmatmul.mubr.f32.gmra.mrb[60].mxu0 %v1512_v48  ;;  %v6367_v48 = vadd.f32 %v7889_v5, %v6177_v40  ;;  %v4951_v39 = vpop.eup %4950  ;;  %v1481_v62 = vadd.f32 1.0, %v4949_v47  ;;  %v1384_v13 = vmul.f32 0.70710677, %v6362_v35  ;;  %v1274_v60 = vadd.f32 %v7890_v3, %v6193_v42  ;;  %v2572_v3 = vld [vmem:[#allocation2 + $0x470] sm:$0xff] }
 0x362   :  { %1929 = vmatprep.mubr.f32.mxu0 %v1517_v52  ;;  %v1533_v52 = vmul.f32 %v1477_v45, %v1309_v12  ;;  %v4953_v21 = vpop.eup %4952  ;;  %v1480_v55 = vadd.f32 1.0, %v4951_v39  ;;  %4964 = verf.f32 %v1385_v28  ;;  %v1532_v26 = vmul.f32 %v1476_v20, %v1308_v29  ;;  %v1686_v28 = vld [vmem:[%s7716_s10] sm:$0x3]  ;;  %v7891_v29 = vld [vmem:[#allocation13_spill] sm:$0xff] }
 0x363   :  { %v1389_v40 = vmul.f32 0.70710677, %v6367_v48  ;;  %v1537_v63 = vmul.f32 %v1481_v62, %v1313_v14  ;;  %v1312_v38 = vmul.f32 0.5, %v6314_v53  ;;  %v1317_v43 = vmul.f32 0.5, %v6319_v19  ;;  %v2573_v62 = vld [vmem:[#allocation2 + $0x478] sm:$0xff] }
 0x364   :  { %4966 = verf.f32 %v1384_v13  ;;  %v1388_v8 = vmul.f32 0.70710677, %v1274_v60  ;;  %v1316_v61 = vmul.f32 0.5, %v6326_v31  ;;  %v1321_v11 = vmul.f32 0.5, %v6331_v10  ;;  %v6394_v13 = vld [vmem:[%s7710_s4 + $0x8] sm:$0x77] }
 0x365   :  { %1930 = vmatmul.mubr.f32.gmra.mrb[62].mxu0 %v1516_v36  ;;  %v4955_v49 = vpop.eup %4954  ;;  %v1485_v36 = vadd.f32 1.0, %v4953_v21  ;;  %4968 = verf.f32 %v1389_v40  ;;  %v1536_v42 = vmul.f32 %v1480_v55, %v1312_v38  ;;  %v1320_v59 = vmul.f32 0.5, %v6338_v44  ;;  %v2568_v21 = vld [vmem:[#allocation2 + $0x450] sm:$0xff]  ;;  %s5164_s4 = smov [#allocation7]  }
 0x366   :  { %1935 = vmatprep.mubr.f32.mxu0 %v1521_v32  ;;  %v4957_v32 = vpop.eup %4956  ;;  %v1484_v24 = vadd.f32 1.0, %v4955_v49  ;;  %4970 = verf.f32 %v1388_v8  ;;  %v1325_v4 = vmul.f32 0.5, %v6343_v41  ;;  %v1324_v56 = vmul.f32 0.5, %v6350_v46  ;;  %v2581_v49 = vld [vmem:[#allocation2 + $0x4b8] sm:$0xff]  ;;  %s3908_s28 = sshll.u32 %s5164_s4, 4  ;;  %s3909_s28 = int_to_ptr.vmem [resolvable:$true] %s3908_s28 }
 0x367   :  { %v1489_v54 = vadd.f32 1.0, %v4957_v32  ;;  %v1541_v1 = vmul.f32 %v1485_v36, %v1317_v43  ;;  %v1329_v7 = vmul.f32 0.5, %v6355_v58  ;;  %v1328_v41 = vmul.f32 0.5, %v6362_v35  ;;  %v2561_v58 = vld [vmem:[#allocation2 + $0x418] sm:$0xff]  ;;  %v2560_v35 = vld [vmem:[#allocation2 + $0x410] sm:$0xff]  ;;  %v7893_v43 = vld [vmem:[#allocation11_spill] sm:$0xff]  ;;  %p5133_p3 = scmp.lt.s32.totalorder %s3909_s28, %s3909_s28 }
 0x368   :  { %v4959_v37 = vpop.eup %4958  ;;  %v1540_v0 = vmul.f32 %v1484_v24, %v1316_v61  ;;  %v1333_v47 = vmul.f32 0.5, %v6367_v48  ;;  %v1332_v30 = vmul.f32 0.5, %v1274_v60  ;;  %v4433_v5 = vpack.c.bf16 %v2565_v9, %v2561_v58  ;;  %v2569_v48 = vld [vmem:[#allocation2 + $0x458] sm:$0xff]  ;;  %v7892_v60 = vld [vmem:[#allocation12_spill] sm:$0xff]  ;;  %s5128_s29 = scalar_lea.vmem %s3909_s28, 16  ;;  %s5132_s30 = scalar_lea.vmem %s3909_s28, 32 }
 0x369   :  { %1936 = vmatmul.mubr.f32.gmra.mrb[64].mxu0 %v1520_v22  ;;  %v4961_v23 = vpop.eup %4960  ;;  %v1488_v53 = vadd.f32 1.0, %v4959_v37  ;;  %v1545_v57 = vmul.f32 %v1489_v54, %v1321_v11  ;;  %v6389_v14 = vrot.slane %v1686_v28, %v7891_v29  ;;  %v6397_v55 = vrot.slane %v1686_v28, %v7892_v60  ;;  %v2580_v32 = vld [vmem:[#allocation2 + $0x4b0] sm:$0xff]  ;;  %v2589_v61 = vld [vmem:[#allocation2 + $0x4f8] sm:$0xff]  ;;  %p5129_p2 = scmp.ne.s32.totalorder %s3909_s28, %s5128_s29  ;;  %p5134_p4 = scmp.lt.s32.totalorder %s5132_s30, %s5128_s29 }
 0x36a   :  { %1941 = vmatprep.mubr.f32.mxu0 %v1525_v34  ;;  %v4963_v19 = vpop.eup %4962  ;;  %v1493_v22 = vadd.f32 1.0, %v4961_v23  ;;  %4434 = vmatprep.subr.bf16.mxu0 %v4433_v5  ;;  %v4439_v40 = vpack.c.bf16 %v2572_v3, %v2568_v21  ;;  %v7894_v8 = vsub.s32 4, %v7893_v43  ;;  %v2030_v54 = vrot.slane %v6394_v13, %v7891_v29  ;;  %v7899_v58 = vld [vmem:[#allocation20_spill] sm:$0xff] }
 0x36b   :  { %v1492_v25 = vadd.f32 1.0, %v4963_v19  ;;  %v1544_v16 = vmul.f32 %v1488_v53, %v1320_v59  ;;  %v2588_v19 = vld [vmem:[#allocation2 + $0x4f0] sm:$0xff]  ;;  %v7895_v59 = vld [vmem:[#allocation18_spill] sm:$0xff]  ;;  %p5135_p5 = por %p5134_p4, %p5133_p3 }
 0x36c   :  { %v4965_v34 = vpop.eup %4964  ;;  %v1549_v17 = vmul.f32 %v1493_v22, %v1325_v4  ;;  %v2034_v24 = vrot.slane %v6394_v13, %v7894_v8  ;;  %v2593_v22 = vld [vmem:[#allocation2 + $0x518] sm:$0xff] }
 0x36d   :  { %1942 = vmatmul.mubr.f32.gmra.mrb[66].mxu0 %v1524_v2  ;;  %v1497_v50 = vadd.f32 1.0, %v4965_v34  ;;  %v1548_v2 = vmul.f32 %v1492_v25, %v1324_v56  ;;  %v2076_v34 = vrot.slane %v6394_v13, %v7892_v60  ;;  %v6421_v56 = vrot.slane %v2030_v54, %v7891_v29  ;;  %v7901_v54 = vld [vmem:[#allocation21_spill] sm:$0xff]  ;;  %p5136_p6 = pnand %p5135_p5, %p5129_p2 }
 0x36e   :  { %1947 = vmatprep.mubr.f32.mxu0 %v1529_v15  ;;  %v4967_v31 = vpop.eup %4966  ;;  %v6412_v25 = vrot.slane %v2034_v24, %v7891_v29 }
 0x36f   :  { %v4969_v10 = vpop.eup %4968  ;;  %v1496_v6 = vadd.f32 1.0, %v4967_v31  ;;  %v1553_v15 = vmul.f32 %v1497_v50, %v1329_v7  ;;  %v7896_v31 = vsub.s32 5, %v7893_v43 }
 0x370   :  { %v4971_v45 = vpop.eup %4970  ;;  %v1501_v44 = vadd.f32 1.0, %v4969_v10 }
 0x371   :  { %1948 = vmatmul.mubr.f32.gmra.mrb[68].mxu0 %v1528_v33  ;;  %v1500_v27 = vadd.f32 1.0, %v4971_v45  ;;  %v1552_v12 = vmul.f32 %v1496_v6, %v1328_v41  ;;  %v2564_v33 = vld [vmem:[#allocation2 + $0x430] sm:$0xff]  ;;  %v2080_v50 = vrot.slane %v6394_v13, %v7896_v31  ;;  %v2617_v31 = vld [vmem:[#allocation2 + $0x5d8] sm:$0xff] }
 0x372   :  { %1953 = vmatprep.mubr.f32.mxu0 %v1533_v52  ;;  %v1557_v20 = vmul.f32 %v1501_v44, %v1333_v47  ;;  %v4435_v39 = vpack.c.bf16 %v2564_v33, %v2560_v35  ;;  %v4437_v52 = vpack.c.bf16 %v2573_v62, %v2569_v48  ;;  %v2596_v41 = vld [vmem:[#allocation2 + $0x530] sm:$0xff]  ;;  %v7898_v47 = vld [vmem:[#allocation19_spill] sm:$0xff] }
 0x373   :  { %v1556_v46 = vmul.f32 %v1500_v27, %v1332_v30  ;;  %v6429_v30 = vrot.slane %v2076_v34, %v7892_v60  ;;  %v6437_v5 = vrot.slane %v2080_v50, %v7892_v60  ;;  %v7902_v34 = vld [vmem:[#allocation23_spill] sm:$0xff]  ;;  %v2621_v50 = vld [vmem:[#allocation2 + $0x5f8] sm:$0xff] }
 0x374   :  { %4436 = vmatpush1.bf16.msra.mxu0 %v4435_v39 }
 0x375   :  { %1954 = vmatmul.mubr.f32.gmra.mrb[70].mxu0 %v1532_v26  ;;  %4438 = vmatprep.subr.bf16.mxu0 %v4437_v52  ;;  %v2577_v26 = vld [vmem:[#allocation2 + $0x498] sm:$0xff] }
 0x376   :  { %1959 = vmatprep.mubr.f32.mxu0 %v1537_v63  ;;  %v4441_v36 = vpack.c.bf16 %v2581_v49, %v2577_v26  ;;  %v2576_v63 = vld [vmem:[#allocation2 + $0x490] sm:$0xff] }
 0x377   :  { %v4443_v23 = vpack.c.bf16 %v2580_v32, %v2576_v63  ;;  %v2604_v26 = vld [vmem:[#allocation2 + $0x570] sm:$0xff]  ;;  %v2613_v63 = vld [vmem:[#allocation2 + $0x5b8] sm:$0xff] }
 0x378   :  { %4440 = vmatpush1.bf16.msra.mxu0 %v4439_v40  ;;  %v2600_v40 = vld [vmem:[#allocation2 + $0x550] sm:$0xff]  ;;  %v7900_v32 = vld [vmem:[#allocation22_spill] sm:$0xff] }
 0x379   :  { %1960 = vmatmul.mubr.f32.gmra.mrb[72].mxu0 %v1536_v42  ;;  %v2585_v42 = vld [vmem:[#allocation2 + $0x4d8] sm:$0xff]  ;;  %4442 = vmatprep.subr.bf16.mxu0 %v4441_v36 }
 0x37a   :  { %1965 = vmatprep.mubr.f32.mxu0 %v1541_v1  ;;  %v4445_v53 = vpack.c.bf16 %v2589_v61, %v2585_v42  ;;  %v2609_v36 = vld [vmem:[#allocation2 + $0x598] sm:$0xff] }
 0x37c   :  { %4444 = vmatpush1.bf16.msra.mxu0 %v4443_v23 }
 0x37d   :  { %1966 = vmatmul.mubr.f32.gmra.mrb[74].mxu0 %v1540_v0  ;;  %v2584_v0 = vld [vmem:[#allocation2 + $0x4d0] sm:$0xff]  ;;  %4446 = vmatprep.subr.bf16.mxu0 %v4445_v53 }
 0x37e   :  { %1971 = vmatprep.mubr.f32.mxu0 %v1545_v57  ;;  %v2597_v57 = vld [vmem:[#allocation2 + $0x538] sm:$0xff]  ;;  %v2608_v53 = vld [vmem:[#allocation2 + $0x590] sm:$0xff] }
 0x37f   :  { %v4449_v44 = vpack.c.bf16 %v2597_v57, %v2593_v22  ;;  %v4457_v57 = vpack.c.bf16 %v2613_v63, %v2609_v36 }
 0x381   :  { %1972 = vmatmul.mubr.f32.gmra.mrb[76].mxu0 %v1544_v16 }
 0x382   :  { %1977 = vmatprep.mubr.f32.mxu0 %v1549_v17  ;;  %v7897_v17 = vld [vmem:[#allocation17_spill] sm:$0xff] }
 0x385   :  { %1978 = vmatmul.mubr.f32.gmra.mrb[78].mxu0 %v1548_v2  ;;  %v4447_v2 = vpack.c.bf16 %v2588_v19, %v2584_v0  ;;  %v2612_v0 = vld [vmem:[#allocation2 + $0x5b0] sm:$0xff] }
 0x386   :  { %1983 = vmatprep.mubr.f32.mxu0 %v1553_v15  ;;  %v2592_v15 = vld [vmem:[#allocation2 + $0x510] sm:$0xff] }
 0x387   :  { %4448 = vmatpush1.bf16.msra.mxu0 %v4447_v2  ;;  %v4451_v62 = vpack.c.bf16 %v2596_v41, %v2592_v15 }
 0x388   :  { %4450 = vmatprep.subr.bf16.mxu0 %v4449_v44 }
 0x389   :  { %1984 = vmatmul.mubr.f32.gmra.mrb[80].mxu0 %v1552_v12  ;;  %v2601_v12 = vld [vmem:[#allocation2 + $0x558] sm:$0xff] }
 0x38a   :  { %1989 = vmatprep.mubr.f32.mxu0 %v1557_v20  ;;  %v2605_v20 = vld [vmem:[#allocation2 + $0x578] sm:$0xff] }
 0x38b   :  { %v4453_v3 = vpack.c.bf16 %v2605_v20, %v2601_v12  ;;  %4452 = vmatpush1.bf16.msra.mxu0 %v4451_v62 }
 0x38d   :  { %1990 = vmatmul.mubr.f32.gmra.mrb[82].mxu0 %v1556_v46  ;;  %4454 = vmatprep.subr.bf16.mxu0 %v4453_v3 }
 0x42c   :  { %v1913_v38 = vpop.f32.mrb[56].mxu0 }
 0x42d   :  { %v4689_v37 = vadd.f32 %v1913_v38, %v6389_v14  ;;  %v1915_v1 = vpop.f32.mrb[57].mxu0 }
 0x42e   :  { %v4690_v11 = vadd.f32 %v1915_v1, %v6397_v55 }
 0x42f   :  { %v6418_v10 = vadd.f32 %v4689_v37, %v7897_v17 }
 0x430   :  { %v6409_v4 = vadd.f32 %v4690_v11, %v7895_v59  ;;  %v1919_v16 = vpop.f32.mrb[58].mxu0  ;;  %v4455_v11 = vpack.c.bf16 %v2604_v26, %v2600_v40  ;;  %v7907_v26 = vld [vmem:[#allocation25_spill] sm:$0xff] }
 0x431   :  { %v4691_v7 = vadd.f32 %v1919_v16, %v6389_v14  ;;  %v1921_v6 = vpop.f32.mrb[59].mxu0  ;;  %v2045_v35 = vmul.f32 %v6421_v56, %v6418_v10 }
 0x432   :  { %v4692_v45 = vadd.f32 %v1921_v6, %v6397_v55  ;;  %v2046_v46 = vmul.f32 %v6412_v25, %v6409_v4  ;;  %4456 = vmatpush1.bf16.msra.mxu0 %v4455_v11 }
 0x433   :  { %v6426_v27 = vadd.f32 %v4691_v7, %v7898_v47  ;;  %v2091_v37 = vadd.f32 %v6429_v30, %v2045_v35  ;;  %v7903_v7 = vld [vmem:[#allocation24_spill] sm:$0xff]  ;;  %4458 = vmatprep.subr.bf16.mxu0 %v4457_v57 }
 0x434   :  { %v6434_v9 = vadd.f32 %v4692_v45, %v7899_v58  ;;  %v1925_v28 = vpop.f32.mrb[60].mxu0  ;;  %v2092_v24 = vadd.f32 %v6437_v5, %v2046_v46  ;;  %v4459_v45 = vpack.c.bf16 %v2612_v0, %v2608_v53  ;;  %v4461_v46 = vpack.c.bf16 %v2621_v50, %v2617_v31  ;;  %v2616_v58 = vld [vmem:[#allocation2 + $0x5d0] sm:$0xff]  ;;  %v2633_v53 = vld [vmem:[#allocation2 + $0x658] sm:$0xff] }
 0x435   :  { %v2047_v33 = vmul.f32 %v6421_v56, %v6426_v27  ;;  %v4693_v39 = vadd.f32 %v1925_v28, %v6389_v14  ;;  %v1927_v48 = vpop.f32.mrb[61].mxu0  ;;  %v2620_v28 = vld [vmem:[#allocation2 + $0x5f0] sm:$0xff]  ;;  %v2637_v0 = vld [vmem:[#allocation2 + $0x678] sm:$0xff] }
 0x436   :  { %v2048_v52 = vmul.f32 %v6412_v25, %v6434_v9  ;;  %v4694_v21 = vadd.f32 %v1927_v48, %v6397_v55  ;;  %v7905_v48 = vld [vmem:[#allocation26_spill] sm:$0xff]  ;;  %4460 = vmatpush1.bf16.msra.mxu0 %v4459_v45 }
 0x437   :  { %v2093_v49 = vadd.f32 %v6429_v30, %v2047_v33  ;;  %v6455_v1 = vadd.f32 %v4693_v39, %v7901_v54  ;;  %v2625_v33 = vld [vmem:[#allocation2 + $0x618] sm:$0xff]  ;;  %4462 = vmatprep.subr.bf16.mxu0 %v4461_v46 }
 0x438   :  { %v6449_v38 = vadd.f32 %v4694_v21, %v7900_v32  ;;  %v1931_v8 = vpop.f32.mrb[62].mxu0  ;;  %v2094_v42 = vadd.f32 %v6437_v5, %v2048_v52  ;;  %v2629_v39 = vld [vmem:[#allocation2 + $0x638] sm:$0xff]  ;;  %v4463_v32 = vpack.c.bf16 %v2620_v28, %v2616_v58 }
 0x439   :  { %v4695_v23 = vadd.f32 %v1931_v8, %v6389_v14  ;;  %v1933_v61 = vpop.f32.mrb[63].mxu0  ;;  %v4341_v16 = vpack.c.bf16 %v2093_v49, %v2091_v37  ;;  %v2049_v44 = vmul.f32 %v6421_v56, %v6455_v1  ;;  %v2624_v8 = vld [vmem:[#allocation2 + $0x610] sm:$0xff]  ;;  %v4465_v54 = vpack.c.bf16 %v2629_v39, %v2625_v33  ;;  %v7913_v46 = vld [vmem:[#allocation30_spill] sm:$0xff] }
 0x43a   :  { %v4696_v19 = vadd.f32 %v1933_v61, %v6397_v55  ;;  %v4339_v22 = vpack.c.bf16 %v2094_v42, %v2092_v24  ;;  %v2050_v17 = vmul.f32 %v6412_v25, %v6449_v38  ;;  %v2628_v24 = vld [vmem:[#allocation2 + $0x630] sm:$0xff]  ;;  %4464 = vmatpush1.bf16.msra.mxu0 %v4463_v32 }
 0x43b   :  { %v6460_v59 = vadd.f32 %v4695_v23, %v7902_v34  ;;  %v2095_v40 = vadd.f32 %v6429_v30, %v2049_v44  ;;  %v7909_v23 = vld [vmem:[#allocation27_spill] sm:$0xff]  ;;  %4466 = vmatprep.subr.bf16.mxu0 %v4465_v54  ;;  %v4469_v44 = vpack.c.bf16 %v2637_v0, %v2633_v53  ;;  %v2649_v54 = vld [vmem:[#allocation2 + $0x6d8] sm:$0xff]  ;;  %v7919_v53 = vld [vmem:[#allocation32_spill] sm:$0xff] }
 0x43c   :  { %v6465_v6 = vadd.f32 %v4696_v19, %v7903_v7  ;;  %v1937_v2 = vpop.f32.mrb[64].mxu0  ;;  %4340 = vmatprep.subr.bf16.mxu1 %v4339_v22  ;;  %v2096_v21 = vadd.f32 %v6437_v5, %v2050_v17  ;;  %v7911_v22 = vld [vmem:[#allocation28_spill] sm:$0xff] }
 0x43d   :  { %v2051_v15 = vmul.f32 %v6421_v56, %v6460_v59  ;;  %v4697_v41 = vadd.f32 %v1937_v2, %v6389_v14  ;;  %v1939_v47 = vpop.f32.mrb[65].mxu0  ;;  %4342 = vmatpush1.bf16.msra.mxu1 %v4341_v16  ;;  %v4467_v16 = vpack.c.bf16 %v2628_v24, %v2624_v8  ;;  %v7917_v24 = vld [vmem:[#allocation31_spill] sm:$0xff] }
 0x43e   :  { %7904 = vst [vmem:[#allocation46_spill] sm:$0xff] %v6465_v6  ;;  %v2052_v12 = vmul.f32 %v6412_v25, %v6465_v6  ;;  %v4698_v20 = vadd.f32 %v1939_v47, %v6397_v55  ;;  %v3379_v6 = vld [vmem:[#allocation5 + $0x6d8] sm:$0xff] }
 0x43f   :  { %v2097_v35 = vadd.f32 %v6429_v30, %v2051_v15  ;;  %v6483_v49 = vadd.f32 %v4697_v41, %v7907_v26  ;;  %v2632_v15 = vld [vmem:[#allocation2 + $0x650] sm:$0xff]  ;;  %4468 = vmatpush1.bf16.msra.mxu0 %v4467_v16 }
 0x440   :  { %v6477_v62 = vadd.f32 %v4698_v20, %v7905_v48  ;;  %v1943_v52 = vpop.f32.mrb[66].mxu0  ;;  %v2098_v3 = vadd.f32 %v6437_v5, %v2052_v12  ;;  %v2636_v41 = vld [vmem:[#allocation2 + $0x670] sm:$0xff]  ;;  %v2641_v12 = vld [vmem:[#allocation2 + $0x698] sm:$0xff]  ;;  %4470 = vmatprep.subr.bf16.mxu0 %v4469_v44 }
 0x441   :  { %7908 = vst [vmem:[#allocation48_spill] sm:$0xff] %v6483_v49  ;;  %v4699_v36 = vadd.f32 %v1943_v52, %v6389_v14  ;;  %v1945_v63 = vpop.f32.mrb[67].mxu0  ;;  %v4345_v11 = vpack.c.bf16 %v2097_v35, %v2095_v40  ;;  %v2053_v31 = vmul.f32 %v6421_v56, %v6483_v49  ;;  %v2645_v20 = vld [vmem:[#allocation2 + $0x6b8] sm:$0xff]  ;;  %v4471_v40 = vpack.c.bf16 %v2636_v41, %v2632_v15  ;;  %v2640_v26 = vld [vmem:[#allocation2 + $0x690] sm:$0xff] }
 0x442   :  { %7906 = vst [vmem:[#allocation45_spill] sm:$0xff] %v6477_v62  ;;  %v4700_v42 = vadd.f32 %v1945_v63, %v6397_v55  ;;  %v4343_v37 = vpack.c.bf16 %v2098_v3, %v2096_v21  ;;  %v2054_v19 = vmul.f32 %v6412_v25, %v6477_v62  ;;  %v7915_v48 = vld [vmem:[#allocation29_spill] sm:$0xff]  ;;  %v4473_v8 = vpack.c.bf16 %v2645_v20, %v2641_v12  ;;  %v7921_v12 = vld [vmem:[#allocation34_spill] sm:$0xff] }
 0x443   :  { %v6488_v61 = vadd.f32 %v4699_v36, %v7909_v23  ;;  %v2099_v39 = vadd.f32 %v6429_v30, %v2053_v31  ;;  %v2644_v36 = vld [vmem:[#allocation2 + $0x6b0] sm:$0xff]  ;;  %v2653_v23 = vld [vmem:[#allocation2 + $0x6f8] sm:$0xff]  ;;  %4472 = vmatpush1.bf16.msra.mxu0 %v4471_v40 }
 0x444   :  { %v6493_v57 = vadd.f32 %v4700_v42, %v7911_v22  ;;  %v1949_v34 = vpop.f32.mrb[68].mxu0  ;;  %4344 = vmatprep.subr.bf16.mxu1 %v4343_v37  ;;  %v2100_v35 = vadd.f32 %v6437_v5, %v2054_v19  ;;  %v4475_v22 = vpack.c.bf16 %v2644_v36, %v2640_v26  ;;  %4474 = vmatprep.subr.bf16.mxu0 %v4473_v8  ;;  %v2652_v44 = vld [vmem:[#allocation2 + $0x6f0] sm:$0xff]  ;;  %v2657_v41 = vld [vmem:[#allocation2 + $0x718] sm:$0xff] }
 0x445   :  { %7910 = vst [vmem:[#allocation47_spill] sm:$0xff] %v6488_v61  ;;  %v2055_v50 = vmul.f32 %v6421_v56, %v6488_v61  ;;  %v4701_v17 = vadd.f32 %v1949_v34, %v6389_v14  ;;  %v1951_v7 = vpop.f32.mrb[69].mxu0  ;;  %4346 = vmatpush1.bf16.msra.mxu1 %v4345_v11  ;;  %v2656_v26 = vld [vmem:[#allocation2 + $0x710] sm:$0xff]  ;;  %v3372_v61 = vld [vmem:[#allocation5 + $0x6a0] sm:$0xff] }
 0x446   :  { %7912 = vst [vmem:[#allocation50_spill] sm:$0xff] %v6493_v57  ;;  %v2056_v2 = vmul.f32 %v6412_v25, %v6493_v57  ;;  %v4702_v45 = vadd.f32 %v1951_v7, %v6397_v55  ;;  %v2660_v36 = vld [vmem:[#allocation2 + $0x730] sm:$0xff] }
 0x447   :  { %v2101_v47 = vadd.f32 %v6429_v30, %v2055_v50  ;;  %v6511_v52 = vadd.f32 %v4701_v17, %v7915_v48  ;;  %4476 = vmatpush1.bf16.msra.mxu0 %v4475_v22  ;;  %v4483_v22 = vpack.c.bf16 %v2660_v36, %v2656_v26  ;;  %v6771_v57 = vld [vmem:[#allocation5 + $0x4b0] sm:$0xff] }
 0x448   :  { %v6505_v58 = vadd.f32 %v4702_v45, %v7913_v46  ;;  %v1955_v28 = vpop.f32.mrb[70].mxu0  ;;  %v2102_v33 = vadd.f32 %v6437_v5, %v2056_v2  ;;  %v4477_v2 = vpack.c.bf16 %v2653_v23, %v2649_v54  ;;  %v2648_v45 = vld [vmem:[#allocation2 + $0x6d0] sm:$0xff] }
 0x449   :  { %7916 = vst [vmem:[#allocation52_spill] sm:$0xff] %v6511_v52  ;;  %v4703_v21 = vadd.f32 %v1955_v28, %v6389_v14  ;;  %v1957_v3 = vpop.f32.mrb[71].mxu0  ;;  %v4349_v37 = vpack.c.bf16 %v2101_v47, %v2099_v39  ;;  %v2057_v34 = vmul.f32 %v6421_v56, %v6511_v52  ;;  %v2661_v47 = vld [vmem:[#allocation2 + $0x738] sm:$0xff]  ;;  %v4479_v40 = vpack.c.bf16 %v2652_v44, %v2648_v45  ;;  %v6769_v52 = vld [vmem:[#allocation5 + $0x4a0] sm:$0xff]  ;;  %v3374_v62 = vld [vmem:[#allocation5 + $0x6b0] sm:$0xff] }
 0x44a   :  { %7914 = vst [vmem:[#allocation49_spill] sm:$0xff] %v6505_v58  ;;  %v4704_v63 = vadd.f32 %v1957_v3, %v6397_v55  ;;  %v4347_v32 = vpack.c.bf16 %v2102_v33, %v2100_v35  ;;  %v2058_v11 = vmul.f32 %v6412_v25, %v6505_v58  ;;  %v7923_v39 = vld [vmem:[#allocation33_spill] sm:$0xff]  ;;  %4478 = vmatprep.subr.bf16.mxu0 %v4477_v2  ;;  %v7929_v45 = vld [vmem:[#allocation38_spill] sm:$0xff] }
 0x44b   :  { %v6516_v42 = vadd.f32 %v4703_v21, %v7917_v24  ;;  %v2103_v33 = vadd.f32 %v6429_v30, %v2057_v34  ;;  %v4481_v8 = vpack.c.bf16 %v2661_v47, %v2657_v41  ;;  %v7925_v24 = vld [vmem:[#allocation35_spill] sm:$0xff]  ;;  %4480 = vmatpush1.bf16.msra.mxu0 %v4479_v40  ;;  %v3375_v58 = vld [vmem:[#allocation5 + $0x6b8] sm:$0xff] }
 0x44c   :  { %v6521_v0 = vadd.f32 %v4704_v63, %v7919_v53  ;;  %v1961_v19 = vpop.f32.mrb[72].mxu0  ;;  %4348 = vmatprep.subr.bf16.mxu1 %v4347_v32  ;;  %v2104_v28 = vadd.f32 %v6437_v5, %v2058_v11  ;;  %v7927_v11 = vld [vmem:[#allocation36_spill] sm:$0xff] }
 0x44d   :  { %7918 = vst [vmem:[#allocation51_spill] sm:$0xff] %v6516_v42  ;;  %v2059_v16 = vmul.f32 %v6421_v56, %v6516_v42  ;;  %v4705_v31 = vadd.f32 %v1961_v19, %v6389_v14  ;;  %v1963_v50 = vpop.f32.mrb[73].mxu0  ;;  %4350 = vmatpush1.bf16.msra.mxu1 %v4349_v37  ;;  %4482 = vmatprep.subr.bf16.mxu0 %v4481_v8  ;;  %v6756_v42 = vld [vmem:[#allocation5 + $0x4a8] sm:$0xff] }
 0x44e   :  { %7920 = vst [vmem:[#allocation54_spill] sm:$0xff] %v6521_v0  ;;  %v2060_v17 = vmul.f32 %v6412_v25, %v6521_v0  ;;  %v4706_v7 = vadd.f32 %v1963_v50, %v6397_v55  ;;  %v3370_v0 = vld [vmem:[#allocation5 + $0x690] sm:$0xff] }
 0x44f   :  { %v2105_v15 = vadd.f32 %v6429_v30, %v2059_v16  ;;  %v6539_v48 = vadd.f32 %v4705_v31, %v7923_v39  ;;  %4484 = vmatpush1.bf16.msra.mxu0 %v4483_v22 }
 0x450   :  { %v6533_v20 = vadd.f32 %v4706_v7, %v7921_v12  ;;  %v1967_v46 = vpop.f32.mrb[74].mxu0  ;;  %v2106_v35 = vadd.f32 %v6437_v5, %v2060_v17 }
 0x451   :  { %7924 = vst [vmem:[#allocation11_spill] sm:$0xff] %v6539_v48  ;;  %v4707_v21 = vadd.f32 %v1967_v46, %v6389_v14  ;;  %v1969_v3 = vpop.f32.mrb[75].mxu0  ;;  %v4353_v54 = vpack.c.bf16 %v2105_v15, %v2103_v33  ;;  %v2061_v34 = vmul.f32 %v6421_v56, %v6539_v48  ;;  %v7931_v46 = vld [vmem:[#allocation37_spill] sm:$0xff]  ;;  %v3368_v48 = vld [vmem:[#allocation5 + $0x680] sm:$0xff] }
 0x452   :  { %7922 = vst [vmem:[#allocation53_spill] sm:$0xff] %v6533_v20  ;;  %v4708_v63 = vadd.f32 %v1969_v3, %v6397_v55  ;;  %v4351_v32 = vpack.c.bf16 %v2106_v35, %v2104_v28  ;;  %v2062_v23 = vmul.f32 %v6412_v25, %v6533_v20  ;;  %v7933_v3 = vld [vmem:[#allocation39_spill] sm:$0xff]  ;;  %v6754_v20 = vld [vmem:[#allocation5 + $0x490] sm:$0xff] }
 0x453   :  { %v6544_v37 = vadd.f32 %v4707_v21, %v7925_v24  ;;  %v2107_v12 = vadd.f32 %v6429_v30, %v2061_v34  ;;  %7960 = vst [vmem:[#allocation39_spill] sm:$0xff] %v6756_v42  ;;  %v3384_v42 = vld [vmem:[#allocation5 + $0x700] sm:$0xff] }
 0x454   :  { %v6549_v53 = vadd.f32 %v4708_v63, %v7927_v11  ;;  %v1973_v19 = vpop.f32.mrb[76].mxu0  ;;  %4352 = vmatprep.subr.bf16.mxu1 %v4351_v32  ;;  %v2108_v41 = vadd.f32 %v6437_v5, %v2062_v23  ;;  %v7935_v63 = vld [vmem:[#allocation40_spill] sm:$0xff] }
 0x455   :  { %7926 = vst [vmem:[#allocation18_spill] sm:$0xff] %v6544_v37  ;;  %v2063_v16 = vmul.f32 %v6421_v56, %v6544_v37  ;;  %v4709_v31 = vadd.f32 %v1973_v19, %v6389_v14  ;;  %v1975_v50 = vpop.f32.mrb[77].mxu0  ;;  %4354 = vmatpush1.bf16.msra.mxu1 %v4353_v54  ;;  %v6752_v37 = vld [vmem:[#allocation5 + $0x480] sm:$0xff] }
 0x456   :  { %7928 = vst [vmem:[#allocation17_spill] sm:$0xff] %v6549_v53  ;;  %v2064_v17 = vmul.f32 %v6412_v25, %v6549_v53  ;;  %v4710_v7 = vadd.f32 %v1975_v50, %v6397_v55  ;;  %v3371_v53 = vld [vmem:[#allocation5 + $0x698] sm:$0xff] }
 0x457   :  { %v2109_v2 = vadd.f32 %v6429_v30, %v2063_v16  ;;  %v6567_v28 = vadd.f32 %v4709_v31, %v7931_v46  ;;  %v7937_v16 = vld [vmem:[#allocation42_spill] sm:$0xff] }
 0x458   :  { %v6561_v44 = vadd.f32 %v4710_v7, %v7929_v45  ;;  %v1979_v15 = vpop.f32.mrb[78].mxu0  ;;  %v2110_v47 = vadd.f32 %v6437_v5, %v2064_v17  ;;  %v7939_v45 = vld [vmem:[#allocation41_spill] sm:$0xff] }
 0x459   :  { %7932 = vst [vmem:[#allocation20_spill] sm:$0xff] %v6567_v28  ;;  %v4711_v35 = vadd.f32 %v1979_v15, %v6389_v14  ;;  %v1981_v33 = vpop.f32.mrb[79].mxu0  ;;  %v4357_v26 = vpack.c.bf16 %v2109_v2, %v2107_v12  ;;  %v2065_v24 = vmul.f32 %v6421_v56, %v6567_v28  ;;  %v3369_v28 = vld [vmem:[#allocation5 + $0x688] sm:$0xff] }
 0x45a   :  { %7930 = vst [vmem:[#allocation19_spill] sm:$0xff] %v6561_v44  ;;  %v4712_v39 = vadd.f32 %v1981_v33, %v6397_v55  ;;  %v4355_v21 = vpack.c.bf16 %v2110_v47, %v2108_v41  ;;  %v2066_v36 = vmul.f32 %v6412_v25, %v6561_v44 }
 0x45b   :  { %v6572_v40 = vadd.f32 %v4711_v35, %v7933_v3  ;;  %v2111_v2 = vadd.f32 %v6429_v30, %v2065_v24  ;;  %v7941_v35 = vld [vmem:[#allocation43_spill] sm:$0xff]  ;;  %v7943_v3 = vld [vmem:[#allocation44_spill] sm:$0xff] }
 0x45c   :  { %v6577_v32 = vadd.f32 %v4712_v39, %v7935_v63  ;;  %v1985_v8 = vpop.f32.mrb[80].mxu0  ;;  %4356 = vmatprep.subr.bf16.mxu1 %v4355_v21  ;;  %v2112_v17 = vadd.f32 %v6437_v5, %v2066_v36  ;;  %v2563_v24 = vld [vmem:[#allocation2 + $0x428] sm:$0xff] }
 0x45d   :  { %7934 = vst [vmem:[#allocation22_spill] sm:$0xff] %v6572_v40  ;;  %v2067_v54 = vmul.f32 %v6421_v56, %v6572_v40  ;;  %v4713_v23 = vadd.f32 %v1985_v8, %v6389_v14  ;;  %v1987_v11 = vpop.f32.mrb[81].mxu0  ;;  %4358 = vmatpush1.bf16.msra.mxu1 %v4357_v26  ;;  %v2559_v8 = vld [vmem:[#allocation2 + $0x408] sm:$0xff] }
 0x45e   :  { %7936 = vst [vmem:[#allocation21_spill] sm:$0xff] %v6577_v32  ;;  %v2068_v19 = vmul.f32 %v6412_v25, %v6577_v32  ;;  %v4714_v22 = vadd.f32 %v1987_v11, %v6397_v55 }
 0x45f   :  { %v2113_v34 = vadd.f32 %v6429_v30, %v2067_v54  ;;  %v6595_v15 = vadd.f32 %v4713_v23, %v7939_v45  ;;  %v2570_v45 = vld [vmem:[#allocation2 + $0x460] sm:$0xff] }
 0x460   :  { %v6589_v31 = vadd.f32 %v4714_v22, %v7937_v16  ;;  %v1991_v50 = vpop.f32.mrb[82].mxu0  ;;  %v2114_v7 = vadd.f32 %v6437_v5, %v2068_v19  ;;  %v4369_v22 = vpack.c.bf16 %v2563_v24, %v2559_v8  ;;  %v2562_v16 = vld [vmem:[#allocation2 + $0x420] sm:$0xff] }
 0x461   :  { %7940 = vst [vmem:[#allocation24_spill] sm:$0xff] %v6595_v15  ;;  %v4715_v41 = vadd.f32 %v1991_v50, %v6389_v14  ;;  %v1993_v47 = vpop.f32.mrb[83].mxu0  ;;  %v4361_v39 = vpack.c.bf16 %v2113_v34, %v2111_v2  ;;  %v2069_v36 = vmul.f32 %v6421_v56, %v6595_v15  ;;  %v2558_v34 = vld [vmem:[#allocation2 + $0x400] sm:$0xff]  ;;  %v6738_v15 = vld [vmem:[#allocation5 + $0x498] sm:$0xff] }
 0x462   :  { %7938 = vst [vmem:[#allocation23_spill] sm:$0xff] %v6589_v31  ;;  %v4716_v12 = vadd.f32 %v1993_v47, %v6397_v55  ;;  %v4359_v46 = vpack.c.bf16 %v2114_v7, %v2112_v17  ;;  %v2070_v21 = vmul.f32 %v6412_v25, %v6589_v31  ;;  %v2571_v17 = vld [vmem:[#allocation2 + $0x468] sm:$0xff]  ;;  %v2566_v2 = vld [vmem:[#allocation2 + $0x440] sm:$0xff]  ;;  %v3953_v7 = vld [vmem:[%s7709_s3 + $0x90] sm:$0xff] }
 0x463   :  { %v6600_v33 = vadd.f32 %v4715_v41, %v7941_v35  ;;  %v2115_v11 = vadd.f32 %v6429_v30, %v2069_v36  ;;  %v2575_v41 = vld [vmem:[#allocation2 + $0x488] sm:$0xff]  ;;  %v4375_v35 = vpack.c.bf16 %v2570_v45, %v2566_v2  ;;  %v2582_v24 = vld [vmem:[#allocation2 + $0x4c0] sm:$0xff]  ;;  %7959 = vst [vmem:[#allocation37_spill] sm:$0xff] %v6738_v15  ;;  %v3387_v15 = vld [vmem:[#allocation5 + $0x718] sm:$0xff] }
 0x464   :  { %v6605_v26 = vadd.f32 %v4716_v12, %v7943_v3  ;;  %4360 = vmatprep.subr.bf16.mxu1 %v4359_v46  ;;  %v2116_v54 = vadd.f32 %v6437_v5, %v2070_v21  ;;  %v2579_v47 = vld [vmem:[#allocation2 + $0x4a8] sm:$0xff]  ;;  %v7946_v12 = vmov 0.0   ;;  %v3950_v46 = vld [vmem:[%s7709_s3 + $0x78] sm:$0xff]  ;;  %v2574_v21 = vld [vmem:[#allocation2 + $0x480] sm:$0xff] }
 0x465   :  { %7942 = vst [vmem:[#allocation26_spill] sm:$0xff] %v6600_v33  ;;  %v2071_v14 = vmul.f32 %v6421_v56, %v6600_v33  ;;  %4362 = vmatpush1.bf16.msra.mxu1 %v4361_v39  ;;  %v2567_v56 = vld [vmem:[#allocation2 + $0x448] sm:$0xff]  ;;  %v4377_v39 = vpack.c.bf16 %v2579_v47, %v2575_v41  ;;  %v2578_v3 = vld [vmem:[#allocation2 + $0x4a0] sm:$0xff]  ;;  %v3954_v47 = vld [vmem:[%s7709_s3 + $0x98] sm:$0xff] }
 0x466   :  { %7944 = vst [vmem:[#allocation25_spill] sm:$0xff] %v6605_v26  ;;  %v2072_v55 = vmul.f32 %v6412_v25, %v6605_v26  ;;  %v3949_v25 = vld [vmem:[%s7709_s3 + $0x70] sm:$0xff]  ;;  %v2583_v36 = vld [vmem:[#allocation2 + $0x4c8] sm:$0xff]  ;;  %v2602_v2 = vld [vmem:[#allocation2 + $0x560] sm:$0xff] }
 0x467   :  { %v2117_v63 = vadd.f32 %v6429_v30, %v2071_v14  ;;  %v4373_v30 = vpack.c.bf16 %v2571_v17, %v2567_v56  ;;  %v2587_v14 = vld [vmem:[#allocation2 + $0x4e8] sm:$0xff]  ;;  %v3364_v26 = vld [vmem:[#allocation5 + $0x660] sm:$0xff]  ;;  %v3366_v33 = vld [vmem:[#allocation5 + $0x670] sm:$0xff] }
 0x468   :  { %v2118_v23 = vadd.f32 %v6437_v5, %v2072_v55  ;;  %v4371_v5 = vpack.c.bf16 %v2562_v16, %v2558_v34  ;;  %v3951_v55 = vld [vmem:[%s7709_s3 + $0x80] sm:$0xff]  ;;  %v4381_v8 = vpack.c.bf16 %v2587_v14, %v2583_v36  ;;  %v2599_v56 = vld [vmem:[#allocation2 + $0x548] sm:$0xff] }
 0x469   :  { %v4366_v50 = vpack.c.bf16 %v2117_v63, %v2115_v11  ;;  %v4379_v63 = vpack.c.bf16 %v2578_v3, %v2574_v21  ;;  %v2595_v11 = vld [vmem:[#allocation2 + $0x528] sm:$0xff]  ;;  %v2590_v16 = vld [vmem:[#allocation2 + $0x500] sm:$0xff] }
 0x46a   :  { %v4363_v19 = vpack.c.bf16 %v2118_v23, %v2116_v54  ;;  %v2586_v54 = vld [vmem:[#allocation2 + $0x4e0] sm:$0xff]  ;;  %v2591_v23 = vld [vmem:[#allocation2 + $0x508] sm:$0xff] }
 0x46b   :  { %v4385_v34 = vpack.c.bf16 %v2595_v11, %v2591_v23  ;;  %v2603_v17 = vld [vmem:[#allocation2 + $0x568] sm:$0xff]  ;;  %v2610_v21 = vld [vmem:[#allocation2 + $0x5a0] sm:$0xff] }
 0x46c   :  { %4365 = vmatprep.subr.msk.bf16.mxu1 %vm5569_vm3, %v4363_v19  ;;  %v3952_v19 = vld [vmem:[%s7709_s3 + $0x88] sm:$0xff]  ;;  %v3955_v14 = vld [vmem:[%s7709_s3 + $0xa0] sm:$0xff] }
 0x46d   :  { %4368 = vmatpush1.bf16.msk.msra.mxu1 %vm5569_vm3, %v4366_v50  ;;  %v2594_v50 = vld [vmem:[#allocation2 + $0x520] sm:$0xff]  ;;  %v2607_v45 = vld [vmem:[#allocation2 + $0x588] sm:$0xff] }
 0x46e   :  { %4370 = vmatprep.subr.bf16.mxu1 %v4369_v22  ;;  %v4383_v22 = vpack.c.bf16 %v2586_v54, %v2582_v24  ;;  %v2611_v41 = vld [vmem:[#allocation2 + $0x5a8] sm:$0xff]  ;;  %v2618_v24 = vld [vmem:[#allocation2 + $0x5e0] sm:$0xff] }
 0x46f   :  { %v2615_v3 = vld [vmem:[#allocation2 + $0x5c8] sm:$0xff] }
 0x470   :  { %3965 = vmatmul.mubr.msk.f32.vlgmr.msra.gmra.mrb[56].mxu1 %vm407_vm4, %v3949_v25  ;;  %v4387_v25 = vpack.c.bf16 %v2594_v50, %v2590_v16  ;;  %v2619_v36 = vld [vmem:[#allocation2 + $0x5e8] sm:$0xff]  ;;  %v2626_v16 = vld [vmem:[#allocation2 + $0x620] sm:$0xff] }
 0x471   :  { %2252 = vmatprep.mubr.f32.mxu1 %v7946_v12  ;;  %4372 = vmatpush1.bf16.msra.mxu1 %v4371_v5  ;;  %v4389_v5 = vpack.c.bf16 %v2603_v17, %v2599_v56  ;;  %v2623_v54 = vld [vmem:[#allocation2 + $0x608] sm:$0xff]  ;;  %v3957_v17 = vld [vmem:[%s7709_s3 + $0xb0] sm:$0xff] }
 0x472   :  { %4374 = vmatprep.subr.bf16.mxu1 %v4373_v30  ;;  %v2598_v30 = vld [vmem:[#allocation2 + $0x540] sm:$0xff]  ;;  %v2627_v23 = vld [vmem:[#allocation2 + $0x628] sm:$0xff] }
 0x473   :  { %v3956_v11 = vld [vmem:[%s7709_s3 + $0xa8] sm:$0xff] }
 0x474   :  { %3966 = vmatmul.mubr.msk.f32.gmra.mrb[58].mxu1 %vm407_vm4, %v3950_v46  ;;  %v4391_v46 = vpack.c.bf16 %v2602_v2, %v2598_v30  ;;  %v2631_v50 = vld [vmem:[#allocation2 + $0x648] sm:$0xff]  ;;  %v2634_v30 = vld [vmem:[#allocation2 + $0x660] sm:$0xff] }
 0x475   :  { %2258 = vmatprep.mubr.f32.mxu1 %v7946_v12  ;;  %4376 = vmatpush1.bf16.msra.mxu1 %v4375_v35  ;;  %v4393_v35 = vpack.c.bf16 %v2611_v41, %v2607_v45  ;;  %v2635_v56 = vld [vmem:[#allocation2 + $0x668] sm:$0xff]  ;;  %v3958_v41 = vld [vmem:[%s7709_s3 + $0xb8] sm:$0xff] }
 0x476   :  { %4378 = vmatprep.subr.bf16.mxu1 %v4377_v39  ;;  %v2606_v39 = vld [vmem:[#allocation2 + $0x580] sm:$0xff]  ;;  %v2639_v2 = vld [vmem:[#allocation2 + $0x688] sm:$0xff] }
 0x477   :  { %v2643_v45 = vld [vmem:[#allocation2 + $0x6a8] sm:$0xff] }
 0x478   :  { %3967 = vmatmul.mubr.msk.f32.gmra.mrb[60].mxu1 %vm407_vm4, %v3951_v55  ;;  %v4395_v55 = vpack.c.bf16 %v2610_v21, %v2606_v39  ;;  %v2642_v39 = vld [vmem:[#allocation2 + $0x6a0] sm:$0xff]  ;;  %v2647_v21 = vld [vmem:[#allocation2 + $0x6c8] sm:$0xff] }
 0x479   :  { %2264 = vmatprep.mubr.f32.mxu1 %v7946_v12  ;;  %4380 = vmatpush1.bf16.msra.mxu1 %v4379_v63  ;;  %v4397_v63 = vpack.c.bf16 %v2619_v36, %v2615_v3  ;;  %v2651_v3 = vld [vmem:[#allocation2 + $0x6e8] sm:$0xff]  ;;  %v3959_v36 = vld [vmem:[%s7709_s3 + $0xc0] sm:$0xff] }
 0x47a   :  { %4382 = vmatprep.subr.bf16.mxu1 %v4381_v8  ;;  %v2614_v8 = vld [vmem:[#allocation2 + $0x5c0] sm:$0xff]  ;;  %v6736_v31 = vld [vmem:[#allocation5 + $0x488] sm:$0xff] }
 0x47b   :  { %7958 = vst [vmem:[#allocation38_spill] sm:$0xff] %v6736_v31  ;;  %v3385_v31 = vld [vmem:[#allocation5 + $0x708] sm:$0xff] }
 0x47c   :  { %3968 = vmatmul.mubr.msk.f32.gmra.mrb[62].mxu1 %vm407_vm4, %v3952_v19  ;;  %v4399_v19 = vpack.c.bf16 %v2618_v24, %v2614_v8  ;;  %v2650_v8 = vld [vmem:[#allocation2 + $0x6e0] sm:$0xff]  ;;  %v2655_v24 = vld [vmem:[#allocation2 + $0x708] sm:$0xff] }
 0x47d   :  { %2270 = vmatprep.mubr.f32.mxu1 %v7946_v12  ;;  %4384 = vmatpush1.bf16.msra.mxu1 %v4383_v22  ;;  %v4401_v22 = vpack.c.bf16 %v2627_v23, %v2623_v54  ;;  %v2659_v54 = vld [vmem:[#allocation2 + $0x728] sm:$0xff] }
 0x47e   :  { %4386 = vmatprep.subr.bf16.mxu1 %v4385_v34  ;;  %v2622_v34 = vld [vmem:[#allocation2 + $0x600] sm:$0xff]  ;;  %v3960_v23 = vld [vmem:[%s7709_s3 + $0xc8] sm:$0xff] }
 0x480   :  { %3969 = vmatmul.mubr.msk.f32.gmra.mrb[64].mxu1 %vm407_vm4, %v3953_v7  ;;  %v4403_v7 = vpack.c.bf16 %v2626_v16, %v2622_v34  ;;  %v2658_v34 = vld [vmem:[#allocation2 + $0x720] sm:$0xff]  ;;  %v3961_v16 = vld [vmem:[%s7709_s3 + $0xd0] sm:$0xff] }
 0x481   :  { %2276 = vmatprep.mubr.f32.mxu1 %v7946_v12  ;;  %4388 = vmatpush1.bf16.msra.mxu1 %v4387_v25  ;;  %v4405_v25 = vpack.c.bf16 %v2635_v56, %v2631_v50  ;;  %v3962_v56 = vld [vmem:[%s7709_s3 + $0xd8] sm:$0x3f] }
 0x482   :  { %4390 = vmatprep.subr.bf16.mxu1 %v4389_v5  ;;  %v2630_v5 = vld [vmem:[#allocation2 + $0x640] sm:$0xff] }
 0x484   :  { %3970 = vmatmul.mubr.msk.f32.gmra.mrb[66].mxu1 %vm407_vm4, %v3954_v47  ;;  %v4407_v47 = vpack.c.bf16 %v2634_v30, %v2630_v5  ;;  %v2665_v5 = vld [vmem:[#allocation2 + $0x758] sm:$0xff] }
 0x485   :  { %2282 = vmatprep.mubr.f32.mxu1 %v7946_v12  ;;  %4392 = vmatpush1.bf16.msra.mxu1 %v4391_v46  ;;  %v4409_v46 = vpack.c.bf16 %v2643_v45, %v2639_v2  ;;  %v2669_v30 = vld [vmem:[#allocation2 + $0x778] sm:$0xff]  ;;  %v2662_v2 = vld [vmem:[#allocation2 + $0x740] sm:$0xff] }
 0x486   :  { %4394 = vmatprep.subr.bf16.mxu1 %v4393_v35  ;;  %v2638_v35 = vld [vmem:[#allocation2 + $0x680] sm:$0xff]  ;;  %v4485_v45 = vpack.c.bf16 %v2669_v30, %v2665_v5  ;;  %v2680_v5 = vld [vmem:[#allocation2 + $0x7d0] sm:$0xff] }
 0x487   :  { %v2684_v30 = vld [vmem:[#allocation2 + $0x7f0] sm:$0xff] }
 0x488   :  { %3971 = vmatmul.mubr.msk.f32.gmra.mrb[68].mxu1 %vm407_vm4, %v3955_v14  ;;  %v4411_v14 = vpack.c.bf16 %v2642_v39, %v2638_v35  ;;  %v2671_v39 = vld [vmem:[#allocation2 + $0x788] sm:$0xff]  ;;  %4486 = vmatprep.subr.bf16.mxu0 %v4485_v45 }
 0x489   :  { %2288 = vmatprep.mubr.f32.mxu1 %v7946_v12  ;;  %4396 = vmatpush1.bf16.msra.mxu1 %v4395_v55  ;;  %v4413_v55 = vpack.c.bf16 %v2651_v3, %v2647_v21  ;;  %v2675_v21 = vld [vmem:[#allocation2 + $0x7a8] sm:$0xff]  ;;  %v2673_v3 = vld [vmem:[#allocation2 + $0x798] sm:$0xff] }
 0x48a   :  { %4398 = vmatprep.subr.bf16.mxu1 %v4397_v63  ;;  %v2646_v63 = vld [vmem:[#allocation2 + $0x6c0] sm:$0xff]  ;;  %v3289_v45 = vld [vmem:[#allocation5 + $0x408] sm:$0xff] }
 0x48c   :  { %3972 = vmatmul.mubr.msk.f32.gmra.mrb[70].mxu1 %vm407_vm4, %v3956_v11  ;;  %v4415_v11 = vpack.c.bf16 %v2650_v8, %v2646_v63  ;;  %v2670_v63 = vld [vmem:[#allocation2 + $0x780] sm:$0xff] }
 0x48d   :  { %2294 = vmatprep.mubr.f32.mxu1 %v7946_v12  ;;  %4400 = vmatpush1.bf16.msra.mxu1 %v4399_v19  ;;  %v4417_v19 = vpack.c.bf16 %v2659_v54, %v2655_v24  ;;  %v2674_v8 = vld [vmem:[#allocation2 + $0x7a0] sm:$0xff]  ;;  %v2672_v24 = vld [vmem:[#allocation2 + $0x790] sm:$0xff] }
 0x48e   :  { %4402 = vmatprep.subr.bf16.mxu1 %v4401_v22  ;;  %v2654_v22 = vld [vmem:[#allocation2 + $0x700] sm:$0xff]  ;;  %v4427_v54 = vpack.c.bf16 %v2674_v8, %v2670_v63 }
 0x48f   :  { %v4419_v50 = vpack.c.bf16 %v2658_v34, %v2654_v22  ;;  %v2683_v22 = vld [vmem:[#allocation2 + $0x7e8] sm:$0xff]  ;;  %v2681_v34 = vld [vmem:[#allocation2 + $0x7d8] sm:$0xff]  ;;  %v6704_v8 = vld [vmem:[#allocation5 + $0x400] sm:$0xff] }
 0x490   :  { %3973 = vmatmul.mubr.msk.f32.gmra.mrb[72].mxu1 %vm407_vm4, %v3957_v17  ;;  %v2663_v17 = vld [vmem:[#allocation2 + $0x748] sm:$0xff] }
 0x491   :  { %2300 = vmatprep.mubr.f32.mxu1 %v7946_v12  ;;  %4404 = vmatpush1.bf16.msra.mxu1 %v4403_v7  ;;  %v2667_v7 = vld [vmem:[#allocation2 + $0x768] sm:$0xff] }
 0x492   :  { %4406 = vmatprep.subr.bf16.mxu1 %v4405_v25  ;;  %v4421_v25 = vpack.c.bf16 %v2667_v7, %v2663_v17  ;;  %v2682_v17 = vld [vmem:[#allocation2 + $0x7e0] sm:$0xff] }
 0x494   :  { %3974 = vmatmul.mubr.msk.f32.gmra.mrb[74].mxu1 %vm407_vm4, %v3958_v41  ;;  %v2666_v41 = vld [vmem:[#allocation2 + $0x760] sm:$0xff] }
 0x495   :  { %2306 = vmatprep.mubr.f32.mxu1 %v7946_v12  ;;  %4408 = vmatpush1.bf16.msra.mxu1 %v4407_v47  ;;  %v2664_v47 = vld [vmem:[#allocation2 + $0x750] sm:$0xff]  ;;  %v4423_v35 = vpack.c.bf16 %v2666_v41, %v2662_v2  ;;  %v4495_v2 = vpack.c.bf16 %v2684_v30, %v2680_v5  ;;  %v3291_v41 = vld [vmem:[#allocation5 + $0x418] sm:$0xff]  ;;  %v6721_v30 = vld [vmem:[#allocation5 + $0x440] sm:$0xff] }
 0x496   :  { %4410 = vmatprep.subr.bf16.mxu1 %v4409_v46  ;;  %v2668_v46 = vld [vmem:[#allocation2 + $0x770] sm:$0xff]  ;;  %v3363_v5 = vld [vmem:[#allocation5 + $0x658] sm:$0xff] }
 0x498   :  { %3975 = vmatmul.mubr.msk.f32.gmra.mrb[76].mxu1 %vm407_vm4, %v3959_v36  ;;  %v2677_v36 = vld [vmem:[#allocation2 + $0x7b8] sm:$0xff] }
 0x499   :  { %2312 = vmatprep.mubr.f32.mxu1 %v7946_v12  ;;  %4412 = vmatpush1.bf16.msra.mxu1 %v4411_v14  ;;  %v4425_v14 = vpack.c.bf16 %v2675_v21, %v2671_v39  ;;  %v4007_v39 = vld [vmem:[%s7712_s6 + $0x4] sm:$0xf]  ;;  %v2334_v21 = vrot.slane %v6394_v13, %v5647_v18 }
 0x49a   :  { %4414 = vmatprep.subr.bf16.mxu1 %v4413_v55  ;;  %v4489_v55 = vpack.c.bf16 %v2677_v36, %v2673_v3  ;;  %v2468_v3 = vrot.slane %v4007_v39, %v7891_v29  ;;  %v2514_v36 = vrot.slane %v4007_v39, %v7892_v60  ;;  %v2472_v63 = vrot.slane %v4007_v39, %v5647_v18 }
 0x49c   :  { %3976 = vmatmul.mubr.msk.f32.gmra.mrb[78].mxu1 %vm407_vm4, %v3960_v23  ;;  %v2676_v23 = vld [vmem:[#allocation2 + $0x7b0] sm:$0xff]  ;;  %v6741_v32 = vrot.slane %v2468_v3, %v7891_v29  ;;  %v6744_v40 = vrot.slane %v2514_v36, %v7892_v60  ;;  %v6750_v44 = vrot.slane %v2472_v63, %v7891_v29  ;;  %v6758_v3 = vld [vmem:[#allocation5 + $0x4b8] sm:$0xff]  ;;  %v3373_v29 = vld [vmem:[#allocation5 + $0x6a8] sm:$0xff] }
 0x49d   :  { %2318 = vmatprep.mubr.f32.mxu1 %v7946_v12  ;;  %4416 = vmatpush1.bf16.msra.mxu1 %v4415_v11  ;;  %v4491_v11 = vpack.c.bf16 %v2676_v23, %v2672_v24  ;;  %v6706_v24 = vld [vmem:[#allocation5 + $0x410] sm:$0xff]  ;;  %7961 = vst [vmem:[#allocation40_spill] sm:$0xff] %v6758_v3 }
 0x49e   :  { %4418 = vmatprep.subr.bf16.mxu1 %v4417_v19  ;;  %v2679_v19 = vld [vmem:[#allocation2 + $0x7c8] sm:$0xff]  ;;  %v3354_v23 = vld [vmem:[#allocation5 + $0x610] sm:$0xff] }
 0x4a0   :  { %3977 = vmatmul.mubr.msk.f32.gmra.mrb[80].mxu1 %vm407_vm4, %v3961_v16  ;;  %v4429_v16 = vpack.c.bf16 %v2683_v22, %v2679_v19  ;;  %v6710_v19 = vld [vmem:[#allocation5 + $0x438] sm:$0xff]  ;;  %v2518_v22 = vrot.slane %v4007_v39, %v5665_v51  ;;  %v3365_v39 = vld [vmem:[#allocation5 + $0x668] sm:$0xff]  ;;  %v6732_v51 = vld [vmem:[#allocation5 + $0x460] sm:$0xff] }
 0x4a1   :  { %2324 = vmatprep.mubr.f32.mxu1 %v7946_v12  ;;  %4420 = vmatpush1.bf16.msra.mxu1 %v4419_v50  ;;  %v4487_v12 = vpack.c.bf16 %v2668_v46, %v2664_v47  ;;  %v2685_v50 = vld [vmem:[#allocation2 + $0x7f8] sm:$0xff]  ;;  %v3353_v47 = vld [vmem:[#allocation5 + $0x608] sm:$0xff]  ;;  %7950 = vst [vmem:[#allocation30_spill] sm:$0xff] %v6710_v19  ;;  %7957 = vst [vmem:[#allocation36_spill] sm:$0xff] %v6732_v51 }
 0x4a2   :  { %4422 = vmatprep.subr.bf16.mxu1 %v4421_v25  ;;  %v4493_v7 = vpack.c.bf16 %v2685_v50, %v2681_v34  ;;  %v3355_v46 = vld [vmem:[#allocation5 + $0x618] sm:$0xff]  ;;  %v3357_v34 = vld [vmem:[#allocation5 + $0x628] sm:$0xff]  ;;  %v6713_v50 = vld [vmem:[#allocation5 + $0x420] sm:$0xff]  ;;  %v6761_v36 = vrot.slane %v2518_v22, %v7892_v60 }
 0x4a3   :  { %4488 = vmatpush1.bf16.msra.mxu0 %v4487_v12  ;;  %v6690_v12 = vpack.c.bf16 %v3355_v46, %v3353_v47  ;;  %7951 = vst [vmem:[#allocation29_spill] sm:$0xff] %v6713_v50  ;;  %v6725_v47 = vld [vmem:[#allocation5 + $0x468] sm:$0xff]  ;;  %v6727_v46 = vld [vmem:[#allocation5 + $0x478] sm:$0xff]  ;;  %v6787_v19 = vld [vmem:[#allocation5 + $0x4d0] sm:$0xff] }
 0x4a4   :  { %3978 = vmatmul.mubr.msk.f32.gmra.mrb[82].mxu1 %vm407_vm4, %v3962_v56  ;;  %4490 = vmatprep.subr.bf16.mxu0 %v4489_v55  ;;  %v2678_v56 = vld [vmem:[#allocation2 + $0x7c0] sm:$0xff]  ;;  %7955 = vst [vmem:[#allocation33_spill] sm:$0xff] %v6725_v47  ;;  %7956 = vst [vmem:[#allocation35_spill] sm:$0xff] %v6727_v46  ;;  %v3378_v22 = vld [vmem:[#allocation5 + $0x6d0] sm:$0xff] }
 0x4a5   :  { %4424 = vmatpush1.bf16.msra.mxu1 %v4423_v35  ;;  %v4431_v25 = vpack.c.bf16 %v2682_v17, %v2678_v56  ;;  %v4497_v35 = vpack.c.bf16 %v3291_v41, %v3289_v45  ;;  %7947 = vst [vmem:[#allocation27_spill] sm:$0xff] %v6690_v12  ;;  %v3358_v56 = vld [vmem:[#allocation5 + $0x630] sm:$0xff]  ;;  %v6717_v17 = vld [vmem:[#allocation5 + $0x448] sm:$0xff]  ;;  %v3360_v45 = vld [vmem:[#allocation5 + $0x640] sm:$0xff] }
 0x4a6   :  { %4426 = vmatprep.subr.bf16.mxu1 %v4425_v14  ;;  %v7948_v14 = vsub.s32 6, %v7893_v43  ;;  %v6715_v43 = vld [vmem:[#allocation5 + $0x430] sm:$0xff]  ;;  %7953 = vst [vmem:[#allocation32_spill] sm:$0xff] %v6717_v17  ;;  %7964 = vst [vmem:[#allocation43_spill] sm:$0xff] %v6787_v19  ;;  %v6797_v17 = vld [vmem:[#allocation5 + $0x4e8] sm:$0xff] }
 0x4a7   :  { %4492 = vmatpush1.bf16.msra.mxu0 %v4491_v11  ;;  %v6708_v11 = vld [vmem:[#allocation5 + $0x428] sm:$0xff]  ;;  %7952 = vst [vmem:[#allocation31_spill] sm:$0xff] %v6715_v43  ;;  %v3362_v41 = vld [vmem:[#allocation5 + $0x650] sm:$0xff]  ;;  %7966 = vst [vmem:[#allocation14_spill] sm:$0xff] %v6797_v17 }
 0x4a8   :  { %4494 = vmatprep.subr.bf16.mxu0 %v4493_v7  ;;  %v2338_v55 = vrot.slane %v6394_v13, %v7948_v14  ;;  %7949 = vst [vmem:[#allocation28_spill] sm:$0xff] %v6708_v11  ;;  %v3356_v13 = vld [vmem:[#allocation5 + $0x620] sm:$0xff]  ;;  %v6719_v7 = vld [vmem:[#allocation5 + $0x458] sm:$0xff]  ;;  %v3382_v47 = vld [vmem:[#allocation5 + $0x6f0] sm:$0xff] }
 0x4a9   :  { %4428 = vmatpush1.bf16.msra.mxu1 %v4427_v54  ;;  %v3352_v54 = vld [vmem:[#allocation5 + $0x600] sm:$0xff]  ;;  %7954 = vst [vmem:[#allocation34_spill] sm:$0xff] %v6719_v7  ;;  %v3367_v14 = vld [vmem:[#allocation5 + $0x678] sm:$0xff]  ;;  %v6777_v60 = vpack.c.bf16 %v3358_v56, %v3356_v13  ;;  %v6793_v13 = vpack.c.bf16 %v3362_v41, %v3360_v45  ;;  %v6811_v56 = vld [vmem:[#allocation5 + $0x4f0] sm:$0xff] }
 0x4aa   :  { %4430 = vmatprep.subr.bf16.mxu1 %v4429_v16  ;;  %v3359_v16 = vld [vmem:[#allocation5 + $0x638] sm:$0xff]  ;;  %v6765_v63 = vpack.c.bf16 %v3354_v23, %v3352_v54  ;;  %v6781_v23 = vld [vmem:[#allocation5 + $0x4c8] sm:$0xff]  ;;  %v6785_v11 = vld [vmem:[#allocation5 + $0x4c0] sm:$0xff]  ;;  %v6801_v43 = vpack.c.bf16 %v3367_v14, %v3365_v39  ;;  %v6818_v14 = vpack.c.bf16 %v3371_v53, %v3369_v28  ;;  %v6832_v28 = vpack.c.bf16 %v3375_v58, %v3373_v29 }
 0x4ab   :  { %4496 = vmatpush1.bf16.msra.mxu0 %v4495_v2  ;;  %v6723_v2 = vld [vmem:[#allocation5 + $0x450] sm:$0xff]  ;;  %v6773_v49 = vpack.c.bf16 %v3359_v16, %v3357_v34  ;;  %7962 = vst [vmem:[#allocation42_spill] sm:$0xff] %v6777_v60  ;;  %7963 = vst [vmem:[#allocation41_spill] sm:$0xff] %v6785_v11  ;;  %v3376_v54 = vld [vmem:[#allocation5 + $0x6c0] sm:$0xff] }
 0x4ac   :  { %4562 = vmatprep.subr.bf16.mxu0 %v6690_v12  ;;  %v6734_v12 = vld [vmem:[#allocation5 + $0x470] sm:$0xff]  ;;  %7965 = vst [vmem:[#allocation44_spill] sm:$0xff] %v6793_v13  ;;  %v6799_v7 = vld [vmem:[#allocation5 + $0x4f8] sm:$0xff]  ;;  %v3381_v60 = vld [vmem:[#allocation5 + $0x6e8] sm:$0xff] }
 0x4ad   :  { %4432 = vmatpush1.bf16.msra.mxu1 %v4431_v25  ;;  %v3361_v25 = vld [vmem:[#allocation5 + $0x648] sm:$0xff]  ;;  %7967 = vst [vmem:[#allocation55_spill] sm:$0xff] %v6799_v7  ;;  %v3383_v50 = vld [vmem:[#allocation5 + $0x6f8] sm:$0xff]  ;;  %v6809_v41 = vld [vmem:[#allocation5 + $0x4e0] sm:$0xff] }
 0x4ae   :  { %4498 = vmatprep.subr.bf16.mxu1 %v4497_v35  ;;  %v6730_v35 = vrot.slane %v2334_v21, %v5647_v18  ;;  %v6747_v21 = vrot.slane %v2338_v55, %v5647_v18  ;;  %v6783_v18 = vld [vmem:[#allocation5 + $0x4d8] sm:$0xff]  ;;  %v3377_v55 = vld [vmem:[#allocation5 + $0x6c8] sm:$0xff]  ;;  %v6789_v34 = vpack.c.bf16 %v3363_v5, %v3361_v25  ;;  %v6805_v5 = vpack.c.bf16 %v3366_v33, %v3364_v26  ;;  %v3380_v16 = vld [vmem:[#allocation5 + $0x6e0] sm:$0xff] }
 0x4af   :  { %v6813_v46 = vld [vmem:[#allocation5 + $0x508] sm:$0xff]  ;;  %v3979_v39 = vld [vmem:[%s7711_s5 + $0xe0] sm:$0xff]  ;;  %v6822_v26 = vpack.c.bf16 %v3370_v0, %v3368_v48  ;;  %v6826_v25 = vld [vmem:[#allocation5 + $0x518] sm:$0xff]  ;;  %7971 = vst [vmem:[#allocation59_spill] sm:$0xff] %v6832_v28  ;;  %v6836_v48 = vpack.c.bf16 %v3374_v62, %v3372_v61  ;;  %v6854_v0 = vpack.c.bf16 %v3378_v22, %v3376_v54  ;;  %v6868_v22 = vpack.c.bf16 %v3382_v47, %v3380_v16 }
 0x4b0   :  { %7968 = vst [vmem:[#allocation56_spill] sm:$0xff] %v6805_v5  ;;  %7969 = vst [vmem:[#allocation57_spill] sm:$0xff] %v6813_v46  ;;  %v3980_v53 = vld [vmem:[%s7711_s5 + $0xe8] sm:$0xff]  ;;  %v6838_v33 = vld [vmem:[#allocation5 + $0x500] sm:$0xff] }
 0x4b1   :  { %7970 = vst [vmem:[#allocation58_spill] sm:$0xff] %v6822_v26  ;;  %7972 = vst [vmem:[#allocation60_spill] sm:$0xff] %v6836_v48  ;;  %v6840_v45 = vld [vmem:[#allocation5 + $0x510] sm:$0xff]  ;;  %v6845_v26 = vpack.c.bf16 %v3379_v6, %v3377_v55  ;;  %v6849_v28 = vld [vmem:[#allocation5 + $0x528] sm:$0xff]  ;;  %v6858_v48 = vpack.c.bf16 %v3383_v50, %v3381_v60 }
 0x4b2   :  { %7973 = vst [vmem:[#allocation61_spill] sm:$0xff] %v6838_v33  ;;  %v3386_v58 = vld [vmem:[#allocation5 + $0x710] sm:$0xff]  ;;  %7974 = vst [vmem:[#allocation62_spill] sm:$0xff] %v6849_v28  ;;  %v6851_v62 = vld [vmem:[#allocation5 + $0x538] sm:$0xff] }
 0x4b3   :  { %7975 = vst [vmem:[#allocation63_spill] sm:$0xff] %v6851_v62  ;;  %7976 = vst [vmem:[#allocation64_spill] sm:$0xff] %v6858_v48  ;;  %v3391_v6 = vld [vmem:[#allocation5 + $0x738] sm:$0xff]  ;;  %v6860_v55 = vld [vmem:[#allocation5 + $0x520] sm:$0xff]  ;;  %v6875_v48 = vpack.c.bf16 %v3387_v15, %v3385_v31  ;;  %v6884_v46 = vpack.c.bf16 %v3386_v58, %v3384_v42 }
 0x4b4   :  { %7977 = vst [vmem:[#allocation65_spill] sm:$0xff] %v6860_v55  ;;  %v3981_v19 = vld [vmem:[%s7711_s5 + $0xf0] sm:$0xff]  ;;  %7978 = vst [vmem:[#allocation66_spill] sm:$0xff] %v6868_v22  ;;  %v3388_v54 = vld [vmem:[#allocation5 + $0x720] sm:$0xff] }
 0x4b5   :  { %v6872_v50 = vld [vmem:[#allocation5 + $0x530] sm:$0xff]  ;;  %7979 = vst [vmem:[#allocation67_spill] sm:$0xff] %v6875_v48  ;;  %v6879_v7 = vld [vmem:[#allocation5 + $0x548] sm:$0xff]  ;;  %v6881_v47 = vld [vmem:[#allocation5 + $0x558] sm:$0xff] }
 0x4b6   :  { %v3393_v16 = vld [vmem:[#allocation5 + $0x748] sm:$0xff]  ;;  %7980 = vst [vmem:[#allocation68_spill] sm:$0xff] %v6884_v46  ;;  %v6890_v31 = vld [vmem:[#allocation5 + $0x550] sm:$0xff]  ;;  %v3392_v58 = vld [vmem:[#allocation5 + $0x740] sm:$0xff] }
 0x543   :  { %v2248_v13 = vpop.f32.mrb[56].mxu1 }
 0x544   :  { %v2349_v5 = vmul.f32 %v6730_v35, %v2248_v13  ;;  %v2250_v51 = vpop.f32.mrb[57].mxu1  ;;  %v3389_v13 = vld [vmem:[#allocation5 + $0x728] sm:$0xff] }
 0x545   :  { %v2350_v3 = vmul.f32 %v6747_v21, %v2250_v51 }
 0x546   :  { %v2377_v61 = vadd.f32 %v2349_v5, %v6418_v10  ;;  %v3390_v5 = vld [vmem:[#allocation5 + $0x730] sm:$0xff] }
 0x547   :  { %v2378_v29 = vadd.f32 %v2350_v3, %v6409_v4  ;;  %v2254_v11 = vpop.f32.mrb[58].mxu1  ;;  %v6903_v46 = vpack.c.bf16 %v3390_v5, %v3388_v54 }
 0x548   :  { %v2434_v51 = vadd.f32 %v3979_v39, %v2377_v61  ;;  %v2351_v4 = vmul.f32 %v6730_v35, %v2254_v11  ;;  %v2256_v3 = vpop.f32.mrb[59].mxu1  ;;  %v3395_v11 = vld [vmem:[#allocation5 + $0x758] sm:$0xff]  ;;  %v6888_v61 = vld [vmem:[#allocation5 + $0x540] sm:$0xff] }
 0x549   :  { %v2435_v10 = vadd.f32 %v3980_v53, %v2378_v29  ;;  %v2352_v60 = vmul.f32 %v6747_v21, %v2256_v3  ;;  %v3982_v53 = vld [vmem:[%s7711_s5 + $0xf8] sm:$0xff]  ;;  %v6897_v29 = vpack.c.bf16 %v3391_v6, %v3389_v13  ;;  %v3394_v3 = vld [vmem:[#allocation5 + $0x750] sm:$0xff]  ;;  %7982 = vst [vmem:[#allocation70_spill] sm:$0xff] %v6903_v46  ;;  %v6908_v6 = vpack.c.bf16 %v3395_v11, %v3393_v16  ;;  %v3984_v16 = vld [vmem:[%s7711_s5 + $0x108] sm:$0xff] }
 0x54a   :  { %v2483_v15 = vmul.f32 %v6741_v32, %v2434_v51  ;;  %v2379_v17 = vadd.f32 %v2351_v4, %v6426_v27  ;;  %v4537_v27 = vpack.c.bf16 %v6881_v47, %v6879_v7  ;;  %v6917_v5 = vpack.c.bf16 %v3394_v3, %v3392_v58  ;;  %v4005_v7 = vld [vmem:[%s7711_s5 + $0x1b0] sm:$0x3f] }
 0x54b   :  { %7981 = vst [vmem:[#allocation69_spill] sm:$0xff] %v6897_v29  ;;  %v2380_v39 = vadd.f32 %v2352_v60, %v6434_v9  ;;  %v2260_v28 = vpop.f32.mrb[60].mxu1  ;;  %v2484_v62 = vmul.f32 %v6750_v44, %v2435_v10  ;;  %7983 = vst [vmem:[#allocation71_spill] sm:$0xff] %v6908_v6  ;;  %v3983_v9 = vld [vmem:[%s7711_s5 + $0x100] sm:$0xff] }
 0x54c   :  { %v2436_v4 = vadd.f32 %v3981_v19, %v2379_v17  ;;  %v2353_v33 = vmul.f32 %v6730_v35, %v2260_v28  ;;  %v2262_v13 = vpop.f32.mrb[61].mxu1  ;;  %7984 = vst [vmem:[#allocation72_spill] sm:$0xff] %v6917_v5  ;;  %v2529_v19 = vadd.f32 %v6744_v40, %v2483_v15 }
 0x54d   :  { %v2437_v55 = vadd.f32 %v3982_v53, %v2380_v39  ;;  %v2354_v60 = vmul.f32 %v6747_v21, %v2262_v13  ;;  %v2530_v54 = vadd.f32 %v6761_v36, %v2484_v62  ;;  %v3986_v13 = vld [vmem:[%s7711_s5 + $0x118] sm:$0xff] }
 0x54e   :  { %v4717_v17 = vadd.f32 %v2436_v4, %v2434_v51  ;;  %v2381_v28 = vadd.f32 %v2353_v33, %v6455_v1  ;;  %v2485_v39 = vmul.f32 %v6741_v32, %v2436_v4 }
 0x54f   :  { %v4745_v11 = vadd.f32 %v2437_v55, %v2435_v10  ;;  %v2382_v53 = vadd.f32 %v2354_v60, %v6449_v38  ;;  %v2266_v42 = vpop.f32.mrb[62].mxu1  ;;  %2773 = vmatprep.mubr.f32.mxu1 %v2530_v54  ;;  %2922 = vmatprep.mubr.f32.mxu0 %v2530_v54  ;;  %v2486_v62 = vmul.f32 %v6750_v44, %v2437_v55  ;;  %v3985_v10 = vld [vmem:[%s7711_s5 + $0x110] sm:$0xff]  ;;  %v7986_v60 = vld [vmem:[#allocation30_spill] sm:$0xff] }
 0x550   :  { %v2438_v58 = vadd.f32 %v3983_v9, %v2381_v28  ;;  %v2355_v15 = vmul.f32 %v6730_v35, %v2266_v42  ;;  %v2268_v51 = vpop.f32.mrb[63].mxu1  ;;  %2774 = vmatmul.mubr.f32.vlgmr.msra.gmra.mrb[84].mxu1 %v2529_v19  ;;  %2923 = vmatmul.mubr.f32.vlgmr.msra.gmra.mrb[84].mxu0 %v2529_v19  ;;  %v2531_v1 = vadd.f32 %v6744_v40, %v2485_v39  ;;  %v7987_v54 = vld [vmem:[#allocation28_spill] sm:$0xff] }
 0x551   :  { %v2439_v33 = vadd.f32 %v3984_v16, %v2382_v53  ;;  %v2356_v38 = vmul.f32 %v6747_v21, %v2268_v51  ;;  %v2532_v3 = vadd.f32 %v6761_v36, %v2486_v62  ;;  %v7985_v55 = vpack.c.bf16 %v6706_v24, %v6704_v8  ;;  %4564 = vmatpush1.bf16.msra.mxu0 %v6765_v63  ;;  %v7989_v8 = vld [vmem:[#allocation46_spill] sm:$0xff] }
 0x552   :  { %v4718_v42 = vadd.f32 %v4717_v17, %v2438_v58  ;;  %v2383_v4 = vadd.f32 %v2355_v15, %v6460_v59  ;;  %v2487_v9 = vmul.f32 %v6741_v32, %v2438_v58  ;;  %v7988_v19 = vpack.c.bf16 %v7986_v60, %v7987_v54  ;;  %4566 = vmatprep.subr.bf16.mxu0 %v6773_v49  ;;  %v7995_v60 = vld [vmem:[#allocation34_spill] sm:$0xff]  ;;  %v7996_v54 = vld [vmem:[#allocation32_spill] sm:$0xff] }
 0x553   :  { %4500 = vmatpush1.bf16.msra.mxu1 %v7985_v55  ;;  %v4746_v28 = vadd.f32 %v4745_v11, %v2439_v33  ;;  %v2384_v24 = vadd.f32 %v2356_v38, %v7989_v8  ;;  %v2272_v16 = vpop.f32.mrb[64].mxu1  ;;  %2779 = vmatprep.mubr.f32.mxu1 %v2532_v3  ;;  %v2488_v59 = vmul.f32 %v6750_v44, %v2439_v33  ;;  %v3987_v11 = vld [vmem:[%s7711_s5 + $0x120] sm:$0xff] }
 0x554   :  { %4502 = vmatprep.subr.bf16.mxu1 %v7988_v19  ;;  %2928 = vmatprep.mubr.f32.mxu0 %v2532_v3  ;;  %v2440_v17 = vadd.f32 %v3985_v10, %v2383_v4  ;;  %v2357_v39 = vmul.f32 %v6730_v35, %v2272_v16  ;;  %v2274_v53 = vpop.f32.mrb[65].mxu1  ;;  %v2533_v62 = vadd.f32 %v6744_v40, %v2487_v9  ;;  %v7990_v38 = vld [vmem:[#allocation31_spill] sm:$0xff]  ;;  %v7991_v3 = vld [vmem:[#allocation29_spill] sm:$0xff]  ;;  %v7993_v10 = vld [vmem:[#allocation42_spill] sm:$0xff] }
 0x555   :  { %2780 = vmatmul.mubr.f32.gmra.mrb[86].mxu1 %v2531_v1  ;;  %2929 = vmatmul.mubr.f32.gmra.mrb[86].mxu0 %v2531_v1  ;;  %v2441_v58 = vadd.f32 %v3986_v13, %v2384_v24  ;;  %v2358_v15 = vmul.f32 %v6747_v21, %v2274_v53  ;;  %v2534_v51 = vadd.f32 %v6761_v36, %v2488_v59  ;;  %v7994_v4 = vld [vmem:[#allocation48_spill] sm:$0xff]  ;;  %v7998_v24 = vld [vmem:[#allocation45_spill] sm:$0xff] }
 0x556   :  { %v7992_v33 = vpack.c.bf16 %v7990_v38, %v7991_v3  ;;  %4568 = vmatpush1.bf16.msra.mxu0 %v7993_v10  ;;  %v4719_v55 = vadd.f32 %v4718_v42, %v2440_v17  ;;  %v2385_v1 = vadd.f32 %v2357_v39, %v7994_v4  ;;  %v3988_v13 = vld [vmem:[%s7711_s5 + $0x128] sm:$0xff]  ;;  %v2489_v9 = vmul.f32 %v6741_v32, %v2440_v17 }
 0x557   :  { %v7997_v19 = vpack.c.bf16 %v7995_v60, %v7996_v54  ;;  %4570 = vmatprep.subr.bf16.mxu0 %v6789_v34  ;;  %v4747_v8 = vadd.f32 %v4746_v28, %v2441_v58  ;;  %v2386_v16 = vadd.f32 %v2358_v15, %v7998_v24  ;;  %v2278_v59 = vpop.f32.mrb[66].mxu1  ;;  %2785 = vmatprep.mubr.f32.mxu1 %v2534_v51  ;;  %v3989_v28 = vld [vmem:[%s7711_s5 + $0x130] sm:$0xff]  ;;  %v8001_v4 = vld [vmem:[#allocation47_spill] sm:$0xff] }
 0x558   :  { %4504 = vmatpush1.bf16.msra.mxu1 %v7992_v33  ;;  %2934 = vmatprep.mubr.f32.mxu0 %v2534_v51  ;;  %v2490_v42 = vmul.f32 %v6750_v44, %v2441_v58  ;;  %v2442_v39 = vadd.f32 %v3987_v11, %v2385_v1  ;;  %v2359_v53 = vmul.f32 %v6730_v35, %v2278_v59  ;;  %v2280_v38 = vpop.f32.mrb[67].mxu1  ;;  %v8000_v11 = vld [vmem:[#allocation44_spill] sm:$0xff]  ;;  %v3990_v1 = vld [vmem:[%s7711_s5 + $0x138] sm:$0xff] }
 0x559   :  { %4506 = vmatprep.subr.bf16.mxu1 %v7997_v19  ;;  %2786 = vmatmul.mubr.f32.gmra.mrb[88].mxu1 %v2533_v62  ;;  %v2535_v17 = vadd.f32 %v6744_v40, %v2489_v9  ;;  %v2443_v3 = vadd.f32 %v3988_v13, %v2386_v16  ;;  %v2360_v15 = vmul.f32 %v6747_v21, %v2280_v38  ;;  %v8002_v9 = vld [vmem:[#allocation35_spill] sm:$0xff]  ;;  %v8003_v60 = vld [vmem:[#allocation33_spill] sm:$0xff] }
 0x55a   :  { %2935 = vmatmul.mubr.f32.gmra.mrb[88].mxu0 %v2533_v62  ;;  %v2536_v33 = vadd.f32 %v6761_v36, %v2490_v42  ;;  %v7999_v58 = vpack.c.bf16 %v6723_v2, %v6721_v30  ;;  %v4720_v51 = vadd.f32 %v4719_v55, %v2442_v39  ;;  %v2387_v62 = vadd.f32 %v2359_v53, %v8001_v4  ;;  %v8005_v30 = vld [vmem:[#allocation50_spill] sm:$0xff]  ;;  %v8009_v4 = vld [vmem:[#allocation52_spill] sm:$0xff] }
 0x55b   :  { %4572 = vmatpush1.bf16.msra.mxu0 %v8000_v11  ;;  %v2491_v13 = vmul.f32 %v6741_v32, %v2442_v39  ;;  %v8004_v54 = vpack.c.bf16 %v8002_v9, %v8003_v60  ;;  %v4748_v19 = vadd.f32 %v4747_v8, %v2443_v3  ;;  %v2388_v2 = vadd.f32 %v2360_v15, %v8005_v30  ;;  %v2284_v24 = vpop.f32.mrb[68].mxu1  ;;  %v3991_v8 = vld [vmem:[%s7711_s5 + $0x140] sm:$0xff] }
 0x55c   :  { %4508 = vmatpush1.bf16.msra.mxu1 %v7999_v58  ;;  %4574 = vmatprep.subr.bf16.mxu0 %v6801_v43  ;;  %v2492_v55 = vmul.f32 %v6750_v44, %v2443_v3  ;;  %v2444_v16 = vadd.f32 %v3989_v28, %v2387_v62  ;;  %v2361_v59 = vmul.f32 %v6730_v35, %v2284_v24  ;;  %v2286_v42 = vpop.f32.mrb[69].mxu1  ;;  %v8008_v28 = vld [vmem:[#allocation56_spill] sm:$0xff]  ;;  %v8011_v9 = vld [vmem:[#allocation38_spill] sm:$0xff] }
 0x55d   :  { %4510 = vmatprep.subr.bf16.mxu1 %v8004_v54  ;;  %2791 = vmatprep.mubr.f32.mxu1 %v2536_v33  ;;  %v2537_v39 = vadd.f32 %v6744_v40, %v2491_v13  ;;  %v2445_v53 = vadd.f32 %v3990_v1, %v2388_v2  ;;  %v2362_v38 = vmul.f32 %v6747_v21, %v2286_v42  ;;  %v3992_v62 = vld [vmem:[%s7711_s5 + $0x148] sm:$0xff]  ;;  %v8010_v13 = vld [vmem:[#allocation37_spill] sm:$0xff] }
 0x55e   :  { %2940 = vmatprep.mubr.f32.mxu0 %v2536_v33  ;;  %2792 = vmatmul.mubr.f32.gmra.mrb[90].mxu1 %v2535_v17  ;;  %v2538_v15 = vadd.f32 %v6761_v36, %v2492_v55  ;;  %v8006_v33 = vld [vmem:[#allocation36_spill] sm:$0xff]  ;;  %v4721_v58 = vadd.f32 %v4720_v51, %v2444_v16  ;;  %v2493_v1 = vmul.f32 %v6741_v32, %v2444_v16 }
 0x55f   :  { %2941 = vmatmul.mubr.f32.gmra.mrb[90].mxu0 %v2535_v17  ;;  %v8007_v3 = vpack.c.bf16 %v6734_v12, %v8006_v33  ;;  %v2389_v17 = vadd.f32 %v2361_v59, %v8009_v4  ;;  %v8012_v60 = vpack.c.bf16 %v8010_v13, %v8011_v9  ;;  %v4749_v54 = vadd.f32 %v4748_v19, %v2445_v53  ;;  %v8013_v12 = vld [vmem:[#allocation49_spill] sm:$0xff]  ;;  %v2290_v2 = vpop.f32.mrb[70].mxu1  ;;  %v8020_v9 = vld [vmem:[#allocation59_spill] sm:$0xff] }
 0x560   :  { %4576 = vmatpush1.bf16.msra.mxu0 %v8008_v28  ;;  %v2390_v30 = vadd.f32 %v2362_v38, %v8013_v12  ;;  %2797 = vmatprep.mubr.f32.mxu1 %v2538_v15  ;;  %v2494_v51 = vmul.f32 %v6750_v44, %v2445_v53  ;;  %v2363_v55 = vmul.f32 %v6730_v35, %v2290_v2  ;;  %v2292_v59 = vpop.f32.mrb[71].mxu1  ;;  %v3993_v19 = vld [vmem:[%s7711_s5 + $0x150] sm:$0xff]  ;;  %v3994_v4 = vld [vmem:[%s7711_s5 + $0x158] sm:$0xff] }
 0x561   :  { %4512 = vmatpush1.bf16.msra.mxu1 %v8007_v3  ;;  %4578 = vmatprep.subr.bf16.mxu0 %v6818_v14  ;;  %v2446_v24 = vadd.f32 %v3991_v8, %v2389_v17  ;;  %v2539_v16 = vadd.f32 %v6744_v40, %v2493_v1  ;;  %v2364_v38 = vmul.f32 %v6747_v21, %v2292_v59  ;;  %v8015_v8 = vld [vmem:[#allocation58_spill] sm:$0xff]  ;;  %v8016_v3 = vld [vmem:[#allocation51_spill] sm:$0xff] }
 0x562   :  { %4514 = vmatprep.subr.bf16.mxu1 %v8012_v60  ;;  %2946 = vmatprep.mubr.f32.mxu0 %v2538_v15  ;;  %v2447_v42 = vadd.f32 %v3992_v62, %v2390_v30  ;;  %v2540_v33 = vadd.f32 %v6761_v36, %v2494_v51  ;;  %v8014_v53 = vpack.c.bf16 %v6754_v20, %v6752_v37  ;;  %v8017_v62 = vld [vmem:[#allocation40_spill] sm:$0xff]  ;;  %v8018_v1 = vld [vmem:[#allocation39_spill] sm:$0xff]  ;;  %v8021_v20 = vld [vmem:[#allocation54_spill] sm:$0xff] }
 0x563   :  { %2798 = vmatmul.mubr.f32.gmra.mrb[92].mxu1 %v2537_v39  ;;  %2947 = vmatmul.mubr.f32.gmra.mrb[92].mxu0 %v2537_v39  ;;  %v4722_v15 = vadd.f32 %v4721_v58, %v2446_v24  ;;  %v2391_v39 = vadd.f32 %v2363_v55, %v8016_v3  ;;  %v2495_v17 = vmul.f32 %v6741_v32, %v2446_v24  ;;  %v2296_v12 = vpop.f32.mrb[72].mxu1  ;;  %v3996_v3 = vld [vmem:[%s7711_s5 + $0x168] sm:$0xff] }
 0x564   :  { %4580 = vmatpush1.bf16.msra.mxu0 %v8015_v8  ;;  %v8019_v13 = vpack.c.bf16 %v8017_v62, %v8018_v1  ;;  %v4750_v60 = vadd.f32 %v4749_v54, %v2447_v42  ;;  %v2392_v37 = vadd.f32 %v2364_v38, %v8021_v20  ;;  %2803 = vmatprep.mubr.f32.mxu1 %v2540_v33  ;;  %v2298_v51 = vpop.f32.mrb[73].mxu1  ;;  %v3995_v54 = vld [vmem:[%s7711_s5 + $0x160] sm:$0xff] }
 0x565   :  { %4516 = vmatpush1.bf16.msra.mxu1 %v8014_v53  ;;  %4582 = vmatprep.subr.bf16.mxu0 %v8020_v9  ;;  %v2496_v58 = vmul.f32 %v6750_v44, %v2447_v42  ;;  %v2448_v30 = vadd.f32 %v3993_v19, %v2391_v39  ;;  %v2365_v2 = vmul.f32 %v6730_v35, %v2296_v12  ;;  %v8023_v19 = vld [vmem:[#allocation60_spill] sm:$0xff]  ;;  %v8024_v53 = vld [vmem:[#allocation11_spill] sm:$0xff] }
 0x566   :  { %4518 = vmatprep.subr.bf16.mxu1 %v8019_v13  ;;  %2952 = vmatprep.mubr.f32.mxu0 %v2540_v33  ;;  %v2541_v24 = vadd.f32 %v6744_v40, %v2495_v17  ;;  %v2449_v55 = vadd.f32 %v3994_v4, %v2392_v37  ;;  %v2366_v59 = vmul.f32 %v6747_v21, %v2298_v51 }
 0x567   :  { %2804 = vmatmul.mubr.f32.gmra.mrb[94].mxu1 %v2539_v16  ;;  %2953 = vmatmul.mubr.f32.gmra.mrb[94].mxu0 %v2539_v16  ;;  %v2542_v38 = vadd.f32 %v6761_v36, %v2496_v58  ;;  %v8022_v42 = vpack.c.bf16 %v6771_v57, %v6769_v52  ;;  %v4723_v33 = vadd.f32 %v4722_v15, %v2448_v30  ;;  %v8026_v57 = vld [vmem:[#allocation53_spill] sm:$0xff]  ;;  %v2302_v62 = vpop.f32.mrb[74].mxu1  ;;  %v8027_v58 = vld [vmem:[#allocation43_spill] sm:$0xff] }
 0x568   :  { %4584 = vmatpush1.bf16.msra.mxu0 %v8023_v19  ;;  %v2393_v16 = vadd.f32 %v2365_v2, %v8024_v53  ;;  %v2497_v39 = vmul.f32 %v6741_v32, %v2448_v30  ;;  %v8025_v4 = vpack.c.bf16 %v6783_v18, %v6781_v23  ;;  %v4751_v17 = vadd.f32 %v4750_v60, %v2449_v55  ;;  %v2304_v20 = vpop.f32.mrb[75].mxu1  ;;  %v3997_v23 = vld [vmem:[%s7711_s5 + $0x170] sm:$0xff] }
 0x569   :  { %4520 = vmatpush1.bf16.msra.mxu1 %v8022_v42  ;;  %4586 = vmatprep.subr.bf16.mxu0 %v6845_v26  ;;  %v2394_v52 = vadd.f32 %v2366_v59, %v8026_v57  ;;  %v2498_v15 = vmul.f32 %v6750_v44, %v2449_v55  ;;  %v2367_v13 = vmul.f32 %v6730_v35, %v2302_v62  ;;  %v8028_v30 = vld [vmem:[#allocation41_spill] sm:$0xff]  ;;  %v8030_v55 = vld [vmem:[#allocation18_spill] sm:$0xff] }
 0x56a   :  { %4522 = vmatprep.subr.bf16.mxu1 %v8025_v4  ;;  %2809 = vmatprep.mubr.f32.mxu1 %v2542_v38  ;;  %v2450_v1 = vadd.f32 %v3995_v54, %v2393_v16  ;;  %v2543_v37 = vadd.f32 %v6744_v40, %v2497_v39  ;;  %v2368_v60 = vmul.f32 %v6747_v21, %v2304_v20  ;;  %v3998_v54 = vld [vmem:[%s7711_s5 + $0x178] sm:$0xff]  ;;  %v8034_v16 = vld [vmem:[#allocation64_spill] sm:$0xff] }
 0x56b   :  { %2958 = vmatprep.mubr.f32.mxu0 %v2542_v38  ;;  %2810 = vmatmul.mubr.f32.gmra.mrb[96].mxu1 %v2541_v24  ;;  %v2451_v18 = vadd.f32 %v3996_v3, %v2394_v52  ;;  %v2544_v12 = vadd.f32 %v6761_v36, %v2498_v15  ;;  %v8029_v2 = vpack.c.bf16 %v8027_v58, %v8028_v30  ;;  %v8031_v38 = vld [vmem:[#allocation55_spill] sm:$0xff]  ;;  %v8032_v42 = vld [vmem:[#allocation14_spill] sm:$0xff]  ;;  %v8035_v39 = vld [vmem:[#allocation17_spill] sm:$0xff]  ;;  %v2308_v57 = vpop.f32.mrb[76].mxu1 }
 0x56c   :  { %2959 = vmatmul.mubr.f32.gmra.mrb[96].mxu0 %v2541_v24  ;;  %v4724_v51 = vadd.f32 %v4723_v33, %v2450_v1  ;;  %v2395_v24 = vadd.f32 %v2367_v13, %v8030_v55  ;;  %v2499_v59 = vmul.f32 %v6741_v32, %v2450_v1  ;;  %v8033_v53 = vpack.c.bf16 %v8031_v38, %v8032_v42  ;;  %v2310_v15 = vpop.f32.mrb[77].mxu1  ;;  %v4000_v58 = vld [vmem:[%s7711_s5 + $0x188] sm:$0xff] }
 0x56d   :  { %4524 = vmatpush1.bf16.msra.mxu1 %v8029_v2  ;;  %4588 = vmatpush1.bf16.msra.mxu0 %v6854_v0  ;;  %v4752_v3 = vadd.f32 %v4751_v17, %v2451_v18  ;;  %v2396_v4 = vadd.f32 %v2368_v60, %v8035_v39  ;;  %v2500_v33 = vmul.f32 %v6750_v44, %v2451_v18  ;;  %v3999_v17 = vld [vmem:[%s7711_s5 + $0x180] sm:$0xff]  ;;  %v8038_v2 = vld [vmem:[#allocation57_spill] sm:$0xff] }
 0x56e   :  { %4526 = vmatprep.subr.bf16.mxu1 %v8033_v53  ;;  %4590 = vmatprep.subr.bf16.mxu0 %v8034_v16  ;;  %v2452_v52 = vadd.f32 %v3997_v23, %v2395_v24  ;;  %v2369_v62 = vmul.f32 %v6730_v35, %v2308_v57  ;;  %v2545_v1 = vadd.f32 %v6744_v40, %v2499_v59  ;;  %v8041_v57 = vld [vmem:[#allocation61_spill] sm:$0xff] }
 0x56f   :  { %2815 = vmatprep.mubr.f32.mxu1 %v2544_v12  ;;  %2964 = vmatprep.mubr.f32.mxu0 %v2544_v12  ;;  %v2453_v13 = vadd.f32 %v3998_v54, %v2396_v4  ;;  %v2370_v20 = vmul.f32 %v6747_v21, %v2310_v15  ;;  %v2546_v60 = vadd.f32 %v6761_v36, %v2500_v33  ;;  %v8037_v12 = vld [vmem:[#allocation20_spill] sm:$0xff]  ;;  %v2314_v54 = vpop.f32.mrb[78].mxu1  ;;  %v8044_v15 = vld [vmem:[#allocation22_spill] sm:$0xff] }
 0x570   :  { %2816 = vmatmul.mubr.f32.gmra.mrb[98].mxu1 %v2543_v37  ;;  %2965 = vmatmul.mubr.f32.gmra.mrb[98].mxu0 %v2543_v37  ;;  %v8036_v18 = vpack.c.bf16 %v6811_v56, %v6809_v41  ;;  %v4725_v23 = vadd.f32 %v4724_v51, %v2452_v52  ;;  %v2397_v37 = vadd.f32 %v2369_v62, %v8037_v12  ;;  %v8040_v56 = vld [vmem:[#allocation19_spill] sm:$0xff]  ;;  %v2316_v42 = vpop.f32.mrb[79].mxu1 }
 0x571   :  { %4592 = vmatpush1.bf16.msra.mxu0 %v6868_v22  ;;  %v2501_v30 = vmul.f32 %v6741_v32, %v2452_v52  ;;  %v8039_v55 = vpack.c.bf16 %v6826_v25, %v8038_v2  ;;  %v4753_v24 = vadd.f32 %v4752_v3, %v2453_v13  ;;  %v2398_v41 = vadd.f32 %v2370_v20, %v8040_v56  ;;  %v4001_v3 = vld [vmem:[%s7711_s5 + $0x190] sm:$0xff]  ;;  %v8045_v20 = vld [vmem:[#allocation63_spill] sm:$0xff] }
 0x572   :  { %4528 = vmatpush1.bf16.msra.mxu1 %v8036_v18  ;;  %4594 = vmatprep.subr.bf16.mxu0 %v6875_v48  ;;  %v2502_v51 = vmul.f32 %v6750_v44, %v2453_v13  ;;  %v2454_v59 = vadd.f32 %v3999_v17, %v2397_v37  ;;  %v2371_v38 = vmul.f32 %v6730_v35, %v2314_v54  ;;  %v8043_v52 = vld [vmem:[#allocation68_spill] sm:$0xff]  ;;  %v4002_v13 = vld [vmem:[%s7711_s5 + $0x198] sm:$0xff] }
 0x573   :  { %4530 = vmatprep.subr.bf16.mxu1 %v8039_v55  ;;  %2821 = vmatprep.mubr.f32.mxu1 %v2546_v60  ;;  %v2547_v53 = vadd.f32 %v6744_v40, %v2501_v30  ;;  %v2455_v25 = vadd.f32 %v4000_v58, %v2398_v41  ;;  %v2372_v39 = vmul.f32 %v6747_v21, %v2316_v42  ;;  %v2320_v58 = vpop.f32.mrb[80].mxu1 }
 0x574   :  { %2970 = vmatprep.mubr.f32.mxu0 %v2546_v60  ;;  %2822 = vmatmul.mubr.f32.gmra.mrb[100].mxu1 %v2545_v1  ;;  %v2548_v4 = vadd.f32 %v6761_v36, %v2502_v51  ;;  %v8042_v33 = vpack.c.bf16 %v6840_v45, %v8041_v57  ;;  %v4726_v62 = vadd.f32 %v4725_v23, %v2454_v59  ;;  %v8046_v60 = vld [vmem:[#allocation62_spill] sm:$0xff]  ;;  %v8048_v45 = vld [vmem:[#allocation21_spill] sm:$0xff]  ;;  %v2322_v55 = vpop.f32.mrb[81].mxu1 }
 0x575   :  { %2971 = vmatmul.mubr.f32.gmra.mrb[100].mxu0 %v2545_v1  ;;  %v2399_v1 = vadd.f32 %v2371_v38, %v8044_v15  ;;  %v2503_v17 = vmul.f32 %v6741_v32, %v2454_v59  ;;  %v8047_v18 = vpack.c.bf16 %v8045_v20, %v8046_v60  ;;  %v4754_v12 = vadd.f32 %v4753_v24, %v2455_v25  ;;  %v4003_v24 = vld [vmem:[%s7711_s5 + $0x1a0] sm:$0xff]  ;;  %v8049_v59 = vld [vmem:[#allocation65_spill] sm:$0xff] }
 0x576   :  { %4532 = vmatpush1.bf16.msra.mxu1 %v8042_v33  ;;  %4596 = vmatpush1.bf16.msra.mxu0 %v8043_v52  ;;  %v2400_v37 = vadd.f32 %v2372_v39, %v8048_v45  ;;  %v2504_v23 = vmul.f32 %v6750_v44, %v2455_v25  ;;  %v2373_v2 = vmul.f32 %v6730_v35, %v2320_v58  ;;  %v8051_v25 = vld [vmem:[#allocation24_spill] sm:$0xff]  ;;  %v8057_v58 = vld [vmem:[#allocation25_spill] sm:$0xff] }
 0x577   :  { %4534 = vmatprep.subr.bf16.mxu1 %v8047_v18  ;;  %4598 = vmatprep.subr.bf16.mxu0 %v6897_v29  ;;  %v2456_v30 = vadd.f32 %v4001_v3, %v2399_v1  ;;  %v2549_v56 = vadd.f32 %v6744_v40, %v2503_v17  ;;  %v2374_v54 = vmul.f32 %v6747_v21, %v2322_v55  ;;  %v4004_v3 = vld [vmem:[%s7711_s5 + $0x1a8] sm:$0xff]  ;;  %v2326_v33 = vpop.f32.mrb[82].mxu1 }
 0x578   :  { %2827 = vmatprep.mubr.f32.mxu1 %v2548_v4  ;;  %2976 = vmatprep.mubr.f32.mxu0 %v2548_v4  ;;  %v2457_v41 = vadd.f32 %v4002_v13, %v2400_v37  ;;  %v2550_v51 = vadd.f32 %v6761_v36, %v2504_v23  ;;  %v8050_v38 = vpack.c.bf16 %v6872_v50, %v8049_v59  ;;  %v8052_v50 = vld [vmem:[#allocation23_spill] sm:$0xff]  ;;  %v2328_v13 = vpop.f32.mrb[83].mxu1  ;;  %v3335_v59 = vld [vmem:[#allocation5 + $0x578] sm:$0xff] }
 0x579   :  { %2828 = vmatmul.mubr.f32.gmra.mrb[102].mxu1 %v2547_v53  ;;  %2977 = vmatmul.mubr.f32.gmra.mrb[102].mxu0 %v2547_v53  ;;  %v4727_v42 = vadd.f32 %v4726_v62, %v2456_v30  ;;  %v2401_v53 = vadd.f32 %v2373_v2, %v8051_v25  ;;  %v2505_v39 = vmul.f32 %v6741_v32, %v2456_v30  ;;  %v3332_v25 = vld [vmem:[#allocation5 + $0x560] sm:$0xff] }
 0x57a   :  { %4536 = vmatpush1.bf16.msra.mxu1 %v8050_v38  ;;  %4600 = vmatpush1.bf16.msra.mxu0 %v6903_v46  ;;  %v4755_v4 = vadd.f32 %v4754_v12, %v2457_v41  ;;  %v2402_v57 = vadd.f32 %v2374_v54, %v8052_v50  ;;  %v2506_v62 = vmul.f32 %v6750_v44, %v2457_v41  ;;  %v4006_v12 = vld [vmem:[%s7711_s5 + $0x1b8] sm:$0x3f]  ;;  %v3397_v38 = vld [vmem:[#allocation5 + $0x768] sm:$0xff] }
 0x57b   :  { %4538 = vmatprep.subr.bf16.mxu1 %v4537_v27  ;;  %4602 = vmatprep.subr.bf16.mxu0 %v6908_v6  ;;  %v2458_v15 = vadd.f32 %v4003_v24, %v2401_v53  ;;  %v2375_v1 = vmul.f32 %v6730_v35, %v2326_v33  ;;  %v2376_v47 = vmul.f32 %v6747_v21, %v2328_v13  ;;  %v8055_v35 = vld [vmem:[#allocation26_spill] sm:$0xff]  ;;  %v3334_v53 = vld [vmem:[#allocation5 + $0x570] sm:$0xff] }
 0x57c   :  { %2833 = vmatprep.mubr.f32.mxu1 %v2550_v51  ;;  %2982 = vmatprep.mubr.f32.mxu0 %v2550_v51  ;;  %v2459_v17 = vadd.f32 %v4004_v3, %v2402_v57  ;;  %v2552_v27 = vadd.f32 %v6761_v36, %v2506_v62  ;;  %v8053_v20 = vpack.c.bf16 %v6890_v31, %v6888_v61  ;;  %v3333_v51 = vld [vmem:[#allocation5 + $0x568] sm:$0xff]  ;;  %v3339_v50 = vld [vmem:[#allocation5 + $0x598] sm:$0xff] }
 0x57d   :  { %2834 = vmatmul.mubr.f32.gmra.mrb[104].mxu1 %v2549_v56  ;;  %2983 = vmatmul.mubr.f32.gmra.mrb[104].mxu0 %v2549_v56  ;;  %v7157_v60 = vadd.f32 %v4727_v42, %v2458_v15  ;;  %v2403_v18 = vadd.f32 %v2375_v1, %v8055_v35  ;;  %v2551_v45 = vadd.f32 %v6744_v40, %v2505_v39  ;;  %v3396_v39 = vld [vmem:[#allocation5 + $0x760] sm:$0xff]  ;;  %v3401_v57 = vld [vmem:[#allocation5 + $0x788] sm:$0xff]  ;;  %v3403_v62 = vld [vmem:[#allocation5 + $0x798] sm:$0xff] }
 0x57e   :  { %4540 = vmatpush1.bf16.msra.mxu1 %v8053_v20  ;;  %4604 = vmatpush1.bf16.msra.mxu0 %v6917_v5  ;;  %v2507_v21 = vmul.f32 %v6741_v32, %v2458_v15  ;;  %v7165_v37 = vadd.f32 %v4755_v4, %v2459_v17  ;;  %v2404_v23 = vadd.f32 %v2376_v47, %v8057_v58  ;;  %v3398_v4 = vld [vmem:[#allocation5 + $0x770] sm:$0xff]  ;;  %v3336_v15 = vld [vmem:[#allocation5 + $0x580] sm:$0xff]  ;;  %v3341_v20 = vld [vmem:[#allocation5 + $0x5a8] sm:$0xff] }
 0x57f   :  { %8054 = vst [vmem:[#allocation30_spill] sm:$0xff] %v7157_v60  ;;  %2839 = vmatprep.mubr.f32.mxu1 %v2552_v27  ;;  %2988 = vmatprep.mubr.f32.mxu0 %v2552_v27  ;;  %v2508_v61 = vmul.f32 %v6750_v44, %v2459_v17  ;;  %v7169_v31 = vadd.f32 %v4005_v7, %v2403_v18  ;;  %v3338_v1 = vld [vmem:[#allocation5 + $0x590] sm:$0xff]  ;;  %v3400_v7 = vld [vmem:[#allocation5 + $0x780] sm:$0xff]  ;;  %v3343_v35 = vld [vmem:[#allocation5 + $0x5b8] sm:$0xff] }
 0x580   :  { %8056 = vst [vmem:[#allocation28_spill] sm:$0xff] %v7165_v37  ;;  %v7171_v30 = vadd.f32 %v4006_v12, %v2404_v23  ;;  %v2553_v55 = vadd.f32 %v6744_v40, %v2507_v21  ;;  %v4541_v42 = vpack.c.bf16 %v3335_v59, %v3333_v51  ;;  %v7187_v13 = vpack.c.bf16 %v3403_v62, %v3401_v57  ;;  %v3402_v47 = vld [vmem:[#allocation5 + $0x790] sm:$0xff]  ;;  %v3405_v18 = vld [vmem:[#allocation5 + $0x7a8] sm:$0xff]  ;;  %v3340_v21 = vld [vmem:[#allocation5 + $0x5a0] sm:$0xff] }
 0x581   :  { %8058 = vst [vmem:[#allocation46_spill] sm:$0xff] %v7169_v31  ;;  %2840 = vmatmul.mubr.f32.gmra.mrb[106].mxu1 %v2551_v45  ;;  %2989 = vmatmul.mubr.f32.gmra.mrb[106].mxu0 %v2551_v45  ;;  %v2554_v2 = vadd.f32 %v6761_v36, %v2508_v61  ;;  %v2509_v56 = vmul.f32 %v6741_v32, %v7169_v31  ;;  %v3399_v32 = vld [vmem:[#allocation5 + $0x778] sm:$0xff]  ;;  %v3342_v58 = vld [vmem:[#allocation5 + $0x5b0] sm:$0xff]  ;;  %v3348_v62 = vld [vmem:[#allocation5 + $0x5e0] sm:$0xff] }
 0x582   :  { %8059 = vst [vmem:[#allocation31_spill] sm:$0xff] %v7171_v30  ;;  %v2510_v41 = vmul.f32 %v6750_v44, %v7171_v30  ;;  %v7181_v3 = vpack.c.bf16 %v3399_v32, %v3397_v38  ;;  %v4543_v44 = vpack.c.bf16 %v3334_v53, %v3332_v25  ;;  %4542 = vmatprep.subr.bf16.mxu1 %v4541_v42  ;;  %8062 = vst [vmem:[#allocation48_spill] sm:$0xff] %v7187_v13  ;;  %v3407_v45 = vld [vmem:[#allocation5 + $0x7b8] sm:$0xff]  ;;  %v3344_v38 = vld [vmem:[#allocation5 + $0x5c0] sm:$0xff] }
 0x583   :  { %2845 = vmatprep.mubr.f32.mxu1 %v2554_v2  ;;  %2994 = vmatprep.mubr.f32.mxu0 %v2554_v2  ;;  %v2555_v54 = vadd.f32 %v6744_v40, %v2509_v56  ;;  %v3337_v40 = vld [vmem:[#allocation5 + $0x588] sm:$0xff]  ;;  %v4547_v17 = vpack.c.bf16 %v3338_v1, %v3336_v15  ;;  %v7189_v27 = vpack.c.bf16 %v3402_v47, %v3400_v7  ;;  %v3404_v2 = vld [vmem:[#allocation5 + $0x7a0] sm:$0xff]  ;;  %v3411_v59 = vld [vmem:[#allocation5 + $0x7d8] sm:$0xff] }
 0x584   :  { %v2556_v24 = vadd.f32 %v6761_v36, %v2510_v41  ;;  %8060 = vst [vmem:[#allocation29_spill] sm:$0xff] %v7181_v3  ;;  %v7183_v36 = vpack.c.bf16 %v3398_v4, %v3396_v39  ;;  %4606 = vmatprep.subr.bf16.mxu0 %v7181_v3  ;;  %4544 = vmatpush1.bf16.msra.mxu1 %v4543_v44  ;;  %v3345_v41 = vld [vmem:[#allocation5 + $0x5c8] sm:$0xff]  ;;  %v3346_v42 = vld [vmem:[#allocation5 + $0x5d0] sm:$0xff]  ;;  %v3408_v53 = vld [vmem:[#allocation5 + $0x7c0] sm:$0xff] }
 0x585   :  { %2846 = vmatmul.mubr.f32.gmra.mrb[108].mxu1 %v2553_v55  ;;  %2995 = vmatmul.mubr.f32.gmra.mrb[108].mxu0 %v2553_v55  ;;  %v4545_v33 = vpack.c.bf16 %v3339_v50, %v3337_v40  ;;  %8063 = vst [vmem:[#allocation34_spill] sm:$0xff] %v7189_v27  ;;  %v4549_v12 = vpack.c.bf16 %v3343_v35, %v3341_v20  ;;  %v3406_v55 = vld [vmem:[#allocation5 + $0x7b0] sm:$0xff]  ;;  %v3349_v4 = vld [vmem:[#allocation5 + $0x5e8] sm:$0xff]  ;;  %v3351_v40 = vld [vmem:[#allocation5 + $0x5f8] sm:$0xff] }
 0x586   :  { %2851 = vmatprep.mubr.f32.mxu1 %v2556_v24  ;;  %3000 = vmatprep.mubr.f32.mxu0 %v2556_v24  ;;  %8061 = vst [vmem:[#allocation42_spill] sm:$0xff] %v7183_v36  ;;  %v7193_v23 = vpack.c.bf16 %v3407_v45, %v3405_v18  ;;  %v4551_v61 = vpack.c.bf16 %v3342_v58, %v3340_v21  ;;  %v3347_v24 = vld [vmem:[#allocation5 + $0x5d8] sm:$0xff]  ;;  %v3410_v44 = vld [vmem:[#allocation5 + $0x7d0] sm:$0xff]  ;;  %v3413_v50 = vld [vmem:[#allocation5 + $0x7e8] sm:$0xff] }
 0x587   :  { %4608 = vmatpush1.bf16.msra.mxu0 %v7183_v36  ;;  %4546 = vmatprep.subr.bf16.mxu1 %v4545_v33  ;;  %v7195_v56 = vpack.c.bf16 %v3406_v55, %v3404_v2  ;;  %v4553_v51 = vpack.c.bf16 %v3347_v24, %v3345_v41  ;;  %v4555_v25 = vpack.c.bf16 %v3346_v42, %v3344_v38  ;;  %v3415_v33 = vld [vmem:[#allocation5 + $0x7f8] sm:$0xff]  ;;  %v3350_v15 = vld [vmem:[#allocation5 + $0x5f0] sm:$0xff]  ;;  %v3412_v7 = vld [vmem:[#allocation5 + $0x7e0] sm:$0xff] }
 0x588   :  { %4610 = vmatprep.subr.bf16.mxu0 %v7187_v13  ;;  %4548 = vmatpush1.bf16.msra.mxu1 %v4547_v17  ;;  %8064 = vst [vmem:[#allocation32_spill] sm:$0xff] %v7193_v23  ;;  %v7201_v39 = vpack.c.bf16 %v3410_v44, %v3408_v53  ;;  %v4557_v57 = vpack.c.bf16 %v3351_v40, %v3349_v4  ;;  %v3414_v47 = vld [vmem:[#allocation5 + $0x7f0] sm:$0xff]  ;;  %v8070_v35 = vld [vmem:[#allocation27_spill] sm:$0xff] }
 0x589   :  { %2852 = vmatmul.mubr.f32.gmra.mrb[110].mxu1 %v2555_v54  ;;  %3001 = vmatmul.mubr.f32.gmra.mrb[110].mxu0 %v2555_v54  ;;  %8065 = vst [vmem:[#allocation45_spill] sm:$0xff] %v7195_v56  ;;  %v3409_v54 = vld [vmem:[#allocation5 + $0x7c8] sm:$0xff]  ;;  %v7205_v1 = vpack.c.bf16 %v3415_v33, %v3413_v50  ;;  %v4559_v17 = vpack.c.bf16 %v3350_v15, %v3348_v62  ;;  %v4008_v18 = vld [vmem:[%s7714_s8 + $0x4] sm:$0xf] }
 0x58a   :  { %4550 = vmatprep.subr.bf16.mxu1 %v4549_v12  ;;  %v7199_v32 = vpack.c.bf16 %v3411_v59, %v3409_v54  ;;  %8067 = vst [vmem:[#allocation47_spill] sm:$0xff] %v7201_v39  ;;  %v7207_v20 = vpack.c.bf16 %v3414_v47, %v3412_v7  ;;  %v8071_v12 = vld [vmem:[#allocation13_spill] sm:$0xff]  ;;  %v8073_v41 = vld [vmem:[#allocation16_spill] sm:$0xff] }
 0x58b   :  { %4612 = vmatpush1.bf16.msra.mxu0 %v7189_v27  ;;  %8068 = vst [vmem:[#allocation35_spill] sm:$0xff] %v7205_v1  ;;  %v7216_v45 = vrot.slane %v4008_v18, %v8071_v12  ;;  %v7222_v24 = vrot.slane %v4008_v18, %v8073_v41 }
 0x58c   :  { %4614 = vmatprep.subr.bf16.mxu0 %v7193_v23  ;;  %4552 = vmatpush1.bf16.msra.mxu1 %v4551_v61  ;;  %8066 = vst [vmem:[#allocation44_spill] sm:$0xff] %v7199_v32  ;;  %8069 = vst [vmem:[#allocation33_spill] sm:$0xff] %v7207_v20  ;;  %v8072_v61 = vld [vmem:[#allocation12_spill] sm:$0xff] }
 0x58d   :  { %4554 = vmatprep.subr.bf16.mxu1 %v4553_v51  ;;  %v7219_v2 = vrot.slane %v4008_v18, %v8072_v61  ;;  %v8074_v51 = vld [vmem:[#allocation15_spill] sm:$0xff] }
 0x58e   :  { %v7225_v59 = vrot.slane %v4008_v18, %v8074_v51 }
 0x58f   :  { %4616 = vmatpush1.bf16.msra.mxu0 %v7195_v56 }
 0x590   :  { %4618 = vmatprep.subr.bf16.mxu0 %v7199_v32  ;;  %4556 = vmatpush1.bf16.msra.mxu1 %v4555_v25 }
 0x591   :  { %4558 = vmatprep.subr.bf16.mxu1 %v4557_v57 }
 0x593   :  { %4620 = vmatpush1.bf16.msra.mxu0 %v7201_v39 }
 0x594   :  { %4622 = vmatprep.subr.bf16.mxu0 %v7205_v1  ;;  %4560 = vmatpush1.bf16.msra.mxu1 %v4559_v17 }
 0x595   :  { %4657 = vmatprep.subr.bf16.mxu1 %v8070_v35 }
 0x597   :  { %4624 = vmatpush1.bf16.msra.mxu0 %v7207_v20 }
 0x623   :  { %v2775_v21 = vpop.f32.mrb[84].mxu1  ;;  %v2924_v58 = vpop.f32.mrb[84].mxu0 }
 0x624   :  { %v2777_v55 = vpop.f32.mrb[85].mxu1  ;;  %v2926_v54 = vpop.f32.mrb[85].mxu0  ;;  %v7228_v38 = vadd.f32 %v2775_v21, %v7216_v45  ;;  %v7237_v4 = vadd.f32 %v2924_v58, %v7225_v59 }
 0x625   :  { %v7231_v42 = vadd.f32 %v2777_v55, %v7219_v2  ;;  %v7234_v25 = vadd.f32 %v2926_v54, %v7222_v24 }
 0x626   :  { %v3063_v57 = vmul.f32 0.70710677, %v7228_v38  ;;  %v3065_v7 = vmul.f32 0.70710677, %v7237_v4 }
 0x627   :  { %v3064_v33 = vmul.f32 0.70710677, %v7231_v42  ;;  %v3066_v17 = vmul.f32 0.70710677, %v7234_v25 }
 0x628   :  { %v2781_v53 = vpop.f32.mrb[86].mxu1  ;;  %v2930_v44 = vpop.f32.mrb[86].mxu0  ;;  %4972 = verf.f32 %v3063_v57 }
 0x629   :  { %v2783_v40 = vpop.f32.mrb[87].mxu1  ;;  %v2932_v50 = vpop.f32.mrb[87].mxu0  ;;  %4974 = verf.f32 %v3064_v33  ;;  %v7259_v57 = vadd.f32 %v2930_v44, %v7225_v59 }
 0x62a   :  { %v7244_v47 = vadd.f32 %v2783_v40, %v7219_v2  ;;  %v7247_v21 = vadd.f32 %v2932_v50, %v7222_v24  ;;  %4976 = verf.f32 %v3066_v17  ;;  %v7255_v40 = vadd.f32 %v2781_v53, %v7216_v45 }
 0x62b   :  { %4978 = verf.f32 %v3065_v7  ;;  %v3069_v44 = vmul.f32 0.70710677, %v7259_v57 }
 0x62c   :  { %v2787_v62 = vpop.f32.mrb[88].mxu1  ;;  %v3068_v54 = vmul.f32 0.70710677, %v7244_v47  ;;  %v3070_v30 = vmul.f32 0.70710677, %v7247_v21 }
 0x62d   :  { %v2936_v15 = vpop.f32.mrb[88].mxu0  ;;  %v2789_v35 = vpop.f32.mrb[89].mxu1  ;;  %v3067_v37 = vmul.f32 0.70710677, %v7255_v40  ;;  %v7292_v23 = vadd.f32 %v2787_v62, %v7216_v45  ;;  %v3008_v62 = vmul.f32 0.5, %v7231_v42 }
 0x62e   :  { %v2938_v18 = vpop.f32.mrb[89].mxu0  ;;  %v7266_v31 = vadd.f32 %v2789_v35, %v7219_v2  ;;  %4980 = verf.f32 %v3068_v54  ;;  %v7299_v5 = vadd.f32 %v2936_v15, %v7225_v59 }
 0x62f   :  { %v7273_v53 = vadd.f32 %v2938_v18, %v7222_v24  ;;  %4982 = verf.f32 %v3070_v30  ;;  %v3071_v15 = vmul.f32 0.70710677, %v7292_v23 }
 0x630   :  { %v3072_v35 = vmul.f32 0.70710677, %v7266_v31  ;;  %4984 = verf.f32 %v3067_v37  ;;  %v3073_v42 = vmul.f32 0.70710677, %v7299_v5 }
 0x631   :  { %v7249_v58 = vpop.f32.mrb[90].mxu1  ;;  %v3074_v18 = vmul.f32 0.70710677, %v7273_v53  ;;  %4986 = verf.f32 %v3069_v44 }
 0x632   :  { %v7251_v55 = vpop.f32.mrb[90].mxu0  ;;  %v2795_v41 = vpop.f32.mrb[91].mxu1  ;;  %4988 = verf.f32 %v3072_v35  ;;  %v3010_v35 = vmul.f32 0.5, %v7234_v25 }
 0x633   :  { %v2944_v51 = vpop.f32.mrb[91].mxu0  ;;  %v4973_v12 = vpop.eup %4972  ;;  %4990 = verf.f32 %v3074_v18  ;;  %v7302_v6 = vadd.f32 %v2795_v41, %v7219_v2 }
 0x634   :  { %v4975_v54 = vpop.eup %4974  ;;  %v3175_v37 = vadd.f32 1.0, %v4973_v12  ;;  %v7312_v12 = vadd.f32 %v2944_v51, %v7222_v24  ;;  %4992 = verf.f32 %v3071_v15 }
 0x635   :  { %v4977_v39 = vpop.eup %4976  ;;  %v3176_v36 = vadd.f32 1.0, %v4975_v54  ;;  %v3007_v54 = vmul.f32 0.5, %v7228_v38  ;;  %v3076_v38 = vmul.f32 0.70710677, %v7302_v6  ;;  %4994 = verf.f32 %v3073_v42 }
 0x636   :  { %v7261_v50 = vpop.f32.mrb[92].mxu1  ;;  %v7263_v33 = vpop.f32.mrb[92].mxu0  ;;  %v3178_v3 = vadd.f32 1.0, %v4977_v39  ;;  %v3009_v39 = vmul.f32 0.5, %v7237_v4 }
 0x637   :  { %v7268_v17 = vpop.f32.mrb[93].mxu1  ;;  %v7270_v7 = vpop.f32.mrb[93].mxu0  ;;  %v3232_v18 = vmul.f32 %v3176_v36, %v3008_v62  ;;  %4996 = verf.f32 %v3076_v38 }
 0x638   :  { %v4979_v32 = vpop.eup %4978  ;;  %v3234_v25 = vmul.f32 %v3178_v3, %v3010_v35 }
 0x639   :  { %v3177_v44 = vadd.f32 1.0, %v4979_v32  ;;  %v4981_v46 = vpop.eup %4980  ;;  %3493 = vmatprep.mubr.f32.mxu1 %v3232_v18  ;;  %v3016_v18 = vmul.f32 0.5, %v7266_v31 }
 0x63a   :  { %v7277_v60 = vpop.f32.mrb[94].mxu1  ;;  %v7279_v61 = vpop.f32.mrb[94].mxu0  ;;  %v3180_v4 = vadd.f32 1.0, %v4981_v46  ;;  %3642 = vmatprep.mubr.f32.mxu0 %v3234_v25  ;;  %v3012_v46 = vmul.f32 0.5, %v7244_v47  ;;  %v7341_v47 = vadd.f32 %v7249_v58, %v7216_v45  ;;  %v7354_v58 = vadd.f32 %v7268_v17, %v7219_v2 }
 0x63b   :  { %v7282_v20 = vpop.f32.mrb[95].mxu1  ;;  %v7284_v1 = vpop.f32.mrb[95].mxu0  ;;  %v3233_v22 = vmul.f32 %v3177_v44, %v3009_v39  ;;  %v7361_v25 = vadd.f32 %v7270_v7, %v7222_v24 }
 0x63c   :  { %v4983_v52 = vpop.eup %4982  ;;  %v3236_v35 = vmul.f32 %v3180_v4, %v3012_v46  ;;  %v3075_v38 = vmul.f32 0.70710677, %v7341_v47 }
 0x63d   :  { %3643 = vmatmul.mubr.f32.vlgmr.msra.gmra.mrb[112].mxu0 %v3233_v22 }
 0x63e   :  { %v7287_v30 = vpop.f32.mrb[96].mxu1 }
 0x63f   :  { %v7289_v56 = vpop.f32.mrb[96].mxu0  ;;  %v7294_v27 = vpop.f32.mrb[97].mxu1 }
 0x640   :  { %8075 = vst [vmem:[#allocation50_spill] sm:$0xff] %v7289_v56  ;;  %v7296_v13 = vpop.f32.mrb[97].mxu0  ;;  %v3182_v56 = vadd.f32 1.0, %v4983_v52  ;;  %v3014_v52 = vmul.f32 0.5, %v7247_v21 }
 0x643   :  { %v7306_v29 = vpop.f32.mrb[98].mxu1  ;;  %v7314_v32 = vpop.f32.mrb[98].mxu0 }
 0x644   :  { %8076 = vst [vmem:[#allocation36_spill] sm:$0xff] %v7306_v29  ;;  %8077 = vst [vmem:[#allocation56_spill] sm:$0xff] %v7314_v32  ;;  %v7316_v41 = vpop.f32.mrb[99].mxu1  ;;  %v7319_v48 = vpop.f32.mrb[99].mxu0  ;;  %v3231_v29 = vmul.f32 %v3175_v37, %v3007_v54 }
 0x645   :  { %8078 = vst [vmem:[#allocation52_spill] sm:$0xff] %v7316_v41  ;;  %v4985_v32 = vpop.eup %4984  ;;  %v3078_v41 = vmul.f32 0.70710677, %v7312_v12 }
 0x646   :  { %3494 = vmatmul.mubr.f32.vlgmr.msra.gmra.mrb[112].mxu1 %v3231_v29  ;;  %v4987_v37 = vpop.eup %4986  ;;  %v3238_v29 = vmul.f32 %v3182_v56, %v3014_v52  ;;  %v3179_v39 = vadd.f32 1.0, %v4985_v32  ;;  %v3011_v56 = vmul.f32 0.5, %v7255_v40  ;;  %v3018_v40 = vmul.f32 0.5, %v7273_v53 }
 0x647   :  { %v7322_v51 = vpop.f32.mrb[100].mxu1  ;;  %4673 = vmatpush1.bf16.msra.mxu1 %v6765_v63  ;;  %v4989_v44 = vpop.eup %4988  ;;  %4998 = verf.f32 %v3078_v41  ;;  %v3181_v15 = vadd.f32 1.0, %v4987_v37  ;;  %3499 = vmatprep.mubr.f32.mxu1 %v3236_v35  ;;  %v3013_v41 = vmul.f32 0.5, %v7259_v57  ;;  %v3082_v53 = vmul.f32 0.70710677, %v7361_v25 }
 0x648   :  { %v7324_v16 = vpop.f32.mrb[100].mxu0  ;;  %v7327_v3 = vpop.f32.mrb[101].mxu1  ;;  %4658 = vmatprep.subr.bf16.mxu1 %v6773_v49  ;;  %v3184_v42 = vadd.f32 1.0, %v4989_v44  ;;  %v7349_v49 = vadd.f32 %v7251_v55, %v7225_v59  ;;  %3648 = vmatprep.mubr.f32.mxu0 %v3238_v29  ;;  %v3235_v17 = vmul.f32 %v3179_v39, %v3011_v56  ;;  %5000 = verf.f32 %v3075_v38 }
 0x649   :  { %v7329_v36 = vpop.f32.mrb[101].mxu0  ;;  %v4991_v62 = vpop.eup %4990  ;;  %v3237_v31 = vmul.f32 %v3181_v15, %v3013_v41  ;;  %v7387_v56 = vadd.f32 %v7261_v50, %v7216_v45  ;;  %v3015_v38 = vmul.f32 0.5, %v7292_v23 }
 0x64a   :  { %v3186_v32 = vadd.f32 1.0, %v4991_v62  ;;  %v3077_v57 = vmul.f32 0.70710677, %v7349_v49  ;;  %v3240_v37 = vmul.f32 %v3184_v42, %v3016_v18  ;;  %v4993_v7 = vpop.eup %4992 }
 0x64b   :  { %4674 = vmatpush1.bf16.msra.mxu1 %v7993_v10  ;;  %v4995_v44 = vpop.eup %4994  ;;  %3649 = vmatmul.mubr.f32.gmra.mrb[112].mxu0 %v3237_v31  ;;  %v3183_v42 = vadd.f32 1.0, %v4993_v7  ;;  %v3020_v31 = vmul.f32 0.5, %v7302_v6  ;;  %v7409_v7 = vadd.f32 %v7282_v20, %v7219_v2  ;;  %v3079_v23 = vmul.f32 0.70710677, %v7387_v56 }
 0x64c   :  { %v7335_v22 = vpop.f32.mrb[102].mxu1  ;;  %v7337_v54 = vpop.f32.mrb[102].mxu0  ;;  %4659 = vmatprep.subr.bf16.mxu1 %v6789_v34  ;;  %v3080_v34 = vmul.f32 0.70710677, %v7354_v58  ;;  %v3242_v52 = vmul.f32 %v3186_v32, %v3018_v40  ;;  %5002 = verf.f32 %v3077_v57  ;;  %v3185_v41 = vadd.f32 1.0, %v4995_v44 }
 0x64d   :  { %v7343_v21 = vpop.f32.mrb[103].mxu1  ;;  %v7345_v63 = vpop.f32.mrb[103].mxu0  ;;  %v3017_v57 = vmul.f32 0.5, %v7299_v5 }
 0x64e   :  { %3500 = vmatmul.mubr.f32.gmra.mrb[112].mxu1 %v3235_v17  ;;  %v4997_v29 = vpop.eup %4996  ;;  %3654 = vmatprep.mubr.f32.mxu0 %v3242_v52  ;;  %5004 = verf.f32 %v3080_v34  ;;  %v3022_v34 = vmul.f32 0.5, %v7312_v12  ;;  %v7430_v12 = vadd.f32 %v7277_v60, %v7216_v45 }
 0x64f   :  { %3505 = vmatprep.mubr.f32.mxu1 %v3240_v37  ;;  %4675 = vmatpush1.bf16.msra.mxu1 %v8000_v11  ;;  %v3188_v18 = vadd.f32 1.0, %v4997_v29  ;;  %5006 = verf.f32 %v3082_v53  ;;  %v3241_v52 = vmul.f32 %v3185_v41, %v3017_v57  ;;  %v3084_v29 = vmul.f32 0.70710677, %v7409_v7 }
 0x650   :  { %v7364_v55 = vpop.f32.mrb[104].mxu1  ;;  %v7368_v4 = vpop.f32.mrb[104].mxu0  ;;  %4660 = vmatprep.subr.bf16.mxu1 %v6801_v43  ;;  %v7398_v43 = vadd.f32 %v7263_v33, %v7225_v59  ;;  %v3239_v33 = vmul.f32 %v3183_v42, %v3015_v38  ;;  %5008 = verf.f32 %v3079_v23  ;;  %v3083_v60 = vmul.f32 0.70710677, %v7430_v12 }
 0x651   :  { %v7370_v10 = vpop.f32.mrb[105].mxu1  ;;  %v7373_v46 = vpop.f32.mrb[105].mxu0  ;;  %v3244_v5 = vmul.f32 %v3188_v18, %v3020_v31  ;;  %v7436_v18 = vadd.f32 %v7294_v27, %v7219_v2  ;;  %v7441_v31 = vadd.f32 %v7279_v61, %v7225_v59  ;;  %v3019_v61 = vmul.f32 0.5, %v7341_v47 }
 0x652   :  { %v4999_v15 = vpop.eup %4998  ;;  %v3081_v20 = vmul.f32 0.70710677, %v7398_v43 }
 0x653   :  { %4676 = vmatpush1.bf16.msra.mxu1 %v8008_v28  ;;  %v3190_v37 = vadd.f32 1.0, %v4999_v15  ;;  %v7415_v28 = vadd.f32 %v7284_v1, %v7222_v24  ;;  %3655 = vmatmul.mubr.f32.gmra.mrb[112].mxu0 %v3241_v52  ;;  %v5001_v15 = vpop.eup %5000  ;;  %v3085_v52 = vmul.f32 0.70710677, %v7441_v31 }
 0x654   :  { %v7377_v62 = vpop.f32.mrb[106].mxu1  ;;  %v7379_v35 = vpop.f32.mrb[106].mxu0  ;;  %4661 = vmatprep.subr.bf16.mxu1 %v6818_v14  ;;  %5010 = verf.f32 %v3081_v20  ;;  %v3187_v27 = vadd.f32 1.0, %v5001_v15 }
 0x655   :  { %v7382_v39 = vpop.f32.mrb[107].mxu1  ;;  %v7389_v32 = vpop.f32.mrb[107].mxu0  ;;  %v3246_v1 = vmul.f32 %v3190_v37, %v3022_v34  ;;  %v3086_v42 = vmul.f32 0.70710677, %v7415_v28  ;;  %5012 = verf.f32 %v3084_v29  ;;  %v3021_v34 = vmul.f32 0.5, %v7349_v49 }
 0x656   :  { %3506 = vmatmul.mubr.f32.gmra.mrb[112].mxu1 %v3239_v33  ;;  %v5003_v41 = vpop.eup %5002  ;;  %v3243_v49 = vmul.f32 %v3187_v27, %v3019_v61 }
 0x657   :  { %3511 = vmatprep.mubr.f32.mxu1 %v3244_v5  ;;  %4677 = vmatpush1.bf16.msra.mxu1 %v8015_v8  ;;  %5014 = verf.f32 %v3086_v42  ;;  %v7446_v8 = vadd.f32 %v7296_v13, %v7222_v24  ;;  %v3189_v37 = vadd.f32 1.0, %v5003_v41  ;;  %v7456_v13 = vadd.f32 %v7287_v30, %v7216_v45 }
 0x658   :  { %v7391_v40 = vpop.f32.mrb[108].mxu1  ;;  %v7393_v11 = vpop.f32.mrb[108].mxu0  ;;  %3660 = vmatprep.mubr.f32.mxu0 %v3246_v1  ;;  %4662 = vmatprep.subr.bf16.mxu1 %v8020_v9  ;;  %v3088_v9 = vmul.f32 0.70710677, %v7436_v18  ;;  %v3026_v5 = vmul.f32 0.5, %v7361_v25  ;;  %5016 = verf.f32 %v3083_v60  ;;  %v8080_v1 = vld [vmem:[#allocation64_spill] sm:$0xff] }
 0x659   :  { %v7401_v50 = vpop.f32.mrb[109].mxu1  ;;  %v7403_v17 = vpop.f32.mrb[109].mxu0  ;;  %v3090_v20 = vmul.f32 0.70710677, %v7446_v8  ;;  %v3245_v29 = vmul.f32 %v3189_v37, %v3021_v34  ;;  %v8081_v25 = vld [vmem:[#allocation50_spill] sm:$0xff] }
 0x65a   :  { %v5005_v38 = vpop.eup %5004  ;;  %5018 = verf.f32 %v3088_v9  ;;  %v7470_v41 = vadd.f32 %v8081_v25, %v7225_v59  ;;  %v8082_v37 = vld [vmem:[#allocation66_spill] sm:$0xff]  ;;  %v8087_v25 = vld [vmem:[#allocation56_spill] sm:$0xff] }
 0x65b   :  { %v5007_v57 = vpop.eup %5006  ;;  %4678 = vmatpush1.bf16.msra.mxu1 %v8023_v19  ;;  %v3192_v23 = vadd.f32 1.0, %v5005_v38  ;;  %v3024_v19 = vmul.f32 0.5, %v7354_v58  ;;  %5020 = verf.f32 %v3085_v52  ;;  %v3087_v58 = vmul.f32 0.70710677, %v7456_v13  ;;  %3661 = vmatmul.mubr.f32.gmra.mrb[112].mxu0 %v3245_v29  ;;  %v8085_v29 = vld [vmem:[#allocation68_spill] sm:$0xff] }
 0x65c   :  { %v7418_v44 = vpop.f32.mrb[110].mxu1  ;;  %v7420_v6 = vpop.f32.mrb[110].mxu0  ;;  %4663 = vmatprep.subr.bf16.mxu1 %v6845_v26  ;;  %v3194_v33 = vadd.f32 1.0, %v5007_v57  ;;  %v8079_v26 = vld [vmem:[#allocation52_spill] sm:$0xff]  ;;  %5022 = verf.f32 %v3090_v20  ;;  %v7474_v38 = vadd.f32 %v7319_v48, %v7222_v24  ;;  %v3089_v61 = vmul.f32 0.70710677, %v7470_v41 }
 0x65d   :  { %v7423_v53 = vpop.f32.mrb[111].mxu1  ;;  %v7425_v14 = vpop.f32.mrb[111].mxu0  ;;  %v7464_v47 = vadd.f32 %v8079_v26, %v7219_v2  ;;  %v3248_v15 = vmul.f32 %v3192_v23, %v3024_v19  ;;  %v8083_v23 = vld [vmem:[#allocation67_spill] sm:$0xff]  ;;  %5024 = verf.f32 %v3087_v58  ;;  %v8084_v48 = vld [vmem:[#allocation36_spill] sm:$0xff]  ;;  %v7488_v26 = vadd.f32 %v7327_v3, %v7219_v2 }
 0x65e   :  { %v5009_v30 = vpop.eup %5008  ;;  %v3250_v42 = vmul.f32 %v3194_v33, %v3026_v5  ;;  %3512 = vmatmul.mubr.f32.gmra.mrb[112].mxu1 %v3243_v49  ;;  %v3023_v33 = vmul.f32 0.5, %v7387_v56  ;;  %v7483_v19 = vadd.f32 %v8084_v48, %v7216_v45  ;;  %v3094_v5 = vmul.f32 0.70710677, %v7474_v38 }
 0x65f   :  { %4679 = vmatpush1.bf16.msra.mxu1 %v6854_v0  ;;  %v5011_v0 = vpop.eup %5010  ;;  %3517 = vmatprep.mubr.f32.mxu1 %v3248_v15  ;;  %v3191_v60 = vadd.f32 1.0, %v5009_v30  ;;  %v3092_v27 = vmul.f32 0.70710677, %v7464_v47  ;;  %v3028_v30 = vmul.f32 0.5, %v7409_v7  ;;  %v8086_v15 = vld [vmem:[#allocation69_spill] sm:$0xff]  ;;  %v3030_v58 = vmul.f32 0.5, %v7415_v28 }
 0x660   :  { %4664 = vmatprep.subr.bf16.mxu1 %v8080_v1  ;;  %3666 = vmatprep.mubr.f32.mxu0 %v3250_v42  ;;  %v5013_v57 = vpop.eup %5012  ;;  %v3193_v34 = vadd.f32 1.0, %v5011_v0  ;;  %v3025_v1 = vmul.f32 0.5, %v7398_v43  ;;  %v7497_v0 = vadd.f32 %v8087_v25, %v7225_v59  ;;  %v3091_v3 = vmul.f32 0.70710677, %v7483_v19 }
 0x661   :  { %v5015_v9 = vpop.eup %5014  ;;  %v3196_v52 = vadd.f32 1.0, %v5013_v57  ;;  %5026 = verf.f32 %v3092_v27  ;;  %v3247_v49 = vmul.f32 %v3191_v60, %v3023_v33  ;;  %v3096_v7 = vmul.f32 0.70710677, %v7488_v26 }
 0x662   :  { %v3198_v20 = vadd.f32 1.0, %v5015_v9  ;;  %v5017_v56 = vpop.eup %5016  ;;  %5028 = verf.f32 %v3089_v61  ;;  %v3249_v57 = vmul.f32 %v3193_v34, %v3025_v1  ;;  %v8088_v9 = vld [vmem:[#allocation70_spill] sm:$0xff]  ;;  %v3027_v33 = vmul.f32 0.5, %v7430_v12 }
 0x663   :  { %4680 = vmatpush1.bf16.msra.mxu1 %v8082_v37  ;;  %5030 = verf.f32 %v3094_v5  ;;  %v3252_v60 = vmul.f32 %v3196_v52, %v3028_v30  ;;  %v3195_v43 = vadd.f32 1.0, %v5017_v56  ;;  %v3093_v61 = vmul.f32 0.70710677, %v7497_v0  ;;  %v8089_v5 = vld [vmem:[#allocation71_spill] sm:$0xff]  ;;  %v8090_v56 = vld [vmem:[#allocation72_spill] sm:$0xff]  ;;  %v8091_v30 = vld [vmem:[#allocation29_spill] sm:$0xff] }
 0x664   :  { %4665 = vmatprep.subr.bf16.mxu1 %v8083_v23  ;;  %v5019_v42 = vpop.eup %5018  ;;  %v3254_v37 = vmul.f32 %v3198_v20, %v3030_v58  ;;  %3667 = vmatmul.mubr.f32.gmra.mrb[112].mxu0 %v3249_v57  ;;  %v3032_v34 = vmul.f32 0.5, %v7436_v18  ;;  %5032 = verf.f32 %v3091_v3  ;;  %v7507_v52 = vadd.f32 %v7322_v51, %v7216_v45 }
 0x665   :  { %v5021_v27 = vpop.eup %5020  ;;  %v3200_v28 = vadd.f32 1.0, %v5019_v42  ;;  %5034 = verf.f32 %v3096_v7  ;;  %v3251_v12 = vmul.f32 %v3195_v43, %v3027_v33  ;;  %v3029_v1 = vmul.f32 0.5, %v7441_v31  ;;  %v8093_v43 = vld [vmem:[#allocation48_spill] sm:$0xff] }
 0x666   :  { %3518 = vmatmul.mubr.f32.gmra.mrb[112].mxu1 %v3247_v49  ;;  %v5023_v23 = vpop.eup %5022  ;;  %3672 = vmatprep.mubr.f32.mxu0 %v3254_v37  ;;  %v3197_v48 = vadd.f32 1.0, %v5021_v27  ;;  %v3034_v51 = vmul.f32 0.5, %v7446_v8  ;;  %5036 = verf.f32 %v3093_v61  ;;  %v3095_v42 = vmul.f32 0.70710677, %v7507_v52  ;;  %v8094_v61 = vld [vmem:[#allocation34_spill] sm:$0xff] }
 0x667   :  { %4681 = vmatpush1.bf16.msra.mxu1 %v8085_v29  ;;  %3523 = vmatprep.mubr.f32.mxu1 %v3252_v60  ;;  %v5025_v20 = vpop.eup %5024  ;;  %v3202_v49 = vadd.f32 1.0, %v5023_v23  ;;  %v7512_v29 = vadd.f32 %v7343_v21, %v7219_v2  ;;  %v3256_v18 = vmul.f32 %v3200_v28, %v3032_v34  ;;  %v8092_v60 = vld [vmem:[#allocation42_spill] sm:$0xff]  ;;  %v3031_v8 = vmul.f32 0.5, %v7456_v13 }
 0x668   :  { %4666 = vmatprep.subr.bf16.mxu1 %v8086_v15  ;;  %v3253_v58 = vmul.f32 %v3197_v48, %v3029_v1  ;;  %v3199_v21 = vadd.f32 1.0, %v5025_v20  ;;  %v3036_v37 = vmul.f32 0.5, %v7464_v47  ;;  %5038 = verf.f32 %v3095_v42 }
 0x669   :  { %v3100_v3 = vmul.f32 0.70710677, %v7512_v29  ;;  %v3258_v57 = vmul.f32 %v3202_v49, %v3034_v51  ;;  %v2838_v28 = vadd.f32 %v7370_v10, %v7219_v2  ;;  %v3033_v13 = vmul.f32 0.5, %v7470_v41  ;;  %v8097_v41 = vld [vmem:[#allocation44_spill] sm:$0xff] }
 0x66a   :  { %v3255_v33 = vmul.f32 %v3199_v21, %v3031_v8  ;;  %v3038_v20 = vmul.f32 0.5, %v7474_v38  ;;  %v3040_v38 = vmul.f32 0.5, %v7488_v26  ;;  %v2836_v42 = vadd.f32 %v7364_v55, %v7216_v45  ;;  %v8098_v21 = vld [vmem:[#allocation47_spill] sm:$0xff]  ;;  %v8100_v8 = vld [vmem:[#allocation33_spill] sm:$0xff] }
 0x66b   :  { %4682 = vmatpush1.bf16.msra.mxu1 %v8088_v9  ;;  %v5027_v15 = vpop.eup %5026  ;;  %v7526_v9 = vadd.f32 %v7335_v22, %v7216_v45  ;;  %5040 = verf.f32 %v3100_v3  ;;  %v3104_v10 = vmul.f32 0.70710677, %v2838_v28 }
 0x66c   :  { %4667 = vmatprep.subr.bf16.mxu1 %v8089_v5  ;;  %v5029_v25 = vpop.eup %5028  ;;  %v3204_v27 = vadd.f32 1.0, %v5027_v15  ;;  %3673 = vmatmul.mubr.f32.gmra.mrb[112].mxu0 %v3253_v58  ;;  %v8095_v5 = vld [vmem:[#allocation32_spill] sm:$0xff]  ;;  %v3035_v15 = vmul.f32 0.5, %v7483_v19  ;;  %v2844_v58 = vadd.f32 %v7382_v39, %v7219_v2  ;;  %v8099_v19 = vld [vmem:[#allocation35_spill] sm:$0xff]  ;;  %v3103_v26 = vmul.f32 0.70710677, %v2836_v42 }
 0x66d   :  { %v5031_v31 = vpop.eup %5030  ;;  %3678 = vmatprep.mubr.f32.mxu0 %v3258_v57  ;;  %v3201_v7 = vadd.f32 1.0, %v5029_v25  ;;  %v3099_v22 = vmul.f32 0.70710677, %v7526_v9  ;;  %v3037_v57 = vmul.f32 0.5, %v7497_v0  ;;  %v3039_v39 = vmul.f32 0.5, %v7507_v52 }
 0x66e   :  { %3524 = vmatmul.mubr.f32.gmra.mrb[112].mxu1 %v3251_v12  ;;  %v3206_v23 = vadd.f32 1.0, %v5031_v31  ;;  %v5033_v48 = vpop.eup %5032  ;;  %v3260_v34 = vmul.f32 %v3204_v27, %v3036_v37  ;;  %v3108_v55 = vmul.f32 0.70710677, %v2844_v58  ;;  %v3044_v37 = vmul.f32 0.5, %v7512_v29 }
 0x66f   :  { %4683 = vmatpush1.bf16.msra.mxu1 %v8090_v56  ;;  %3529 = vmatprep.mubr.f32.mxu1 %v3256_v18  ;;  %v5035_v47 = vpop.eup %5034  ;;  %v3257_v49 = vmul.f32 %v3201_v7, %v3033_v13  ;;  %v3203_v56 = vadd.f32 1.0, %v5033_v48  ;;  %v8096_v18 = vld [vmem:[#allocation45_spill] sm:$0xff]  ;;  %5042 = verf.f32 %v3099_v22  ;;  %v2842_v0 = vadd.f32 %v7377_v62, %v7216_v45 }
 0x670   :  { %4668 = vmatprep.subr.bf16.mxu1 %v8091_v30  ;;  %v5037_v12 = vpop.eup %5036  ;;  %v3262_v1 = vmul.f32 %v3206_v23, %v3038_v20  ;;  %v3208_v30 = vadd.f32 1.0, %v5035_v47  ;;  %5044 = verf.f32 %v3104_v10  ;;  %v2850_v23 = vadd.f32 %v7401_v50, %v7219_v2 }
 0x671   :  { %v3205_v51 = vadd.f32 1.0, %v5037_v12  ;;  %v3259_v25 = vmul.f32 %v3203_v56, %v3035_v15  ;;  %5046 = verf.f32 %v3103_v26  ;;  %v3043_v29 = vmul.f32 0.5, %v7526_v9 }
 0x672   :  { %v5039_v3 = vpop.eup %5038  ;;  %5048 = verf.f32 %v3108_v55  ;;  %v3112_v47 = vmul.f32 0.70710677, %v2850_v23  ;;  %v3048_v20 = vmul.f32 0.5, %v2838_v28  ;;  %v2848_v62 = vadd.f32 %v7391_v40, %v7216_v45 }
 0x673   :  { %4684 = vmatpush1.bf16.msra.mxu1 %v8092_v60  ;;  %v3264_v60 = vmul.f32 %v3208_v30, %v3040_v38  ;;  %v3261_v27 = vmul.f32 %v3205_v51, %v3037_v57  ;;  %v2856_v50 = vadd.f32 %v7423_v53, %v7219_v2  ;;  %v2975_v9 = vadd.f32 %v7329_v36, %v7222_v24 }
 0x674   :  { %4669 = vmatprep.subr.bf16.mxu1 %v8093_v43  ;;  %3679 = vmatmul.mubr.f32.gmra.mrb[112].mxu0 %v3257_v49  ;;  %v3207_v43 = vadd.f32 1.0, %v5039_v3  ;;  %v3111_v10 = vmul.f32 0.70710677, %v2848_v62  ;;  %v3047_v30 = vmul.f32 0.5, %v2836_v42  ;;  %v2973_v2 = vadd.f32 %v7324_v16, %v7225_v59 }
 0x675   :  { %3684 = vmatprep.mubr.f32.mxu0 %v3262_v1  ;;  %v5041_v31 = vpop.eup %5040  ;;  %v2854_v1 = vadd.f32 %v7418_v44, %v7216_v45  ;;  %v3052_v53 = vmul.f32 0.5, %v2844_v58  ;;  %v3098_v15 = vmul.f32 0.70710677, %v2975_v9  ;;  %v2981_v51 = vadd.f32 %v7345_v63, %v7222_v24 }
 0x676   :  { %3530 = vmatmul.mubr.f32.gmra.mrb[112].mxu1 %v3255_v33  ;;  %v3212_v7 = vadd.f32 1.0, %v5041_v31  ;;  %v3263_v33 = vmul.f32 %v3207_v43, %v3039_v39  ;;  %v3097_v36 = vmul.f32 0.70710677, %v2973_v2  ;;  %v3051_v58 = vmul.f32 0.5, %v2842_v0 }
 0x677   :  { %4685 = vmatpush1.bf16.msra.mxu1 %v8094_v61  ;;  %3535 = vmatprep.mubr.f32.mxu1 %v3260_v34  ;;  %v3107_v34 = vmul.f32 0.70710677, %v2842_v0  ;;  %v3102_v42 = vmul.f32 0.70710677, %v2981_v51  ;;  %v2979_v3 = vadd.f32 %v7337_v54, %v7225_v59  ;;  %v3056_v57 = vmul.f32 0.5, %v2850_v23 }
 0x678   :  { %4670 = vmatprep.subr.bf16.mxu1 %v8095_v5  ;;  %v3268_v48 = vmul.f32 %v3212_v7, %v3044_v37  ;;  %v2987_v63 = vadd.f32 %v7373_v46, %v7222_v24  ;;  %v3055_v37 = vmul.f32 0.5, %v2848_v62  ;;  %v2985_v54 = vadd.f32 %v7368_v4, %v7225_v59 }
 0x679   :  { %v5043_v61 = vpop.eup %5042  ;;  %5050 = verf.f32 %v3107_v34  ;;  %v3060_v0 = vmul.f32 0.5, %v2856_v50  ;;  %v2993_v46 = vadd.f32 %v7389_v32, %v7222_v24  ;;  %v2991_v32 = vadd.f32 %v7379_v35, %v7225_v59 }
 0x67a   :  { %v5045_v13 = vpop.eup %5044  ;;  %v3211_v5 = vadd.f32 1.0, %v5043_v61  ;;  %5052 = verf.f32 %v3112_v47  ;;  %v3106_v43 = vmul.f32 0.70710677, %v2987_v63  ;;  %v3042_v47 = vmul.f32 0.5, %v2975_v9 }
 0x67b   :  { %4686 = vmatpush1.bf16.msra.mxu1 %v8096_v18  ;;  %v3216_v52 = vadd.f32 1.0, %v5045_v13  ;;  %v5047_v49 = vpop.eup %5046  ;;  %v3116_v18 = vmul.f32 0.70710677, %v2856_v50  ;;  %5054 = verf.f32 %v3111_v10  ;;  %v2997_v35 = vadd.f32 %v7393_v11, %v7225_v59 }
 0x67c   :  { %4671 = vmatprep.subr.bf16.mxu1 %v8097_v41  ;;  %3685 = vmatmul.mubr.f32.gmra.mrb[112].mxu0 %v3261_v27  ;;  %v3267_v22 = vmul.f32 %v3211_v5, %v3043_v29  ;;  %v5049_v56 = vpop.eup %5048  ;;  %v3215_v28 = vadd.f32 1.0, %v5047_v49  ;;  %v3115_v41 = vmul.f32 0.70710677, %v2854_v1  ;;  %v3101_v27 = vmul.f32 0.70710677, %v2979_v3 }
 0x67d   :  { %v3272_v12 = vmul.f32 %v3216_v52, %v3048_v20  ;;  %v3220_v40 = vadd.f32 1.0, %v5049_v56  ;;  %5056 = verf.f32 %v3116_v18  ;;  %v3059_v5 = vmul.f32 0.5, %v2854_v1 }
 0x67e   :  { %3536 = vmatmul.mubr.f32.gmra.mrb[112].mxu1 %v3259_v25  ;;  %v3271_v45 = vmul.f32 %v3215_v28, %v3047_v30  ;;  %5058 = verf.f32 %v3115_v41  ;;  %v3105_v52 = vmul.f32 0.70710677, %v2985_v54  ;;  %v3110_v20 = vmul.f32 0.70710677, %v2993_v46 }
 0x67f   :  { %4687 = vmatpush1.bf16.msra.mxu1 %v8098_v21  ;;  %3541 = vmatprep.mubr.f32.mxu1 %v3264_v60  ;;  %v3276_v38 = vmul.f32 %v3220_v40, %v3052_v53  ;;  %5060 = verf.f32 %v3098_v15  ;;  %v3046_v49 = vmul.f32 0.5, %v2981_v51  ;;  %v2999_v56 = vadd.f32 %v7403_v17, %v7222_v24 }
 0x680   :  { %4672 = vmatprep.subr.bf16.mxu1 %v8099_v19  ;;  %5062 = verf.f32 %v3097_v36  ;;  %v3109_v28 = vmul.f32 0.70710677, %v2991_v32  ;;  %v3050_v53 = vmul.f32 0.5, %v2987_v63  ;;  %v3005_v41 = vadd.f32 %v7425_v14, %v7222_v24 }
 0x681   :  { %5064 = verf.f32 %v3102_v42  ;;  %v3114_v40 = vmul.f32 0.70710677, %v2999_v56 }
 0x682   :  { %5066 = verf.f32 %v3101_v27  ;;  %v3118_v36 = vmul.f32 0.70710677, %v3005_v41 }
 0x683   :  { %4688 = vmatpush1.bf16.msra.mxu1 %v8100_v8  ;;  %v5051_v44 = vpop.eup %5050  ;;  %5068 = verf.f32 %v3106_v43 }
 0x684   :  { %v5053_v25 = vpop.eup %5052  ;;  %v3219_v21 = vadd.f32 1.0, %v5051_v44  ;;  %5070 = verf.f32 %v3105_v52  ;;  %v3113_v44 = vmul.f32 0.70710677, %v2997_v35 }
 0x685   :  { %v3224_v16 = vadd.f32 1.0, %v5053_v25  ;;  %v5055_v19 = vpop.eup %5054  ;;  %5072 = verf.f32 %v3110_v20  ;;  %v3800_v20 = vld [vmem:[%s7717_s11 + $0x18] sm:$0xff] }
 0x686   :  { %3542 = vmatmul.mubr.f32.gmra.mrb[112].mxu1 %v3263_v33  ;;  %v3275_v60 = vmul.f32 %v3219_v21, %v3051_v58  ;;  %v3223_v55 = vadd.f32 1.0, %v5055_v19  ;;  %5074 = verf.f32 %v3109_v28  ;;  %v3049_v21 = vmul.f32 0.5, %v2985_v54  ;;  %v3804_v28 = vld [vmem:[%s7717_s11 + $0x38] sm:$0xff] }
 0x687   :  { %3547 = vmatprep.mubr.f32.mxu1 %v3268_v48  ;;  %v3280_v31 = vmul.f32 %v3224_v16, %v3056_v57  ;;  %v5057_v26 = vpop.eup %5056  ;;  %5076 = verf.f32 %v3114_v40  ;;  %v3054_v16 = vmul.f32 0.5, %v2993_v46  ;;  %v3821_v40 = vld [vmem:[%s7717_s11 + $0xc0] sm:$0xff] }
 0x688   :  { %v5059_v8 = vpop.eup %5058  ;;  %v3228_v7 = vadd.f32 1.0, %v5057_v26  ;;  %v3279_v33 = vmul.f32 %v3223_v55, %v3055_v37  ;;  %5078 = verf.f32 %v3113_v44  ;;  %v3808_v44 = vld [vmem:[%s7717_s11 + $0x58] sm:$0xff] }
 0x689   :  { %v5061_v39 = vpop.eup %5060  ;;  %v3227_v23 = vadd.f32 1.0, %v5059_v8  ;;  %5080 = verf.f32 %v3118_v36  ;;  %v3057_v8 = vmul.f32 0.5, %v2997_v35  ;;  %v3806_v35 = vld [vmem:[%s7717_s11 + $0x48] sm:$0xff] }
 0x68a   :  { %v5063_v61 = vpop.eup %5062  ;;  %v3210_v48 = vadd.f32 1.0, %v5061_v39  ;;  %v3284_v13 = vmul.f32 %v3228_v7, %v3060_v0  ;;  %v3062_v7 = vmul.f32 0.5, %v3005_v41 }
 0x68b   :  { %v5065_v34 = vpop.eup %5064  ;;  %v3209_v29 = vadd.f32 1.0, %v5063_v61  ;;  %v3283_v62 = vmul.f32 %v3227_v23, %v3059_v5  ;;  %v3813_v23 = vld [vmem:[%s7717_s11 + $0x80] sm:$0xff]  ;;  %v3816_v5 = vld [vmem:[%s7717_s11 + $0x98] sm:$0xff] }
 0x68c   :  { %v3214_v4 = vadd.f32 1.0, %v5065_v34  ;;  %v3266_v50 = vmul.f32 %v3210_v48, %v3042_v47  ;;  %v5067_v10 = vpop.eup %5066  ;;  %v3797_v61 = vld [vmem:[%s7717_s11] sm:$0xff]  ;;  %v3815_v34 = vld [vmem:[%s7717_s11 + $0x90] sm:$0xff] }
 0x68d   :  { %v5069_v9 = vpop.eup %5068  ;;  %v3213_v18 = vadd.f32 1.0, %v5067_v10  ;;  %v4629_v52 = vpack.c.bf16 %v3816_v5, %v3815_v34 }
 0x68e   :  { %3548 = vmatmul.mubr.f32.gmra.mrb[112].mxu1 %v3267_v22  ;;  %v3041_v22 = vmul.f32 0.5, %v2973_v2  ;;  %v3270_v1 = vmul.f32 %v3214_v4, %v3046_v49  ;;  %v3218_v30 = vadd.f32 1.0, %v5069_v9  ;;  %v3045_v2 = vmul.f32 0.5, %v2979_v3  ;;  %v5071_v15 = vpop.eup %5070  ;;  %v3818_v4 = vld [vmem:[%s7717_s11 + $0xa8] sm:$0xff]  ;;  %v3801_v49 = vld [vmem:[%s7717_s11 + $0x20] sm:$0xff]  ;;  %v3803_v9 = vld [vmem:[%s7717_s11 + $0x30] sm:$0xff] }
 0x68f   :  { %3553 = vmatprep.mubr.f32.mxu1 %v3272_v12  ;;  %v3217_v25 = vadd.f32 1.0, %v5071_v15  ;;  %v3824_v15 = vld [vmem:[%s7717_s11 + $0xd8] sm:$0xff] }
 0x690   :  { %v3265_v12 = vmul.f32 %v3209_v29, %v3041_v22  ;;  %v3269_v17 = vmul.f32 %v3213_v18, %v3045_v2  ;;  %v3274_v51 = vmul.f32 %v3218_v30, %v3050_v53  ;;  %v3799_v29 = vld [vmem:[%s7717_s11 + $0x10] sm:$0xff]  ;;  %v4639_v18 = vpack.c.bf16 %v3804_v28, %v3803_v9  ;;  %v3822_v30 = vld [vmem:[%s7717_s11 + $0xc8] sm:$0xff]  ;;  %v3805_v2 = vld [vmem:[%s7717_s11 + $0x40] sm:$0xff] }
 0x691   :  { %v3273_v58 = vmul.f32 %v3217_v25, %v3049_v21  ;;  %v4641_v53 = vpack.c.bf16 %v3822_v30, %v3821_v40  ;;  %v4643_v41 = vpack.c.bf16 %v3806_v35, %v3805_v2  ;;  %v3826_v25 = vld [vmem:[%s7717_s11 + $0xe8] sm:$0xff]  ;;  %v3809_v21 = vld [vmem:[%s7717_s11 + $0x60] sm:$0xff] }
 0x696   :  { %3554 = vmatmul.mubr.f32.gmra.mrb[112].mxu1 %v3271_v45  ;;  %v5073_v45 = vpop.eup %5072 }
 0x697   :  { %3559 = vmatprep.mubr.f32.mxu1 %v3276_v38  ;;  %v3003_v38 = vadd.f32 %v7420_v6, %v7225_v59  ;;  %v3222_v42 = vadd.f32 1.0, %v5073_v45  ;;  %v5075_v24 = vpop.eup %5074  ;;  %v3058_v59 = vmul.f32 0.5, %v2999_v56  ;;  %v3820_v56 = vld [vmem:[%s7717_s11 + $0xb8] sm:$0xff] }
 0x698   :  { %v5077_v3 = vpop.eup %5076  ;;  %v3221_v57 = vadd.f32 1.0, %v5075_v24 }
 0x699   :  { %v3117_v11 = vmul.f32 0.70710677, %v3003_v38  ;;  %v3278_v14 = vmul.f32 %v3222_v42, %v3054_v16  ;;  %v3226_v63 = vadd.f32 1.0, %v5077_v3  ;;  %v5079_v19 = vpop.eup %5078  ;;  %v3061_v0 = vmul.f32 0.5, %v3003_v38  ;;  %v3825_v38 = vld [vmem:[%s7717_s11 + $0xe0] sm:$0xff]  ;;  %v3810_v16 = vld [vmem:[%s7717_s11 + $0x68] sm:$0xff] }
 0x69a   :  { %v5081_v26 = vpop.eup %5080  ;;  %v3225_v27 = vadd.f32 1.0, %v5079_v19  ;;  %v4649_v42 = vpack.c.bf16 %v3826_v25, %v3825_v38  ;;  %v4651_v24 = vpack.c.bf16 %v3810_v16, %v3809_v21  ;;  %v3811_v3 = vld [vmem:[%s7717_s11 + $0x70] sm:$0xff]  ;;  %v8106_v38 = vld [vmem:[#allocation31_spill] sm:$0xff] }
 0x69b   :  { %5082 = verf.f32 %v3117_v11  ;;  %v3230_v55 = vadd.f32 1.0, %v5081_v26  ;;  %v3827_v11 = vld [vmem:[%s7717_s11 + $0xf0] sm:$0xff]  ;;  %v8103_v26 = vld [vmem:[#allocation30_spill] sm:$0xff] }
 0x69c   :  { %v3281_v37 = vmul.f32 %v3225_v27, %v3057_v8  ;;  %v8102_v19 = vld [vmem:[#allocation12_spill] sm:$0xff] }
 0x69d   :  { %v3286_v54 = vmul.f32 %v3230_v55, %v3062_v7 }
 0x69e   :  { %3560 = vmatmul.mubr.f32.gmra.mrb[112].mxu1 %v3275_v60  ;;  %v3053_v60 = vmul.f32 0.5, %v2991_v32  ;;  %v3802_v32 = vld [vmem:[%s7717_s11 + $0x28] sm:$0xff] }
 0x69f   :  { %3565 = vmatprep.mubr.f32.mxu1 %v3280_v31  ;;  %v3282_v31 = vmul.f32 %v3226_v63, %v3058_v59  ;;  %v4635_v10 = vpack.c.bf16 %v3802_v32, %v3801_v49  ;;  %v8101_v59 = vld [vmem:[#allocation13_spill] sm:$0xff] }
 0x6a0   :  { %v3277_v6 = vmul.f32 %v3221_v57, %v3053_v60  ;;  %v3812_v57 = vld [vmem:[%s7717_s11 + $0x78] sm:$0xff]  ;;  %v4009_v60 = vld [vmem:[%s7716_s10 + $0x2] sm:$0x3] }
 0x6a1   :  { %v4655_v63 = vpack.c.bf16 %v3812_v57, %v3811_v3 }
 0x6a5   :  { %v5083_v43 = vpop.eup %5082 }
 0x6a6   :  { %3566 = vmatmul.mubr.f32.gmra.mrb[112].mxu1 %v3279_v33  ;;  %v3229_v39 = vadd.f32 1.0, %v5083_v43  ;;  %v3814_v33 = vld [vmem:[%s7717_s11 + $0x88] sm:$0xff] }
 0x6a7   :  { %3571 = vmatprep.mubr.f32.mxu1 %v3284_v13  ;;  %v4625_v48 = vpack.c.bf16 %v3814_v33, %v3813_v23  ;;  %v3798_v13 = vld [vmem:[%s7717_s11 + $0x8] sm:$0xff] }
 0x6a8   :  { %v3285_v46 = vmul.f32 %v3229_v39, %v3061_v0  ;;  %v4627_v47 = vpack.c.bf16 %v3798_v13, %v3797_v61  ;;  %v8104_v43 = vld [vmem:[#allocation28_spill] sm:$0xff] }
 0x6a9   :  { %4626 = vmatprep.subr.bf16.mxu0 %v4625_v48 }
 0x6aa   :  { %3572 = vmatmul.mubr.f32.gmra.mrb[114].mxu1 %v3283_v62  ;;  %v3817_v62 = vld [vmem:[%s7717_s11 + $0xa0] sm:$0xff]  ;;  %4628 = vmatpush3.bf16.msra.mxu0 %v4627_v47 }
 0x6ab   :  { %3690 = vmatprep.mubr.f32.mxu1 %v3266_v50  ;;  %v4631_v50 = vpack.c.bf16 %v3800_v20, %v3799_v29  ;;  %4630 = vmatprep.subr.bf16.mxu0 %v4629_v52  ;;  %v4633_v22 = vpack.c.bf16 %v3818_v4, %v3817_v62 }
 0x6ae   :  { %3691 = vmatmul.mubr.f32.vlgmr.msra.gmra.mrb[116].mxu1 %v3265_v12  ;;  %v3819_v12 = vld [vmem:[%s7717_s11 + $0xb0] sm:$0xff]  ;;  %4632 = vmatpush3.bf16.msra.mxu0 %v4631_v50 }
 0x6af   :  { %3696 = vmatprep.mubr.f32.mxu1 %v3270_v1  ;;  %4634 = vmatprep.subr.bf16.mxu0 %v4633_v22  ;;  %v4637_v1 = vpack.c.bf16 %v3820_v56, %v3819_v12 }
 0x6b2   :  { %4636 = vmatpush3.bf16.msra.mxu0 %v4635_v10 }
 0x6b3   :  { %4638 = vmatprep.subr.bf16.mxu0 %v4637_v1 }
 0x6b6   :  { %3697 = vmatmul.mubr.f32.gmra.mrb[116].mxu1 %v3269_v17  ;;  %4640 = vmatpush3.bf16.msra.mxu0 %v4639_v18  ;;  %v3823_v17 = vld [vmem:[%s7717_s11 + $0xd0] sm:$0xff] }
 0x6b7   :  { %3702 = vmatprep.mubr.f32.mxu1 %v3274_v51  ;;  %4642 = vmatprep.subr.bf16.mxu0 %v4641_v53  ;;  %v3807_v51 = vld [vmem:[%s7717_s11 + $0x50] sm:$0xff]  ;;  %v4645_v45 = vpack.c.bf16 %v3824_v15, %v3823_v17 }
 0x6b8   :  { %v4647_v36 = vpack.c.bf16 %v3808_v44, %v3807_v51 }
 0x6ba   :  { %4644 = vmatpush3.bf16.msra.mxu0 %v4643_v41 }
 0x6bb   :  { %4646 = vmatprep.subr.bf16.mxu0 %v4645_v45  ;;  %v8105_v45 = vld [vmem:[#allocation46_spill] sm:$0xff] }
 0x6be   :  { %3703 = vmatmul.mubr.f32.gmra.mrb[116].mxu1 %v3273_v58  ;;  %v3828_v58 = vld [vmem:[%s7717_s11 + $0xf8] sm:$0xff]  ;;  %4648 = vmatpush3.bf16.msra.mxu0 %v4647_v36 }
 0x6bf   :  { %3708 = vmatprep.mubr.f32.mxu1 %v3278_v14  ;;  %4650 = vmatprep.subr.bf16.mxu0 %v4649_v42  ;;  %v4653_v14 = vpack.c.bf16 %v3828_v58, %v3827_v11 }
 0x6c2   :  { %4652 = vmatpush3.bf16.msra.mxu0 %v4651_v24 }
 0x6c3   :  { %4654 = vmatprep.subr.bf16.mxu0 %v4653_v14 }
 0x6c6   :  { %3709 = vmatmul.mubr.f32.gmra.mrb[116].mxu1 %v3277_v6  ;;  %4656 = vmatpush3.bf16.msra.mxu0 %v4655_v63  ;;  %v3422_v6 = vrot.slane %v4009_v60, %v8101_v59 }
 0x6c7   :  { %3714 = vmatprep.mubr.f32.mxu1 %v3282_v31  ;;  %v3426_v31 = vrot.slane %v4009_v60, %v8102_v19 }
 0x6c8   :  { %v4729_v27 = vadd.f32 %v8103_v26, %v3422_v6 }
 0x6c9   :  { %v4757_v55 = vadd.f32 %v8104_v43, %v3426_v31 }
 0x6ca   :  { %v4730_v8 = vadd.f32 %v4729_v27, %v3422_v6 }
 0x6cb   :  { %v4758_v7 = vadd.f32 %v4757_v55, %v3426_v31  ;;  %v3829_v55 = vld [vmem:[%s7718_s12] sm:$0x1] }
 0x6cc   :  { %v4731_v39 = vadd.f32 %v4730_v8, %v3422_v6 }
 0x6ce   :  { %3715 = vmatmul.mubr.f32.gmra.mrb[116].mxu1 %v3281_v37  ;;  %v4759_v37 = vadd.f32 %v4758_v7, %v3426_v31 }
 0x6cf   :  { %3720 = vmatprep.mubr.f32.mxu1 %v3286_v54  ;;  %v4732_v54 = vadd.f32 %v4731_v39, %v3422_v6 }
 0x6d1   :  { %v4733_v33 = vadd.f32 %v4732_v54, %v3422_v6 }
 0x6d2   :  { %3721 = vmatmul.mubr.f32.gmra.mrb[114].mxu1 %v3285_v46  ;;  %v4760_v46 = vadd.f32 %v4759_v37, %v3426_v31 }
 0x6d3   :  { %v4734_v48 = vadd.f32 %v4733_v33, %v3422_v6 }
 0x6d4   :  { %v4761_v61 = vadd.f32 %v4760_v46, %v3426_v31 }
 0x6d5   :  { %v4735_v34 = vadd.f32 %v4734_v48, %v3422_v6 }
 0x6d6   :  { %v4762_v13 = vadd.f32 %v4761_v61, %v3426_v31 }
 0x6d7   :  { %v4736_v47 = vadd.f32 %v4735_v34, %v3422_v6 }
 0x6d8   :  { %v4763_v5 = vadd.f32 %v4762_v13, %v3426_v31 }
 0x6d9   :  { %v4737_v29 = vadd.f32 %v4736_v47, %v3422_v6 }
 0x6da   :  { %v4764_v52 = vadd.f32 %v4763_v5, %v3426_v31 }
 0x6db   :  { %v4738_v62 = vadd.f32 %v4737_v29, %v3422_v6 }
 0x6dc   :  { %v4765_v20 = vadd.f32 %v4764_v52, %v3426_v31 }
 0x6dd   :  { %v4739_v50 = vadd.f32 %v4738_v62, %v3422_v6 }
 0x6de   :  { %v4766_v4 = vadd.f32 %v4765_v20, %v3426_v31 }
 0x6df   :  { %v4740_v49 = vadd.f32 %v4739_v50, %v3422_v6 }
 0x6e0   :  { %v4767_v22 = vadd.f32 %v4766_v4, %v3426_v31 }
 0x6e1   :  { %v4741_v12 = vadd.f32 %v4740_v49, %v3422_v6 }
 0x6e2   :  { %v4768_v32 = vadd.f32 %v4767_v22, %v3426_v31 }
 0x6e4   :  { %v4769_v10 = vadd.f32 %v4768_v32, %v3426_v31 }
 0x74f   :  { %v3686_v0 = vpop.f32.mrb[112].mxu0 }
 0x750   :  { %v3688_v23 = vpop.f32.mrb[113].mxu0 }
 0x779   :  { %v3567_v56 = vpop.f32.mrb[112].mxu1 }
 0x77a   :  { %v4742_v1 = vadd.f32 %v4741_v12, %v3567_v56  ;;  %v3569_v9 = vpop.f32.mrb[113].mxu1 }
 0x77b   :  { %v4770_v28 = vadd.f32 %v4769_v10, %v3569_v9 }
 0x77c   :  { %v4743_v18 = vadd.f32 %v4742_v1, %v3686_v0 }
 0x77d   :  { %v4771_v40 = vadd.f32 %v4770_v28, %v3688_v23 }
 0x7a1   :  { %v3716_v30 = vpop.f32.mrb[116].mxu1 }
 0x7a2   :  { %v4744_v2 = vadd.f32 %v4743_v18, %v3716_v30  ;;  %v3718_v53 = vpop.f32.mrb[117].mxu1 }
 0x7a3   :  { %v4772_v35 = vadd.f32 %v4771_v40, %v3718_v53 }
 0x7a5   :  { %v3722_v41 = vpop.f32.mrb[114].mxu1 }
 0x7a6   :  { %v4773_v17 = vadd.f32 %v3722_v41, %v3422_v6  ;;  %v3724_v15 = vpop.f32.mrb[115].mxu1 }
 0x7a7   :  { %v4774_v51 = vadd.f32 %v3724_v15, %v3426_v31 }
 0x7a8   :  { %v3753_v44 = vadd.f32 %v4773_v17, %v8105_v45 }
 0x7a9   :  { %v3754_v25 = vadd.f32 %v4774_v51, %v8106_v38 }
 0x7aa   :  { %v3767_v36 = vsel %vm450_vm1, %v3753_v44, 0.0 }
 0x7ab   :  { %v3768_v42 = vadd.f32 %v4744_v2, %v3767_v36  ;;  %v3787_v21 = vsel %vm450_vm1, %v3754_v25, 0.0 }
 0x7ac   :  { %v3788_v16 = vadd.f32 %v4772_v35, %v3787_v21 }
 0x7ad   :  { %v3769_v11 = vrot.slane %v3768_v42, 4 }
 0x7ae   :  { %v3789_v58 = vrot.slane %v3788_v16, 4 }
 0x7af   :  { %v3770_v24 = vadd.f32 %v3769_v11, %v3768_v42 }
 0x7b0   :  { %v3790_v14 = vadd.f32 %v3789_v58, %v3788_v16 }
 0x7b1   :  { %v3771_v3 = vrot.slane %v3770_v24, 2 }
 0x7b2   :  { %v3791_v57 = vrot.slane %v3790_v14, 2 }
 0x7b3   :  { %v3772_v63 = vadd.f32 %v3771_v3, %v3770_v24 }
 0x7b4   :  { %v3792_v60 = vadd.f32 %v3791_v57, %v3790_v14 }
 0x7b5   :  { %v3773_v59 = vrot.slane %v3772_v63, 1 }
 0x7b6   :  { %v3793_v6 = vrot.slane %v3792_v60, 1 }
 0x7b7   :  { %v3774_v19 = vadd.f32 %v3773_v59, %v3772_v63 }
 0x7b8   :  { %v3794_v31 = vadd.f32 %v3793_v6, %v3792_v60 }
 0x7b9   :  { %v3795_v27 = vmul.f32 0.009090909, %v3774_v19 }
 0x7ba   :  { %v3796_v26 = vmul.f32 0.009090909, %v3794_v31 }
 0x7bc   :  { %3894 = vmatprep.mubr.f32.mxu0 %v3796_v26 }
 0x7bd   :  { %3895 = vmatmul.mubr.f32.vlgmr.msra.gmra.mrb[114].mxu0 %v3795_v27 }
 0x890   :  { %v4042_v43 = vpop.f32.mrb[114].mxu0 }
 0x891   :  { %v4043_v8 = vpop.f32.mrb[115].mxu0 }
 0x892   :  { %v4044_v7 = vadd.f32 %v4043_v8, %v4042_v43 }
 0x894   :  { %v3897_v39 = vadd.f32 %v4044_v7, %v3829_v55 }
 0x896   :  { %3901 = vst.msk [vmem:[#allocation7] sm:$0x1] %vm3900_vm5, %v3897_v39 }
 0x897   :  { %5139 = shalt.err (!%p5136_p6)
}
 0x898   :  { %s5140_s12 = scalar_lea.hbm %s7719_s13, 16 }
 0x899   :  { %p5141_p7 = scmp.ne.s32.totalorder %s7719_s13, %s5140_s12  ;;  %p5144_p8 = scmp.lt.u32.totalorder %s5140_s12, %s7719_s13 }
 0x89b   :  { %p5146_p9 = pnand %p5144_p8, %p5141_p7 }
 0x89d   :  { %5149 = shalt.err (!%p5146_p9)
}
 0x89e   :  { %3911 = dma.vmem_to_hbm [thread:$0]  %s3909_s28, 16, %s7719_s13, [#allocation4]  }
 0x89f   :  { %5154 = dma.done.wait [#allocation4], 16  }
 0x8a0   :  { %5155 = vsyncadd [#allocation4], 4294967280 }
 0x8a1   :  { %3915 = vsyncpa [#allocation3], 1 }
 0x8a2   :  { %3916 = vsyncpa [#allocation6], 1 }
 0x8a3   :  { %3917 = vsyncpa [#allocation4], 1 }

</bundles_post_ra>
